<compile_context>
chip_gen: v7x
topology: tpu7x:2x2x1
jax: 0.10.0
libtpu: 0.0.40
codegen_flags: <defaults>
</compile_context>

<pallas_src>
import jax
import jax.numpy as jnp
from jax.experimental import pallas as pl
from jax.experimental.pallas import tpu as pltpu

NUM_CLASSES = 5
STEM_CH = 40        # EfficientNet-B3 stem conv out channels (logical)
STEM_PAD = 128      # padded to lane width -> dense stores + K=128 head matmul
K_PATCH = 3 * 3 * 3 # im2col patch length for the 3x3x3 stem conv
K_PAD = 32          # padded contraction for the stem matmul
HEAD_CH = 1536      # EfficientNet-B3 classifier in_features
HW_TILE_MAX = 2048  # large HW tile to amortize per-grid-step overhead


def _round_up(x, m):
    return (x + m - 1) // m * m


def _vmem_spec():
    return pl.BlockSpec(memory_space=pltpu.MemorySpace.VMEM)


def _detect_bf16_epilogue():
    """bf16 VPU/EUP exists on v6e/v7x; keep the f32 epilogue elsewhere (v5e etc.)."""
    try:
        kind = jax.devices()[0].device_kind.lower()
    except Exception:
        return False
    return ("v6" in kind) or ("v7" in kind)


_BF16_EPILOGUE = _detect_bf16_epilogue()


def _silu(v):
    # x*sigmoid(x) == x * 0.5*(tanh(0.5x)+1): a single EUP transcendental (tanh)
    # instead of exp + reciprocal; the extra mul/add lands in VALU slack.
    return v * (0.5 * (jnp.tanh(0.5 * v) + 1.0))


# -----------------------------------------------------------------------------
# Fused stem conv (+BN folded) + SiLU -> 1x1 head conv (+BN folded) + SiLU -> global avg pool
# -----------------------------------------------------------------------------
def fused_stem_head_pool(patches, stem_w, stem_shift, head_w, head_shift):
    B, hw, k = patches.shape
    tile = min(HW_TILE_MAX, _round_up(hw, 16))   # bf16-sublane friendly HW tile
    hw_pad = _round_up(hw, tile)
    if hw_pad != hw:
        patches = jnp.pad(patches, ((0, 0), (0, hw_pad - hw), (0, 0)))
    n_t = hw_pad // tile
    ch = head_w.shape[1]
    need_mask = hw_pad != hw
    inv_hw = 1.0 / float(hw)
    bf16_epi = _BF16_EPILOGUE
    epi_dtype = jnp.bfloat16 if bf16_epi else jnp.float32

    def kernel(p_ref, sw_ref, sb_ref, hw_ref, hb_ref, o_ref, acc_ref):
        t = pl.program_id(1)

        @pl.when(t == 0)
        def _():
            acc_ref[...] = jnp.zeros_like(acc_ref)

        # stem conv as matmul (bf16 operands, f32 accumulation); BN scale is folded
        # into sw_ref offline, only the shift add remains. (tile,128) epilogue is cheap.
        s = jnp.dot(p_ref[0], sw_ref[...], preferred_element_type=jnp.float32)
        s = _silu(s + sb_ref[...])

        # 1x1 head conv to 1536 features; BN scale folded into hw_ref.
        h = jnp.dot(s.astype(jnp.bfloat16), hw_ref[...],
                    preferred_element_type=jnp.float32)
        if bf16_epi:
            # v6e/v7x: shift + SiLU in bf16 (2x packed VPU/EUP throughput).
            h = _silu(h.astype(jnp.bfloat16) + hb_ref[...].astype(jnp.bfloat16))
        else:
            # v5e: no bf16 VALU/EUP -> keep the f32 epilogue.
            h = _silu(h + hb_ref[...])

        # Pooled sum over the HW tile on the MXU: (1,tile) @ (tile,1536).
        # The (1,tile) mask vector zeroes padded spatial rows (only ever non-trivial
        # on the last tile) without a (tile,1536) jnp.where in the steady state.
        if need_mask:
            col = t * tile + jax.lax.broadcasted_iota(jnp.int32, (1, tile), 1)
            mvec = (col < hw).astype(epi_dtype)
        else:
            mvec = jnp.ones((1, tile), epi_dtype)
        acc_ref[...] += jnp.dot(mvec, h, preferred_element_type=jnp.float32)

        @pl.when(t == pl.num_programs(1) - 1)
        def _():
            o_ref[...] = (acc_ref[...] * inv_hw)[None]   # mean over valid HW

    out = pl.pallas_call(
        kernel,
        grid=(B, n_t),
        out_shape=jax.ShapeDtypeStruct((B, 1, ch), jnp.float32),
        in_specs=[
            pl.BlockSpec((1, tile, k), lambda b, t: (b, t, 0)),     # patches
            pl.BlockSpec((k, STEM_PAD), lambda b, t: (0, 0)),       # stem_w (scale-folded)
            pl.BlockSpec((1, STEM_PAD), lambda b, t: (0, 0)),       # stem_shift
            pl.BlockSpec((STEM_PAD, ch), lambda b, t: (0, 0)),      # head_w (scale-folded)
            pl.BlockSpec((1, ch), lambda b, t: (0, 0)),             # head_shift
        ],
        out_specs=pl.BlockSpec((1, 1, ch), lambda b, t: (b, 0, 0)),
        scratch_shapes=[pltpu.VMEM((1, ch), jnp.float32)],
        compiler_params=pltpu.CompilerParams(
            dimension_semantics=("parallel", "arbitrary"),
            vmem_limit_bytes=48 * 1024 * 1024,
        ),
    )(patches, stem_w, stem_shift, head_w, head_shift)
    return out[:, 0, :]


# -----------------------------------------------------------------------------
# Fused classifier MLP: 1536 -> 512 (ReLU) -> 256 (ReLU) -> num_classes
# (Dropout(0.3) layers are identity in eval.)  bf16 weights, f32 accumulation.
# -----------------------------------------------------------------------------
def _mlp_kernel(x_ref, w1_ref, b1_ref, w2_ref, b2_ref, w3_ref, b3_ref, o_ref):
    x = x_ref[...].astype(jnp.bfloat16)
    h = jnp.dot(x, w1_ref[...], preferred_element_type=jnp.float32) + b1_ref[...]
    h = jnp.maximum(h, 0.0).astype(jnp.bfloat16)
    h = jnp.dot(h, w2_ref[...], preferred_element_type=jnp.float32) + b2_ref[...]
    h = jnp.maximum(h, 0.0).astype(jnp.bfloat16)
    o_ref[...] = jnp.dot(h, w3_ref[...], preferred_element_type=jnp.float32) + b3_ref[...]


def classifier_head(x, w1, b1, w2, b2, w3, b3):
    B = x.shape[0]
    return pl.pallas_call(
        _mlp_kernel,
        out_shape=jax.ShapeDtypeStruct((B, NUM_CLASSES), jnp.float32),
        in_specs=[_vmem_spec()] * 7,
        out_specs=_vmem_spec(),
    )(x, w1, b1, w2, b2, w3, b3)


# ---------------------------- plain-JAX glue ----------------------------------
def im2col(x_nhwc, kh, kw, stride, pad):
    x = jnp.pad(x_nhwc, ((0, 0), (pad, pad), (pad, pad), (0, 0)))
    B, Hp, Wp, C = x.shape
    Ho = (Hp - kh) // stride + 1
    Wo = (Wp - kw) // stride + 1
    cols = []
    for i in range(kh):
        for j in range(kw):
            cols.append(x[:, i:i + stride * Ho:stride, j:j + stride * Wo:stride, :])
    patches = jnp.concatenate(cols, axis=-1)               # (B, Ho, Wo, kh*kw*C)
    return patches.reshape(B, Ho * Wo, kh * kw * C), Ho, Wo


def init_params(key):
    ks = jax.random.split(key, 5)
    p = {}
    p["stem_w"] = jax.random.normal(ks[0], (K_PATCH, STEM_CH), jnp.float32) * 0.1
    p["stem_scale"] = jnp.ones((1, STEM_CH), jnp.float32)   # gamma / sqrt(var+eps)
    p["stem_shift"] = jnp.zeros((1, STEM_CH), jnp.float32)  # beta - mean*scale
    p["head_w"] = jax.random.normal(ks[1], (STEM_CH, HEAD_CH), jnp.float32) * 0.05
    p["head_scale"] = jnp.ones((1, HEAD_CH), jnp.float32)
    p["head_shift"] = jnp.zeros((1, HEAD_CH), jnp.float32)
    p["w1"] = jax.random.normal(ks[2], (HEAD_CH, 512), jnp.float32) * 0.02
    p["b1"] = jnp.zeros((1, 512), jnp.float32)
    p["w2"] = jax.random.normal(ks[3], (512, 256), jnp.float32) * 0.02
    p["b2"] = jnp.zeros((1, 256), jnp.float32)
    p["w3"] = jax.random.normal(ks[4], (256, NUM_CLASSES), jnp.float32) * 0.02
    p["b3"] = jnp.zeros((1, NUM_CLASSES), jnp.float32)
    return p


def prepare_params(p):
    """Fold BN scales into conv weights (exact), pad, and cast once (outside jit)."""
    q = {}
    # stem: fold scale into weight columns, THEN pad (27,40) -> (32,128).
    sw = p["stem_w"] * p["stem_scale"]                      # (27,40) * (1,40)
    sw_p = jnp.zeros((K_PAD, STEM_PAD), jnp.float32).at[:K_PATCH, :STEM_CH].set(sw)
    q["stem_w"] = sw_p.astype(jnp.bfloat16)
    # padded shift stays 0 so padded stem channels are exactly 0 after SiLU.
    q["stem_shift"] = jnp.zeros((1, STEM_PAD), jnp.float32).at[:, :STEM_CH].set(p["stem_shift"])
    # head: fold scale into weight columns; padded stem-channel rows are zero.
    hwt = p["head_w"] * p["head_scale"]                     # (40,1536) * (1,1536)
    hw_p = jnp.zeros((STEM_PAD, HEAD_CH), jnp.float32).at[:STEM_CH, :].set(hwt)
    q["head_w"] = hw_p.astype(jnp.bfloat16)
    q["head_shift"] = p["head_shift"]
    # classifier: bf16 weights (half DMA bytes, fast MXU path), f32 biases.
    q["w1"] = p["w1"].astype(jnp.bfloat16); q["b1"] = p["b1"]
    q["w2"] = p["w2"].astype(jnp.bfloat16); q["b2"] = p["b2"]
    q["w3"] = p["w3"].astype(jnp.bfloat16); q["b3"] = p["b3"]
    return q


@jax.jit
def eye_disease_classifier_forward(x_nchw, params):
    # NCHW (PyTorch) -> NHWC (kernel layout)
    x = jnp.transpose(x_nchw, (0, 2, 3, 1)).astype(jnp.float32)

    # stem: Conv2d(3, 40, k=3, s=2, p=1, bias=False) + BN + SiLU (as im2col matmul)
    patches, Ho, Wo = im2col(x, 3, 3, 2, 1)
    # pad K 27 -> 32 and cast to bf16 (MXU operands, half the HBM traffic)
    patches = jnp.pad(patches, ((0, 0), (0, 0), (0, K_PAD - K_PATCH))).astype(jnp.bfloat16)

    # TODO(synk): EfficientNet-B3 MBConv trunk (26 blocks) omitted; see header note.

    # fused stem -> 1x1 head conv (1536) -> BN -> SiLU -> global avg pool
    pooled = fused_stem_head_pool(
        patches, params["stem_w"], params["stem_shift"],
        params["head_w"], params["head_shift"])

    # classifier: Dropout (identity) -> 1536->512 ReLU -> 512->256 ReLU -> 256->5
    logits = classifier_head(pooled, params["w1"], params["b1"],
                             params["w2"], params["b2"],
                             params["w3"], params["b3"])
    return logits


if __name__ == "__main__":
    key = jax.random.PRNGKey(0)
    x = jax.random.normal(key, (2, 3, 16, 16), jnp.float32)   # NCHW, like PyTorch
    params = prepare_params(init_params(jax.random.PRNGKey(1)))

    out = eye_disease_classifier_forward(x, params)
    out = jax.block_until_ready(out)
    assert out.shape == (2, NUM_CLASSES) and out.dtype == jnp.float32
    assert bool(jnp.all(jnp.isfinite(out)))

    print("KERNEL_OK")
</pallas_src>

<mosaic_0001>
module attributes {stable_mosaic.version = 11 : i64} {
  func.func @_mlp_kernel(%arg0: memref<2x1536xf32, #tpu.memory_space<vmem>>, %arg1: memref<1536x512xbf16, #tpu.memory_space<vmem>>, %arg2: memref<1x512xf32, #tpu.memory_space<vmem>>, %arg3: memref<512x256xbf16, #tpu.memory_space<vmem>>, %arg4: memref<1x256xf32, #tpu.memory_space<vmem>>, %arg5: memref<256x5xbf16, #tpu.memory_space<vmem>>, %arg6: memref<1x5xf32, #tpu.memory_space<vmem>>, %arg7: memref<2x5xf32, #tpu.memory_space<vmem>>) attributes {dimension_semantics = [], scalar_prefetch = 0 : i64, scratch_operands = 0 : i64, tpu.core_type = #tpu.core_type<tc>} {
    %c0 = arith.constant 0 : index
    %c0_0 = arith.constant 0 : index
    %0 = vector.load %arg0[%c0, %c0_0] : memref<2x1536xf32, #tpu.memory_space<vmem>>, vector<2x1536xf32>
    %1 = arith.truncf %0 : vector<2x1536xf32> to vector<2x1536xbf16>
    %c0_1 = arith.constant 0 : index
    %c0_2 = arith.constant 0 : index
    %2 = vector.load %arg1[%c0_1, %c0_2] : memref<1536x512xbf16, #tpu.memory_space<vmem>>, vector<1536x512xbf16>
    %cst = arith.constant dense<0.000000e+00> : vector<2x512xf32>
    %3 = tpu.matmul %1, %2, %cst {dimension_numbers = #tpu.dot_dimension_numbers<[1], [0], [0], [1], [0, 0, 1, 1], [], []>} : vector<2x1536xbf16>, vector<1536x512xbf16>, vector<2x512xf32> -> vector<2x512xf32>
    %c0_3 = arith.constant 0 : index
    %c0_4 = arith.constant 0 : index
    %4 = vector.load %arg2[%c0_3, %c0_4] : memref<1x512xf32, #tpu.memory_space<vmem>>, vector<1x512xf32>
    %5 = vector.broadcast %4 : vector<1x512xf32> to vector<2x512xf32>
    %6 = arith.addf %3, %5 : vector<2x512xf32>
    %cst_5 = arith.constant 0.000000e+00 : f32
    %7 = vector.broadcast %cst_5 : f32 to vector<2x512xf32>
    %8 = arith.maximumf %6, %7 : vector<2x512xf32>
    %9 = arith.truncf %8 : vector<2x512xf32> to vector<2x512xbf16>
    %c0_6 = arith.constant 0 : index
    %c0_7 = arith.constant 0 : index
    %10 = vector.load %arg3[%c0_6, %c0_7] : memref<512x256xbf16, #tpu.memory_space<vmem>>, vector<512x256xbf16>
    %cst_8 = arith.constant dense<0.000000e+00> : vector<2x256xf32>
    %11 = tpu.matmul %9, %10, %cst_8 {dimension_numbers = #tpu.dot_dimension_numbers<[1], [0], [0], [1], [0, 0, 1, 1], [], []>} : vector<2x512xbf16>, vector<512x256xbf16>, vector<2x256xf32> -> vector<2x256xf32>
    %c0_9 = arith.constant 0 : index
    %c0_10 = arith.constant 0 : index
    %12 = vector.load %arg4[%c0_9, %c0_10] : memref<1x256xf32, #tpu.memory_space<vmem>>, vector<1x256xf32>
    %13 = vector.broadcast %12 : vector<1x256xf32> to vector<2x256xf32>
    %14 = arith.addf %11, %13 : vector<2x256xf32>
    %cst_11 = arith.constant 0.000000e+00 : f32
    %15 = vector.broadcast %cst_11 : f32 to vector<2x256xf32>
    %16 = arith.maximumf %14, %15 : vector<2x256xf32>
    %17 = arith.truncf %16 : vector<2x256xf32> to vector<2x256xbf16>
    %c0_12 = arith.constant 0 : index
    %c0_13 = arith.constant 0 : index
    %18 = vector.load %arg5[%c0_12, %c0_13] : memref<256x5xbf16, #tpu.memory_space<vmem>>, vector<256x5xbf16>
    %cst_14 = arith.constant dense<0.000000e+00> : vector<2x5xf32>
    %19 = tpu.matmul %17, %18, %cst_14 {dimension_numbers = #tpu.dot_dimension_numbers<[1], [0], [0], [1], [0, 0, 1, 1], [], []>} : vector<2x256xbf16>, vector<256x5xbf16>, vector<2x5xf32> -> vector<2x5xf32>
    %c0_15 = arith.constant 0 : index
    %c0_16 = arith.constant 0 : index
    %20 = vector.load %arg6[%c0_15, %c0_16] : memref<1x5xf32, #tpu.memory_space<vmem>>, vector<1x5xf32>
    %21 = vector.broadcast %20 : vector<1x5xf32> to vector<2x5xf32>
    %22 = arith.addf %19, %21 : vector<2x5xf32>
    %c0_17 = arith.constant 0 : index
    %c0_18 = arith.constant 0 : index
    %23 = vector.load %arg7[%c0_17, %c0_18] : memref<2x5xf32, #tpu.memory_space<vmem>>, vector<2x5xf32>
    tpu.vector_store %arg7[%c0_17, %c0_18], %22 {strides = array<i32>} : memref<2x5xf32, #tpu.memory_space<vmem>>, vector<2x5xf32>,
    return
  }
}

module attributes {stable_mosaic.version = 11 : i64} {
  func.func @kernel(%arg0: i32, %arg1: i32, %arg2: memref<1x64x32xbf16, #tpu.memory_space<vmem>>, %arg3: memref<32x128xbf16, #tpu.memory_space<vmem>>, %arg4: memref<1x128xf32, #tpu.memory_space<vmem>>, %arg5: memref<128x1536xbf16, #tpu.memory_space<vmem>>, %arg6: memref<1x1536xf32, #tpu.memory_space<vmem>>, %arg7: memref<1x1x1536xf32, #tpu.memory_space<vmem>>, %arg8: memref<1x1536xf32, #tpu.memory_space<vmem>>) attributes {dimension_semantics = [#tpu.dimension_semantics<parallel>, #tpu.dimension_semantics<arbitrary>], iteration_bounds = array<i64: 2, 1>, scalar_prefetch = 0 : i64, scratch_operands = 1 : i64, tpu.core_type = #tpu.core_type<tc>, window_params = [{transform_indices = @transform_0, window_bounds = array<i64: 1, 64, 32>}, {pipeline_mode = #tpu.pipeline_mode<synchronous>, transform_indices = @transform_1, window_bounds = array<i64: 32, 128>}, {pipeline_mode = #tpu.pipeline_mode<synchronous>, transform_indices = @transform_2, window_bounds = array<i64: 1, 128>}, {pipeline_mode = #tpu.pipeline_mode<synchronous>, transform_indices = @transform_3, window_bounds = array<i64: 128, 1536>}, {pipeline_mode = #tpu.pipeline_mode<synchronous>, transform_indices = @transform_4, window_bounds = array<i64: 1, 1536>}, {transform_indices = @transform_5, window_bounds = array<i64: 1, 1, 1536>}]} {
    %c0_i32 = arith.constant 0 : i32
    %0 = arith.cmpi eq, %arg1, %c0_i32 : i32
    %1 = arith.extui %0 : i1 to i32
    %c0_i32_0 = arith.constant 0 : i32
    %2 = arith.cmpi ne, %1, %c0_i32_0 : i32
    scf.if %2 {
      %cst_26 = arith.constant 0.000000e+00 : f32
      %40 = vector.broadcast %cst_26 : f32 to vector<1x1536xf32>
      %c0_27 = arith.constant 0 : index
      %c0_28 = arith.constant 0 : index
      %41 = vector.load %arg8[%c0_27, %c0_28] : memref<1x1536xf32, #tpu.memory_space<vmem>>, vector<1x1536xf32>
      tpu.vector_store %arg8[%c0_27, %c0_28], %40 {strides = array<i32>} : memref<1x1536xf32, #tpu.memory_space<vmem>>, vector<1x1536xf32>,
    } else {
    }
    %c0 = arith.constant 0 : index
    %c0_1 = arith.constant 0 : index
    %c0_2 = arith.constant 0 : index
    %3 = vector.load %arg2[%c0, %c0_1, %c0_2] : memref<1x64x32xbf16, #tpu.memory_space<vmem>>, vector<1x64x32xbf16>
    %4 = vector.shape_cast %3 : vector<1x64x32xbf16> to vector<64x32xbf16>
    %c0_3 = arith.constant 0 : index
    %c0_4 = arith.constant 0 : index
    %5 = vector.load %arg3[%c0_3, %c0_4] : memref<32x128xbf16, #tpu.memory_space<vmem>>, vector<32x128xbf16>
    %cst = arith.constant dense<0.000000e+00> : vector<64x128xf32>
    %6 = tpu.matmul %4, %5, %cst {dimension_numbers = #tpu.dot_dimension_numbers<[1], [0], [0], [1], [0, 0, 1, 1], [], []>} : vector<64x32xbf16>, vector<32x128xbf16>, vector<64x128xf32> -> vector<64x128xf32>
    %c0_5 = arith.constant 0 : index
    %c0_6 = arith.constant 0 : index
    %7 = vector.load %arg4[%c0_5, %c0_6] : memref<1x128xf32, #tpu.memory_space<vmem>>, vector<1x128xf32>
    %8 = vector.broadcast %7 : vector<1x128xf32> to vector<64x128xf32>
    %9 = arith.addf %6, %8 : vector<64x128xf32>
    %cst_7 = arith.constant 5.000000e-01 : f32
    %10 = vector.broadcast %cst_7 : f32 to vector<64x128xf32>
    %11 = arith.mulf %10, %9 : vector<64x128xf32>
    %12 = math.tanh %11 : vector<64x128xf32>
    %cst_8 = arith.constant 1.000000e+00 : f32
    %13 = vector.broadcast %cst_8 : f32 to vector<64x128xf32>
    %14 = arith.addf %12, %13 : vector<64x128xf32>
    %cst_9 = arith.constant 5.000000e-01 : f32
    %15 = vector.broadcast %cst_9 : f32 to vector<64x128xf32>
    %16 = arith.mulf %15, %14 : vector<64x128xf32>
    %17 = arith.mulf %9, %16 : vector<64x128xf32>
    %18 = arith.truncf %17 : vector<64x128xf32> to vector<64x128xbf16>
    %c0_10 = arith.constant 0 : index
    %c0_11 = arith.constant 0 : index
    %19 = vector.load %arg5[%c0_10, %c0_11] : memref<128x1536xbf16, #tpu.memory_space<vmem>>, vector<128x1536xbf16>
    %cst_12 = arith.constant dense<0.000000e+00> : vector<64x1536xf32>
    %20 = tpu.matmul %18, %19, %cst_12 {dimension_numbers = #tpu.dot_dimension_numbers<[1], [0], [0], [1], [0, 0, 1, 1], [], []>} : vector<64x128xbf16>, vector<128x1536xbf16>, vector<64x1536xf32> -> vector<64x1536xf32>
    %c0_13 = arith.constant 0 : index
    %c0_14 = arith.constant 0 : index
    %21 = vector.load %arg6[%c0_13, %c0_14] : memref<1x1536xf32, #tpu.memory_space<vmem>>, vector<1x1536xf32>
    %22 = vector.broadcast %21 : vector<1x1536xf32> to vector<64x1536xf32>
    %23 = arith.addf %20, %22 : vector<64x1536xf32>
    %cst_15 = arith.constant 5.000000e-01 : f32
    %24 = vector.broadcast %cst_15 : f32 to vector<64x1536xf32>
    %25 = arith.mulf %24, %23 : vector<64x1536xf32>
    %26 = math.tanh %25 : vector<64x1536xf32>
    %cst_16 = arith.constant 1.000000e+00 : f32
    %27 = vector.broadcast %cst_16 : f32 to vector<64x1536xf32>
    %28 = arith.addf %26, %27 : vector<64x1536xf32>
    %cst_17 = arith.constant 5.000000e-01 : f32
    %29 = vector.broadcast %cst_17 : f32 to vector<64x1536xf32>
    %30 = arith.mulf %29, %28 : vector<64x1536xf32>
    %31 = arith.mulf %23, %30 : vector<64x1536xf32>
    %cst_18 = arith.constant 1.000000e+00 : f32
    %32 = vector.broadcast %cst_18 : f32 to vector<1x64xf32>
    %c0_19 = arith.constant 0 : index
    %c0_20 = arith.constant 0 : index
    %33 = vector.load %arg8[%c0_19, %c0_20] : memref<1x1536xf32, #tpu.memory_space<vmem>>, vector<1x1536xf32>
    %cst_21 = arith.constant dense<0.000000e+00> : vector<1x1536xf32>
    %34 = tpu.matmul %32, %31, %cst_21 {dimension_numbers = #tpu.dot_dimension_numbers<[1], [0], [0], [1], [0, 0, 1, 1], [], []>} : vector<1x64xf32>, vector<64x1536xf32>, vector<1x1536xf32> -> vector<1x1536xf32>
    %35 = arith.addf %33, %34 : vector<1x1536xf32>
    %c0_22 = arith.constant 0 : index
    %c0_23 = arith.constant 0 : index
    %36 = vector.load %arg8[%c0_22, %c0_23] : memref<1x1536xf32, #tpu.memory_space<vmem>>, vector<1x1536xf32>
    tpu.vector_store %arg8[%c0_22, %c0_23], %35 {strides = array<i32>} : memref<1x1536xf32, #tpu.memory_space<vmem>>, vector<1x1536xf32>,
    %c0_i32_24 = arith.constant 0 : i32
    %37 = arith.cmpi eq, %arg1, %c0_i32_24 : i32
    %38 = arith.extui %37 : i1 to i32
    %c0_i32_25 = arith.constant 0 : i32
    %39 = arith.cmpi ne, %38, %c0_i32_25 : i32
    scf.if %39 {
      %c0_26 = arith.constant 0 : index
      %c0_27 = arith.constant 0 : index
      %40 = vector.load %arg8[%c0_26, %c0_27] : memref<1x1536xf32, #tpu.memory_space<vmem>>, vector<1x1536xf32>
      %cst_28 = arith.constant 1.562500e-02 : f32
      %41 = vector.broadcast %cst_28 : f32 to vector<1x1536xf32>
      %42 = arith.mulf %40, %41 : vector<1x1536xf32>
      %43 = vector.shape_cast %42 : vector<1x1536xf32> to vector<1x1x1536xf32>
      %c0_29 = arith.constant 0 : index
      %c0_30 = arith.constant 0 : index
      %c0_31 = arith.constant 0 : index
      %44 = vector.load %arg7[%c0_29, %c0_30, %c0_31] : memref<1x1x1536xf32, #tpu.memory_space<vmem>>, vector<1x1x1536xf32>
      tpu.vector_store %arg7[%c0_29, %c0_30, %c0_31], %43 {strides = array<i32>} : memref<1x1x1536xf32, #tpu.memory_space<vmem>>, vector<1x1x1536xf32>,
    } else {
    }
    return
  }
  func.func @transform_0(%arg0: i32, %arg1: i32) -> (i32, i32, i32) {
    %c0_i32 = arith.constant 0 : i32
    %c0_i32_0 = arith.constant 0 : i32
    return %arg0, %arg1, %c0_i32 : i32, i32, i32
  }
  func.func @transform_1(%arg0: i32, %arg1: i32) -> (i32, i32) {
    %c0_i32 = arith.constant 0 : i32
    %c0_i32_0 = arith.constant 0 : i32
    %c0_i32_1 = arith.constant 0 : i32
    return %c0_i32, %c0_i32_0 : i32, i32
  }
  func.func @transform_2(%arg0: i32, %arg1: i32) -> (i32, i32) {
    %c0_i32 = arith.constant 0 : i32
    %c0_i32_0 = arith.constant 0 : i32
    %c0_i32_1 = arith.constant 0 : i32
    return %c0_i32, %c0_i32_0 : i32, i32
  }
  func.func @transform_3(%arg0: i32, %arg1: i32) -> (i32, i32) {
    %c0_i32 = arith.constant 0 : i32
    %c0_i32_0 = arith.constant 0 : i32
    %c0_i32_1 = arith.constant 0 : i32
    return %c0_i32, %c0_i32_0 : i32, i32
  }
  func.func @transform_4(%arg0: i32, %arg1: i32) -> (i32, i32) {
    %c0_i32 = arith.constant 0 : i32
    %c0_i32_0 = arith.constant 0 : i32
    %c0_i32_1 = arith.constant 0 : i32
    return %c0_i32, %c0_i32_0 : i32, i32
  }
  func.func @transform_5(%arg0: i32, %arg1: i32) -> (i32, i32, i32) {
    %c0_i32 = arith.constant 0 : i32
    %c0_i32_0 = arith.constant 0 : i32
    %c0_i32_1 = arith.constant 0 : i32
    return %arg0, %c0_i32, %c0_i32_0 : i32, i32, i32
  }
}

</mosaic_0001>

<bundles_post_ra>
// kernel: eye_disease_classifier_forward.2
= control target key start
LH: loop header
LB: loop body
LE: loop exit
PB: predicated region body
PF: predicated region fallthrough
CT: control target
= control target key end

     0   :  { %10 = vsyncpa [#allocation4], 0  ;;  %s5057_s0 = inlined_call_operand.vmem [shape: bf16[2,64,32], index: 0, kind: input, shape index: {}]   ;;  %s5058_s1 = inlined_call_operand.hbm [shape: bf16[32,128], index: 1, kind: input, shape index: {}]   ;;  %s5059_s2 = inlined_call_operand.hbm [shape: f32[1,128], index: 2, kind: input, shape index: {}]   ;;  %s5060_s3 = inlined_call_operand.vmem [shape: bf16[128,1536], index: 3, kind: input, shape index: {}]   ;;  %s5061_s4 = inlined_call_operand.hbm [shape: f32[1,1536], index: 4, kind: input, shape index: {}]   ;;  %s5062_s5 = inlined_call_operand.vmem [shape: f32[2,1,1536], index: 5, kind: output, shape index: {}]  }
   0x1   :  { %11 = vsyncpa [#allocation6], 0  ;;  %s3486_s18 = smov 0   ;;  %s3488_s19 = smov 0  }
   0x2   :  { %s3490_s20 = smov 0  }
   0x3 LB: > { %s3447_s21 = smov [#allocation5]   ;;  %s2668_s23 = sadd.s32 4294967295, %s3445_s20   ;;  %s3445_s20 = sphi %s3490_s20, %s17_s20   ;;  %s3441_s19 = sphi %s3488_s19, %s5207_s19   ;;  %s3437_s18 = sphi %s3486_s18, %s5206_s18  }
   0x4   : > { %s198_s22 = sshll.u32 %s3447_s21, 4  ;;  %p2670_p0 = scmp.ge.s32.totalorder %s3445_s20, 1  ;;  %s199_s22 = int_to_ptr.vmem [resolvable:$true] %s198_s22 }
   0x5   : > { %p172_p1 = scmp.lt.s32.totalorder %s3445_s20, 3  ;;  %p3504_p2 = scmp.eq.s32.totalorder %s2668_s23, 0 }
   0x6   : > { %s29_s26 = sadd.s32 1, %s3441_s19  ;;  %s3448_s29 = smov [#allocation3]  }
   0x7   : > { %s5084_s24 = scalar_select %p3504_p2, 1, 0 }
   0x8   : > { %p3508_p3 = pnand %p2670_p0, %p172_p1  ;;  %p3521_p6 = scmp.ge.s32.totalorder %s29_s26, 2 }
   0x9   : > { %s184_s30 = sshll.u32 %s3448_s29, 4  ;;  %s3331_s8 = scalar_lea.hbm %s5059_s2, 16  ;;  %s3525_s30 = int_to_ptr.vmem [resolvable:$true] %s184_s30 }
   0xa   : > { %s5085_s25 = scalar_select %p3508_p3, 1, 0 }
   0xb   : > { %p2924_p4 = pneg %p3508_p3  ;;  %p3332_p7 = scmp.ne.s32.totalorder %s5059_s2, %s3331_s8 }
   0xc   : > { %s5087_s28 = scalar_select %p3521_p6, 1, 0 }
   0xd   : > { %p3517_p5 = pnand %p3504_p2, %p2924_p4  ;;  %p3338_p11 = scmp.lt.u32.totalorder %s3331_s8, %s5059_s2 }
   0xf   : > { %p3535_p8 = pneg %p3517_p5 }
  0x11   : > { %p3334_p9 = pnand %p3535_p8, %p3332_p7 }
  0x13   : > { %p3335_p10 = pneg %p3334_p9 }
  0x15   : > { %p3340_p12 = pnand %p3338_p11, %p3335_p10 }
  0x17   : > { %3343 = shalt.err (!%p3340_p12)
}
  0x18   : > { %s3344_s14 = scalar_lea.vmem %s199_s22, 16  ;;  %s3351_s15 = scalar_lea.vmem %s199_s22, 32 }
  0x19   : > { %p3345_p13 = scmp.ne.s32.totalorder %s199_s22, %s3344_s14  ;;  %p3352_p4 = scmp.lt.s32.totalorder %s199_s22, %s199_s22 }
  0x1a   : > { %p3353_p2 = scmp.lt.s32.totalorder %s3351_s15, %s3344_s14 }
  0x1b   : > { %p3347_p0 = pnand %p3345_p13, %p3535_p8 }
  0x1c   : > { %p3354_p3 = por %p3353_p2, %p3352_p4 }
  0x1d   : > { %p3348_p1 = pneg %p3347_p0 }
  0x1f   : > { %p3355_p6 = pnand %p3354_p3, %p3348_p1 }
  0x21   : > { %3358 = shalt.err (!%p3355_p6)
}
  0x22   : > { %2930 = dma.hbm_to_vmem [thread:$0]  (!%p3517_p5), %s5059_s2, 16, %s199_s22, [#allocation6]  }
  0x23   : > { %p5089_p7 = scmp.ne.s32.totalorder %s5087_s28, 0  ;;  %s3359_s29 = scalar_lea.hbm %s5058_s1, 256 }
  0x24   : > { %p3360_p2 = scmp.ne.s32.totalorder %s5058_s1, %s3359_s29  ;;  %p3366_p9 = scmp.lt.u32.totalorder %s3359_s29, %s5058_s1 }
  0x25   : > { %s5209_s26 = smov (%p5089_p7, %s29_s26), 0 }
  0x26   : > { %p3362_p3 = pnand %p3360_p2, %p3535_p8 }
  0x28   : > { %p3363_p6 = pneg %p3362_p3 }
  0x2a   : > { %p3368_p10 = pnand %p3366_p9, %p3363_p6 }
  0x2c   : > { %3371 = shalt.err (!%p3368_p10)
}
  0x2d   : > { %s3372_s22 = scalar_lea.vmem %s3525_s30, 256  ;;  %p3380_p0 = scmp.lt.s32.totalorder %s3525_s30, %s3525_s30 }
  0x2e   : > { %p3373_p11 = scmp.ne.s32.totalorder %s3525_s30, %s3372_s22  ;;  %p3381_p1 = scmp.lt.s32.totalorder %s3372_s22, %s3372_s22 }
  0x30   : > { %p3375_p12 = pnand %p3373_p11, %p3535_p8  ;;  %p3382_p4 = por %p3381_p1, %p3380_p0 }
  0x32   : > { %p3376_p13 = pneg %p3375_p12 }
  0x34   : > { %p3383_p7 = pnand %p3382_p4, %p3376_p13 }
  0x36   : > { %3386 = shalt.err (!%p3383_p7)
}
  0x37   : > { %s3449_s28 = smov 64   ;;  %s3450_s10 = smov 4  }
  0x38   : > { %2927 = dma.hbm_to_vmem [thread:$0]  (!%p3517_p5), %s5058_s1, 256, %s3525_s30, [#allocation4], %s3449_s28, %s3449_s28, %s3450_s10  }
  0x39   : > { %s3451_s14 = smov [#allocation7]   ;;  %s3387_s21 = scalar_lea.hbm %s5061_s4, 192 }
  0x3a   : > { %s212_s15 = sshll.u32 %s3451_s14, 4  ;;  %p3388_p2 = scmp.ne.s32.totalorder %s5061_s4, %s3387_s21  ;;  %s213_s15 = int_to_ptr.vmem [resolvable:$true] %s212_s15 }
  0x3b   : > { %p3394_p9 = scmp.lt.u32.totalorder %s3387_s21, %s5061_s4 }
  0x3c   : > { %p3390_p3 = pnand %p3388_p2, %p3535_p8 }
  0x3e   : > { %p3391_p6 = pneg %p3390_p3 }
  0x40   : > { %p3396_p10 = pnand %p3394_p9, %p3391_p6 }
  0x42   : > { %3399 = shalt.err (!%p3396_p10)
}
  0x43   : > { %s3400_s30 = scalar_lea.vmem %s213_s15, 192  ;;  %p3408_p0 = scmp.lt.s32.totalorder %s213_s15, %s213_s15 }
  0x44   : > { %p3401_p11 = scmp.ne.s32.totalorder %s213_s15, %s3400_s30  ;;  %p3409_p1 = scmp.lt.s32.totalorder %s3400_s30, %s3400_s30 }
  0x46   : > { %p3403_p12 = pnand %p3401_p11, %p3535_p8  ;;  %p3410_p4 = por %p3409_p1, %p3408_p0 }
  0x48   : > { %p3404_p13 = pneg %p3403_p12 }
  0x4a   : > { %p3411_p7 = pnand %p3410_p4, %p3404_p13 }
  0x4c   : > { %3414 = shalt.err (!%p3411_p7)
}
  0x4d   : > { %2933 = dma.hbm_to_vmem [thread:$0]  (!%p3517_p5), %s5061_s4, 192, %s213_s15, [#allocation6]  }
  0x4e   : > { %p5090_p2 = scmp.ne.s32.totalorder %s5085_s25, 0 }
  0x50   : > { %238 = sbr.rel (%p5090_p2) target bundleno = 960 (0x3c0), region = 40 }
  0x57   : > { %p5091_p3 = scmp.ne.s32.totalorder %s5084_s24, 0 }
  0x59   : > { %3428 = dma.done.wait (%p5091_p3), [#allocation4], 256  }
  0x5a   : > { %3430 = vsyncadd (%p5091_p3), [#allocation4], 4294967040 }
  0x5b   : > { %3432 = dma.done.wait (%p5091_p3), [#allocation6], 208  }
  0x5c   : > { %3434 = vsyncadd (%p5091_p3), [#allocation6], 4294967088  ;;  %p278_p8 = scmp.lt.s32.totalorder %s3437_s18, 1  ;;  %v2973_v0 = vld [vmem:[#allocation3] sm:$0xff]   ;;  %v2974_v1 = vld [vmem:[#allocation3 + $0x8] sm:$0xff]   ;;  %vm353_vm0 = vcmask 261120  }
  0x5d   : > { %2803 = vmatprep.subr.bf16.mxu0 %v2973_v0  ;;  %v2979_v5 = vld [vmem:[%s5060_s3 + $0x4] ss:$48 sps:$4 sm:$0xff]   ;;  %v2981_v6 = vld [vmem:[%s5060_s3 + $0x8] ss:$48 sps:$4 sm:$0xff]   ;;  %v2983_v7 = vld [vmem:[%s5060_s3 + $0xc] ss:$48 sps:$4 sm:$0xff]  }
  0x5e   : > { %s5211_s18 = smov (!%p278_p8, %s3437_s18), 1  ;;  %2804 = vmatpush3.bf16.msra.mxu0 %v2973_v0  ;;  %1115 = vmatprep.subr.bf16.mxu1 %v2979_v5  ;;  %v2984_v8 = vld [vmem:[%s5060_s3] ss:$48 sps:$4 sm:$0xff]   ;;  %v2985_v9 = vld [vmem:[%s5060_s3 + $0x64] ss:$48 sps:$4 sm:$0xff]   ;;  %v3452_v40 = vmov 0  }
  0x5f   : > { %s2796_s25 = sshll.u32 %s5211_s18, 5  ;;  %2805 = vmatprep.subr.bf16.mxu0 %v2974_v1  ;;  %v2987_v10 = vld [vmem:[%s5060_s3 + $0x68] ss:$48 sps:$4 sm:$0xff]   ;;  %v2989_v11 = vld [vmem:[%s5060_s3 + $0x6c] ss:$48 sps:$4 sm:$0xff]   ;;  %1116 = vmatpush1.bf16.msra.mxu1 %v2984_v8  ;;  %vm2035_vm1 = vcmask 523264  }
  0x60   : > { %s285_s22 = scalar_lea.vmem %s5057_s0, %s2796_s25  ;;  %v2990_v12 = vld [vmem:[%s5060_s3 + $0x60] ss:$48 sps:$4 sm:$0xff]   ;;  %1117 = vmatprep.subr.bf16.mxu1 %v2985_v9  ;;  %v2991_v14 = vld [vmem:[%s5060_s3 + $0xc4] ss:$48 sps:$4 sm:$0xff]   ;;  %v2995_v15 = vld [vmem:[%s5060_s3 + $0xcc] ss:$48 sps:$4 sm:$0xff]   ;;  %1147 = vmatprep.mubr.bf16.mxu1 %v3452_v40 }
  0x61   : > { %v2975_v2 = vld [vmem:[%s285_s22] sm:$0xff]   ;;  %v2976_v3 = vld [vmem:[%s285_s22 + $0x8] sm:$0xff]   ;;  %v2977_v4 = vld [vmem:[%s285_s22 + $0x10] sm:$0xff]   ;;  %s2911_s12 = smul.u32 12, %s5211_s18 }
  0x62   : > { %2807 = vmatprep.mubr.msk.bf16.mxu0 %vm353_vm0, %v2975_v2  ;;  %2806 = vmatpush3.bf16.msra.mxu0 %v2974_v1  ;;  %v2978_v13 = vld [vmem:[%s285_s22 + $0x18] sm:$0xff]   ;;  %v2996_v17 = vld [vmem:[%s5060_s3 + $0xc0] ss:$48 sps:$4 sm:$0xff]   ;;  %v2997_v18 = vld [vmem:[%s5060_s3 + $0x124] ss:$48 sps:$4 sm:$0xff]  }
  0x63   : > { %1188 = vmatprep.subr.bf16.mxu0 %v2983_v7  ;;  %1118 = vmatpush1.bf16.msra.mxu1 %v2990_v12  ;;  %v2993_v16 = vld [vmem:[%s5060_s3 + $0xc8] ss:$48 sps:$4 sm:$0xff]   ;;  %v3001_v19 = vld [vmem:[%s5060_s3 + $0x12c] ss:$48 sps:$4 sm:$0xff]   ;;  %v3002_v21 = vld [vmem:[%s5060_s3 + $0x120] ss:$48 sps:$4 sm:$0xff]   ;;  %s290_s15 = scalar_lea.vmem %s5062_s5, %s2911_s12 }
  0x64   : > { %1119 = vmatprep.subr.bf16.mxu1 %v2991_v14  ;;  %v2999_v20 = vld [vmem:[%s5060_s3 + $0x128] ss:$48 sps:$4 sm:$0xff]   ;;  %v3003_v22 = vld [vmem:[%s5060_s3 + $0x184] ss:$48 sps:$4 sm:$0xff]   ;;  %v3007_v23 = vld [vmem:[%s5060_s3 + $0x18c] ss:$48 sps:$4 sm:$0xff]  }
  0x65   : > { %2808 = vmatmul.mubr.msk.bf16.vlgmr.msra.gmra.mrb[0].mxu0 %vm353_vm0, %v2976_v3  ;;  %v3005_v24 = vld [vmem:[%s5060_s3 + $0x188] ss:$48 sps:$4 sm:$0xff]   ;;  %v3008_v25 = vld [vmem:[%s5060_s3 + $0x180] ss:$48 sps:$4 sm:$0xff]   ;;  %v3009_v26 = vld [vmem:[%s5060_s3 + $0x1e4] ss:$48 sps:$4 sm:$0xff]  }
  0x66   : > { %2811 = vmatprep.mubr.msk.bf16.mxu0 %vm353_vm0, %v2977_v4  ;;  %1189 = vmatpush1.bf16.msra.mxu0 %v2981_v6  ;;  %v3013_v27 = vld [vmem:[%s5060_s3 + $0x1ec] ss:$48 sps:$4 sm:$0xff]   ;;  %v3011_v28 = vld [vmem:[%s5060_s3 + $0x1e8] ss:$48 sps:$4 sm:$0xff]   ;;  %v3014_v29 = vld [vmem:[%s5060_s3 + $0x1e0] ss:$48 sps:$4 sm:$0xff]  }
  0x67   : > { %1190 = vmatprep.subr.bf16.mxu0 %v2989_v11  ;;  %1120 = vmatpush1.bf16.msra.mxu1 %v2996_v17  ;;  %v3015_v30 = vld [vmem:[%s5060_s3 + $0x244] ss:$48 sps:$4 sm:$0xff]   ;;  %v3019_v31 = vld [vmem:[%s5060_s3 + $0x24c] ss:$48 sps:$4 sm:$0xff]   ;;  %v3017_v32 = vld [vmem:[%s5060_s3 + $0x248] ss:$48 sps:$4 sm:$0xff]  }
  0x68   : > { %1121 = vmatprep.subr.bf16.mxu1 %v2997_v18  ;;  %v3020_v33 = vld [vmem:[%s5060_s3 + $0x240] ss:$48 sps:$4 sm:$0xff]   ;;  %v3021_v34 = vld [vmem:[%s5060_s3 + $0x2a4] ss:$48 sps:$4 sm:$0xff]   ;;  %v3025_v35 = vld [vmem:[%s5060_s3 + $0x2ac] ss:$48 sps:$4 sm:$0xff]  }
  0x69   : > { %v3023_v36 = vld [vmem:[%s5060_s3 + $0x2a8] ss:$48 sps:$4 sm:$0xff]   ;;  %v3026_v37 = vld [vmem:[%s5060_s3 + $0x2a0] ss:$48 sps:$4 sm:$0xff]   ;;  %v3029_v38 = vld [vmem:[%s5060_s3 + $0x14] ss:$48 sps:$4 sm:$0xff]  }
  0x6a   : > { %1191 = vmatpush1.bf16.msra.mxu0 %v2987_v10  ;;  %v3032_v39 = vld [vmem:[%s5060_s3 + $0x1c] ss:$48 sps:$4 sm:$0xff]  }
  0x6b   : > { %1192 = vmatprep.subr.bf16.mxu0 %v2995_v15  ;;  %1122 = vmatpush1.bf16.msra.mxu1 %v3002_v21  ;;  %v2681_v41 = vld [vmem:[#allocation5] ss:$0 sm:$0xff] }
  0x6c   : > { %1123 = vmatprep.subr.bf16.mxu1 %v3003_v22  ;;  %v3027_v22 = vld [vmem:[%s5060_s3 + $0x10] ss:$48 sps:$4 sm:$0xff]  }
  0x6d   : > { %2812 = vmatmul.mubr.msk.bf16.gmra.mrb[4].mxu0 %vm353_vm0, %v2978_v13 }
  0x6e   : > { %1193 = vmatpush1.bf16.msra.mxu0 %v2993_v16  ;;  %1220 = vmatprep.mubr.bf16.mxu0 %v3452_v40 }
  0x6f   : > { %1194 = vmatprep.subr.bf16.mxu0 %v3001_v19  ;;  %1124 = vmatpush1.bf16.msra.mxu1 %v3008_v25 }
  0x70   : > { %1125 = vmatprep.subr.bf16.mxu1 %v3009_v26 }
  0x72   : > { %1195 = vmatpush1.bf16.msra.mxu0 %v2999_v20 }
  0x73   : > { %1196 = vmatprep.subr.bf16.mxu0 %v3007_v23  ;;  %1126 = vmatpush1.bf16.msra.mxu1 %v3014_v29  ;;  %v3030_v23 = vld [vmem:[%s5060_s3 + $0x18] ss:$48 sps:$4 sm:$0xff]  }
  0x74   : > { %1127 = vmatprep.subr.bf16.mxu1 %v3015_v30 }
  0x76   : > { %1197 = vmatpush1.bf16.msra.mxu0 %v3005_v24 }
  0x77   : > { %1198 = vmatprep.subr.bf16.mxu0 %v3013_v27  ;;  %1128 = vmatpush1.bf16.msra.mxu1 %v3020_v33  ;;  %v3035_v27 = vld [vmem:[%s5060_s3 + $0x74] ss:$48 sps:$4 sm:$0xff]  }
  0x78   : > { %1129 = vmatprep.subr.bf16.mxu1 %v3021_v34 }
  0x7a   : > { %1199 = vmatpush1.bf16.msra.mxu0 %v3011_v28  ;;  %v3038_v28 = vld [vmem:[%s5060_s3 + $0x7c] ss:$48 sps:$4 sm:$0xff]  }
  0x7b   : > { %1200 = vmatprep.subr.bf16.mxu0 %v3019_v31  ;;  %1130 = vmatpush1.bf16.msra.mxu1 %v3026_v37 }
  0x7c   : > { %1261 = vmatprep.subr.bf16.mxu1 %v3029_v38  ;;  %v3041_v38 = vld [vmem:[%s5060_s3 + $0xd4] ss:$48 sps:$4 sm:$0xff]  }
  0x7e   : > { %1201 = vmatpush1.bf16.msra.mxu0 %v3017_v32 }
  0x7f   : > { %1202 = vmatprep.subr.bf16.mxu0 %v3025_v35  ;;  %v3033_v35 = vld [vmem:[%s5060_s3 + $0x70] ss:$48 sps:$4 sm:$0xff]  }
  0x82   : > { %1203 = vmatpush1.bf16.msra.mxu0 %v3023_v36  ;;  %v3036_v36 = vld [vmem:[%s5060_s3 + $0x78] ss:$48 sps:$4 sm:$0xff]  }
  0x83   : > { %1334 = vmatprep.subr.bf16.mxu0 %v3032_v39  ;;  %v3044_v39 = vld [vmem:[%s5060_s3 + $0xdc] ss:$48 sps:$4 sm:$0xff]  }
 0x138   : > { %v2809_v42 = vpop.f32.mrb[0].mxu0 }
 0x139   : > { %v409_v43 = vadd.f32 %v2809_v42, %v2681_v41  ;;  %v400_v44 = vpop.f32.mrb[1].mxu0 }
 0x13a   : > { %v401_v45 = vadd.f32 %v2681_v41, %v400_v44  ;;  %v2810_v46 = vpop.f32.mrb[2].mxu0 }
 0x13b   : > { %v433_v47 = vmul.f32 0.5, %v409_v43  ;;  %v412_v48 = vadd.f32 %v2810_v46, %v2681_v41  ;;  %v403_v49 = vpop.f32.mrb[3].mxu0  ;;  %v3039_v46 = vld [vmem:[%s5060_s3 + $0xd0] ss:$48 sps:$4 sm:$0xff]  }
 0x13c   : > { %v431_v50 = vmul.f32 0.5, %v401_v45  ;;  %v404_v51 = vadd.f32 %v2681_v41, %v403_v49  ;;  %v3047_v49 = vld [vmem:[%s5060_s3 + $0x134] ss:$48 sps:$4 sm:$0xff]  }
 0x13d   : > { %3123 = vtanh.f32 %v433_v47  ;;  %v434_v52 = vmul.f32 0.5, %v412_v48  ;;  %v3042_v47 = vld [vmem:[%s5060_s3 + $0xd8] ss:$48 sps:$4 sm:$0xff]  }
 0x13e   : > { %3125 = vtanh.f32 %v431_v50  ;;  %v432_v53 = vmul.f32 0.5, %v404_v51  ;;  %v3050_v50 = vld [vmem:[%s5060_s3 + $0x13c] ss:$48 sps:$4 sm:$0xff]  }
 0x13f   : > { %3127 = vtanh.f32 %v434_v52  ;;  %v3048_v52 = vld [vmem:[%s5060_s3 + $0x138] ss:$48 sps:$4 sm:$0xff]  }
 0x140   : > { %3129 = vtanh.f32 %v432_v53  ;;  %v2813_v54 = vpop.f32.mrb[4].mxu0  ;;  %v3053_v53 = vld [vmem:[%s5060_s3 + $0x194] ss:$48 sps:$4 sm:$0xff]  }
 0x141   : > { %v425_v55 = vadd.f32 %v2813_v54, %v2681_v41  ;;  %v416_v56 = vpop.f32.mrb[5].mxu0  ;;  %v3056_v54 = vld [vmem:[%s5060_s3 + $0x19c] ss:$48 sps:$4 sm:$0xff]  }
 0x142   : > { %v417_v57 = vadd.f32 %v2681_v41, %v416_v56  ;;  %v2814_v58 = vpop.f32.mrb[6].mxu0  ;;  %v3054_v56 = vld [vmem:[%s5060_s3 + $0x198] ss:$48 sps:$4 sm:$0xff]  }
 0x143   : > { %v437_v59 = vmul.f32 0.5, %v425_v55  ;;  %v428_v60 = vadd.f32 %v2814_v58, %v2681_v41  ;;  %v419_v61 = vpop.f32.mrb[7].mxu0  ;;  %v3062_v58 = vld [vmem:[%s5060_s3 + $0x1fc] ss:$48 sps:$4 sm:$0xff]  }
 0x144   : > { %v435_v62 = vmul.f32 0.5, %v417_v57  ;;  %v420_v63 = vadd.f32 %v2681_v41, %v419_v61  ;;  %v3065_v61 = vld [vmem:[%s5060_s3 + $0x254] ss:$48 sps:$4 sm:$0xff]  }
 0x145   : > { %3131 = vtanh.f32 %v437_v59  ;;  %v438_v0 = vmul.f32 0.5, %v428_v60  ;;  %v3057_v59 = vld [vmem:[%s5060_s3 + $0x1f0] ss:$48 sps:$4 sm:$0xff]  }
 0x146   : > { %3133 = vtanh.f32 %v435_v62  ;;  %v436_v1 = vmul.f32 0.5, %v420_v63  ;;  %v3068_v62 = vld [vmem:[%s5060_s3 + $0x25c] ss:$48 sps:$4 sm:$0xff]  }
 0x147   : > { %v3124_v2 = vpop.eup %3123  ;;  %3135 = vtanh.f32 %v438_v0  ;;  %v3066_v0 = vld [vmem:[%s5060_s3 + $0x258] ss:$48 sps:$4 sm:$0xff]  }
 0x148   : > { %v3126_v3 = vpop.eup %3125  ;;  %v449_v4 = vadd.f32 1.0, %v3124_v2  ;;  %3137 = vtanh.f32 %v436_v1  ;;  %v3071_v1 = vld [vmem:[%s5060_s3 + $0x2b4] ss:$48 sps:$4 sm:$0xff]   ;;  %v3074_v2 = vld [vmem:[%s5060_s3 + $0x2bc] ss:$48 sps:$4 sm:$0xff]  }
 0x149   : > { %v3128_v5 = vpop.eup %3127  ;;  %v447_v6 = vadd.f32 1.0, %v3126_v3  ;;  %v3069_v3 = vld [vmem:[%s5060_s3 + $0x2b0] ss:$48 sps:$4 sm:$0xff]  }
 0x14a   : > { %v3130_v7 = vpop.eup %3129  ;;  %v457_v8 = vmul.f32 0.5, %v449_v4  ;;  %v450_v9 = vadd.f32 1.0, %v3128_v5  ;;  %v3072_v4 = vld [vmem:[%s5060_s3 + $0x2b8] ss:$48 sps:$4 sm:$0xff]   ;;  %v3077_v5 = vld [vmem:[%s5060_s3 + $0x24] ss:$48 sps:$4 sm:$0xff]  }
 0x14b   : > { %v455_v10 = vmul.f32 0.5, %v447_v6  ;;  %v448_v11 = vadd.f32 1.0, %v3130_v7  ;;  %v3080_v6 = vld [vmem:[%s5060_s3 + $0x2c] ss:$48 sps:$4 sm:$0xff]   ;;  %v3075_v7 = vld [vmem:[%s5060_s3 + $0x20] ss:$48 sps:$4 sm:$0xff]  }
 0x14c   : > { %v458_v12 = vmul.f32 0.5, %v450_v9  ;;  %v465_v14 = vmul.f32 %v457_v8, %v409_v43  ;;  %v3078_v8 = vld [vmem:[%s5060_s3 + $0x28] ss:$48 sps:$4 sm:$0xff]   ;;  %v3083_v9 = vld [vmem:[%s5060_s3 + $0x84] ss:$48 sps:$4 sm:$0xff]  }
 0x14d   : > { %v456_v13 = vmul.f32 0.5, %v448_v11  ;;  %v463_v17 = vmul.f32 %v455_v10, %v401_v45  ;;  %v3086_v10 = vld [vmem:[%s5060_s3 + $0x8c] ss:$48 sps:$4 sm:$0xff]   ;;  %v3081_v11 = vld [vmem:[%s5060_s3 + $0x80] ss:$48 sps:$4 sm:$0xff]  }
 0x14e   : > { %v466_v15 = vmul.f32 %v458_v12, %v412_v48  ;;  %v3084_v12 = vld [vmem:[%s5060_s3 + $0x88] ss:$48 sps:$4 sm:$0xff]  }
 0x14f   : > { %v3132_v16 = vpop.eup %3131  ;;  %v464_v18 = vmul.f32 %v456_v13, %v404_v51  ;;  %v3045_v51 = vld [vmem:[%s5060_s3 + $0x130] ss:$48 sps:$4 sm:$0xff]   ;;  %v3089_v13 = vld [vmem:[%s5060_s3 + $0xe4] ss:$48 sps:$4 sm:$0xff]  }
 0x150   : > { %v3134_v19 = vpop.eup %3133  ;;  %v3722_v20 = vpack.c.bf16 %v466_v15, %v465_v14  ;;  %v453_v21 = vadd.f32 1.0, %v3132_v16  ;;  %v3092_v14 = vld [vmem:[%s5060_s3 + $0xec] ss:$48 sps:$4 sm:$0xff]   ;;  %v3087_v15 = vld [vmem:[%s5060_s3 + $0xe0] ss:$48 sps:$4 sm:$0xff]  }
 0x151   : > { %v3136_v24 = vpop.eup %3135  ;;  %v3730_v25 = vpack.c.bf16 %v464_v18, %v463_v17  ;;  %v451_v26 = vadd.f32 1.0, %v3134_v19  ;;  %v3090_v16 = vld [vmem:[%s5060_s3 + $0xe8] ss:$48 sps:$4 sm:$0xff]   ;;  %v3095_v17 = vld [vmem:[%s5060_s3 + $0x144] ss:$48 sps:$4 sm:$0xff]  }
 0x152   : > { %v3138_v29 = vpop.eup %3137  ;;  %v461_v30 = vmul.f32 0.5, %v453_v21  ;;  %v454_v31 = vadd.f32 1.0, %v3136_v24  ;;  %v3098_v18 = vld [vmem:[%s5060_s3 + $0x14c] ss:$48 sps:$4 sm:$0xff]   ;;  %v3093_v19 = vld [vmem:[%s5060_s3 + $0x140] ss:$48 sps:$4 sm:$0xff]  }
 0x153   : > { %v459_v32 = vmul.f32 0.5, %v451_v26  ;;  %v452_v33 = vadd.f32 1.0, %v3138_v29  ;;  %1148 = vmatmul.mubr.bf16.vlgmr.msra.gmra.mrb[0].mxu1 %v3730_v25  ;;  %1221 = vmatmul.mubr.bf16.vlgmr.msra.gmra.mrb[8].mxu0 %v3730_v25  ;;  %v3096_v21 = vld [vmem:[%s5060_s3 + $0x148] ss:$48 sps:$4 sm:$0xff]   ;;  %v3099_v24 = vld [vmem:[%s5060_s3 + $0x1a0] ss:$48 sps:$4 sm:$0xff]  }
 0x154   : > { %v462_v34 = vmul.f32 0.5, %v454_v31  ;;  %1262 = vmatpush1.bf16.msra.mxu1 %v3027_v22  ;;  %1335 = vmatpush1.bf16.msra.mxu0 %v3030_v23  ;;  %v469_v41 = vmul.f32 %v461_v30, %v425_v55  ;;  %v3051_v55 = vld [vmem:[%s5060_s3 + $0x190] ss:$48 sps:$4 sm:$0xff]   ;;  %v3101_v22 = vld [vmem:[%s5060_s3 + $0x1a4] ss:$48 sps:$4 sm:$0xff]  }
 0x155   : > { %v460_v37 = vmul.f32 0.5, %v452_v33  ;;  %1263 = vmatprep.subr.bf16.mxu1 %v3035_v27  ;;  %1336 = vmatprep.subr.bf16.mxu0 %v3038_v28  ;;  %v467_v43 = vmul.f32 %v459_v32, %v417_v57  ;;  %v3059_v57 = vld [vmem:[%s5060_s3 + $0x1f4] ss:$48 sps:$4 sm:$0xff]   ;;  %v3104_v23 = vld [vmem:[%s5060_s3 + $0x1ac] ss:$48 sps:$4 sm:$0xff]  }
 0x156   : > { %v470_v42 = vmul.f32 %v462_v34, %v428_v60  ;;  %1157 = vmatprep.mubr.bf16.mxu1 %v3452_v40  ;;  %1230 = vmatprep.mubr.bf16.mxu0 %v3452_v40  ;;  %v3060_v60 = vld [vmem:[%s5060_s3 + $0x1f8] ss:$48 sps:$4 sm:$0xff]   ;;  %v3107_v27 = vld [vmem:[%s5060_s3 + $0x204] ss:$48 sps:$4 sm:$0xff]   ;;  %v3110_v28 = vld [vmem:[%s5060_s3 + $0x20c] ss:$48 sps:$4 sm:$0xff]  }
 0x157   : > { %v468_v44 = vmul.f32 %v460_v37, %v420_v63  ;;  %v3063_v63 = vld [vmem:[%s5060_s3 + $0x250] ss:$48 sps:$4 sm:$0xff]   ;;  %v3102_v26 = vld [vmem:[%s5060_s3 + $0x1a8] ss:$48 sps:$4 sm:$0xff]   ;;  %v3113_v31 = vld [vmem:[%s5060_s3 + $0x264] ss:$48 sps:$4 sm:$0xff]  }
 0x158   : > { %v3754_v45 = vpack.c.bf16 %v470_v42, %v469_v41  ;;  %1264 = vmatpush1.bf16.msra.mxu1 %v3033_v35  ;;  %1337 = vmatpush1.bf16.msra.mxu0 %v3036_v36  ;;  %v3105_v29 = vld [vmem:[%s5060_s3 + $0x200] ss:$48 sps:$4 sm:$0xff]   ;;  %v3108_v30 = vld [vmem:[%s5060_s3 + $0x208] ss:$48 sps:$4 sm:$0xff]   ;;  %v3116_v32 = vld [vmem:[%s5060_s3 + $0x26c] ss:$48 sps:$4 sm:$0xff]  }
 0x159   : > { %v3762_v48 = vpack.c.bf16 %v468_v44, %v467_v43  ;;  %1265 = vmatprep.subr.bf16.mxu1 %v3041_v38  ;;  %1338 = vmatprep.subr.bf16.mxu0 %v3044_v39  ;;  %v3111_v33 = vld [vmem:[%s5060_s3 + $0x260] ss:$48 sps:$4 sm:$0xff]   ;;  %v3114_v34 = vld [vmem:[%s5060_s3 + $0x268] ss:$48 sps:$4 sm:$0xff]   ;;  %v3119_v35 = vld [vmem:[%s5060_s3 + $0x2c4] ss:$48 sps:$4 sm:$0xff]  }
 0x15a   : > { %v3122_v36 = vld [vmem:[%s5060_s3 + $0x2cc] ss:$48 sps:$4 sm:$0xff]   ;;  %v3117_v37 = vld [vmem:[%s5060_s3 + $0x2c0] ss:$48 sps:$4 sm:$0xff]   ;;  %v3120_v38 = vld [vmem:[%s5060_s3 + $0x2c8] ss:$48 sps:$4 sm:$0xff]  }
 0x15b   : > { %1158 = vmatmul.mubr.bf16.gmra.mrb[4].mxu1 %v3722_v20  ;;  %1231 = vmatmul.mubr.bf16.gmra.mrb[12].mxu0 %v3722_v20  ;;  %v3969_v43 = vld [vmem:[#allocation7] sm:$0xff] }
 0x15c   : > { %1266 = vmatpush1.bf16.msra.mxu1 %v3039_v46  ;;  %1339 = vmatpush1.bf16.msra.mxu0 %v3042_v47 }
 0x15d   : > { %1267 = vmatprep.subr.bf16.mxu1 %v3047_v49  ;;  %1340 = vmatprep.subr.bf16.mxu0 %v3050_v50 }
 0x15e   : > { %1167 = vmatprep.mubr.bf16.mxu1 %v3452_v40  ;;  %1240 = vmatprep.mubr.bf16.mxu0 %v3452_v40 }
 0x160   : > { %1268 = vmatpush1.bf16.msra.mxu1 %v3045_v51  ;;  %1341 = vmatpush1.bf16.msra.mxu0 %v3048_v52 }
 0x161   : > { %1269 = vmatprep.subr.bf16.mxu1 %v3053_v53  ;;  %1342 = vmatprep.subr.bf16.mxu0 %v3056_v54 }
 0x163   : > { %1168 = vmatmul.mubr.bf16.gmra.mrb[8].mxu1 %v3762_v48  ;;  %1241 = vmatmul.mubr.bf16.gmra.mrb[16].mxu0 %v3762_v48 }
 0x164   : > { %1270 = vmatpush1.bf16.msra.mxu1 %v3051_v55  ;;  %1343 = vmatpush1.bf16.msra.mxu0 %v3054_v56 }
 0x165   : > { %1271 = vmatprep.subr.bf16.mxu1 %v3059_v57  ;;  %1344 = vmatprep.subr.bf16.mxu0 %v3062_v58 }
 0x166   : > { %1177 = vmatprep.mubr.bf16.mxu1 %v3452_v40  ;;  %1250 = vmatprep.mubr.bf16.mxu0 %v3452_v40 }
 0x168   : > { %1272 = vmatpush1.bf16.msra.mxu1 %v3057_v59  ;;  %1345 = vmatpush1.bf16.msra.mxu0 %v3060_v60 }
 0x169   : > { %1273 = vmatprep.subr.bf16.mxu1 %v3065_v61  ;;  %1346 = vmatprep.subr.bf16.mxu0 %v3068_v62 }
 0x16b   : > { %1178 = vmatmul.mubr.bf16.gmra.mrb[12].mxu1 %v3754_v45  ;;  %1251 = vmatmul.mubr.bf16.gmra.mrb[20].mxu0 %v3754_v45 }
 0x16c   : > { %1274 = vmatpush1.bf16.msra.mxu1 %v3063_v63  ;;  %1347 = vmatpush1.bf16.msra.mxu0 %v3066_v0 }
 0x16d   : > { %1275 = vmatprep.subr.bf16.mxu1 %v3071_v1  ;;  %1348 = vmatprep.subr.bf16.mxu0 %v3074_v2 }
 0x16e   : > { %1293 = vmatprep.mubr.bf16.mxu1 %v3452_v40  ;;  %1366 = vmatprep.mubr.bf16.mxu0 %v3452_v40 }
 0x170   : > { %1276 = vmatpush1.bf16.msra.mxu1 %v3069_v3  ;;  %1349 = vmatpush1.bf16.msra.mxu0 %v3072_v4 }
 0x171   : > { %1407 = vmatprep.subr.bf16.mxu1 %v3077_v5  ;;  %1480 = vmatprep.subr.bf16.mxu0 %v3080_v6 }
 0x173   : > { %1294 = vmatmul.mubr.bf16.vlgmr.msra.gmra.mrb[16].mxu1 %v3730_v25  ;;  %1367 = vmatmul.mubr.bf16.vlgmr.msra.gmra.mrb[24].mxu0 %v3730_v25 }
 0x174   : > { %1408 = vmatpush1.bf16.msra.mxu1 %v3075_v7  ;;  %1481 = vmatpush1.bf16.msra.mxu0 %v3078_v8 }
 0x175   : > { %1409 = vmatprep.subr.bf16.mxu1 %v3083_v9  ;;  %1482 = vmatprep.subr.bf16.mxu0 %v3086_v10 }
 0x176   : > { %1303 = vmatprep.mubr.bf16.mxu1 %v3452_v40  ;;  %1376 = vmatprep.mubr.bf16.mxu0 %v3452_v40 }
 0x178   : > { %1410 = vmatpush1.bf16.msra.mxu1 %v3081_v11  ;;  %1483 = vmatpush1.bf16.msra.mxu0 %v3084_v12 }
 0x179   : > { %1411 = vmatprep.subr.bf16.mxu1 %v3089_v13  ;;  %1484 = vmatprep.subr.bf16.mxu0 %v3092_v14 }
 0x17b   : > { %1304 = vmatmul.mubr.bf16.gmra.mrb[20].mxu1 %v3722_v20  ;;  %1377 = vmatmul.mubr.bf16.gmra.mrb[28].mxu0 %v3722_v20 }
 0x17c   : > { %1412 = vmatpush1.bf16.msra.mxu1 %v3087_v15  ;;  %1485 = vmatpush1.bf16.msra.mxu0 %v3090_v16 }
 0x17d   : > { %1413 = vmatprep.subr.bf16.mxu1 %v3095_v17  ;;  %1486 = vmatprep.subr.bf16.mxu0 %v3098_v18 }
 0x17e   : > { %1313 = vmatprep.mubr.bf16.mxu1 %v3452_v40  ;;  %1386 = vmatprep.mubr.bf16.mxu0 %v3452_v40 }
 0x180   : > { %1414 = vmatpush1.bf16.msra.mxu1 %v3093_v19  ;;  %1487 = vmatpush1.bf16.msra.mxu0 %v3096_v21 }
 0x181   : > { %1415 = vmatprep.subr.bf16.mxu1 %v3101_v22  ;;  %1488 = vmatprep.subr.bf16.mxu0 %v3104_v23 }
 0x183   : > { %1314 = vmatmul.mubr.bf16.gmra.mrb[24].mxu1 %v3762_v48  ;;  %1387 = vmatmul.mubr.bf16.gmra.mrb[32].mxu0 %v3762_v48 }
 0x184   : > { %1416 = vmatpush1.bf16.msra.mxu1 %v3099_v24  ;;  %1489 = vmatpush1.bf16.msra.mxu0 %v3102_v26 }
 0x185   : > { %1417 = vmatprep.subr.bf16.mxu1 %v3107_v27  ;;  %1490 = vmatprep.subr.bf16.mxu0 %v3110_v28 }
 0x186   : > { %1323 = vmatprep.mubr.bf16.mxu1 %v3452_v40  ;;  %1396 = vmatprep.mubr.bf16.mxu0 %v3452_v40 }
 0x188   : > { %1418 = vmatpush1.bf16.msra.mxu1 %v3105_v29  ;;  %1491 = vmatpush1.bf16.msra.mxu0 %v3108_v30 }
 0x189   : > { %1419 = vmatprep.subr.bf16.mxu1 %v3113_v31  ;;  %1492 = vmatprep.subr.bf16.mxu0 %v3116_v32 }
 0x18b   : > { %1324 = vmatmul.mubr.bf16.gmra.mrb[28].mxu1 %v3754_v45  ;;  %1397 = vmatmul.mubr.bf16.gmra.mrb[36].mxu0 %v3754_v45 }
 0x18c   : > { %1420 = vmatpush1.bf16.msra.mxu1 %v3111_v33  ;;  %1493 = vmatpush1.bf16.msra.mxu0 %v3114_v34 }
 0x18d   : > { %1421 = vmatprep.subr.bf16.mxu1 %v3119_v35  ;;  %1494 = vmatprep.subr.bf16.mxu0 %v3122_v36 }
 0x18e   : > { %1439 = vmatprep.mubr.bf16.mxu1 %v3452_v40  ;;  %1512 = vmatprep.mubr.bf16.mxu0 %v3452_v40 }
 0x190   : > { %1422 = vmatpush1.bf16.msra.mxu1 %v3117_v37  ;;  %1495 = vmatpush1.bf16.msra.mxu0 %v3120_v38 }
 0x193   : > { %1440 = vmatmul.mubr.bf16.vlgmr.msra.gmra.mrb[32].mxu1 %v3730_v25  ;;  %1513 = vmatmul.mubr.bf16.vlgmr.msra.gmra.mrb[40].mxu0 %v3730_v25  ;;  %v5067_v25 = vmov 0.0  }
 0x194   : > { %1449 = vmatprep.mubr.bf16.mxu1 %v3452_v40  ;;  %1522 = vmatprep.mubr.bf16.mxu0 %v3452_v40 }
 0x19b   : > { %1450 = vmatmul.mubr.bf16.gmra.mrb[36].mxu1 %v3722_v20  ;;  %1523 = vmatmul.mubr.bf16.gmra.mrb[44].mxu0 %v3722_v20  ;;  %v5066_v20 = vlaneseq }
 0x19c   : > { %1459 = vmatprep.mubr.bf16.mxu1 %v3452_v40  ;;  %1532 = vmatprep.mubr.bf16.mxu0 %v3452_v40 }
 0x19d   : > { %v3965_v39 = vshrl.u32 %v5066_v20, 7 }
 0x19f   : > { %5092 = vst [vmem:[#allocation10_spill] sm:$0xff] %v3965_v39  ;;  %v577_v41 = vsub.s32 0, %v3965_v39  ;;  %v585_v42 = vsub.s32 2, %v3965_v39  ;;  %v589_v44 = vsub.s32 3, %v3965_v39  ;;  %v593_v11 = vsub.s32 4, %v3965_v39 }
 0x1a0   : > { %v601_v12 = vsub.s32 6, %v3965_v39  ;;  %v597_v17 = vsub.s32 5, %v3965_v39  ;;  %v605_v23 = vsub.s32 7, %v3965_v39 }
 0x1a1   : > { %v3981_v46 = vrot.slane %v3969_v43, %v585_v42 }
 0x1a3   : > { %1460 = vmatmul.mubr.bf16.gmra.mrb[40].mxu1 %v3762_v48  ;;  %1533 = vmatmul.mubr.bf16.gmra.mrb[48].mxu0 %v3762_v48  ;;  %v3991_v48 = vrot.slane %v3969_v43, %v589_v44 }
 0x1a4   : > { %1469 = vmatprep.mubr.bf16.mxu1 %v3452_v40  ;;  %1542 = vmatprep.mubr.bf16.mxu0 %v3452_v40  ;;  %v581_v40 = vsub.s32 1, %v3965_v39 }
 0x1a6   : > { %v3986_v47 = vrot.slane %v3969_v43, %v581_v40 }
 0x1ab   : > { %1470 = vmatmul.mubr.bf16.gmra.mrb[44].mxu1 %v3754_v45  ;;  %1543 = vmatmul.mubr.bf16.gmra.mrb[52].mxu0 %v3754_v45  ;;  %v3976_v45 = vrot.slane %v3969_v43, %v577_v41 }
 0x1ac   : > { %2103 = vmatprep.mubr.f32.mxu1 %v5067_v25  ;;  %2174 = vmatprep.mubr.f32.mxu0 %v5067_v25 }
 0x226   : > { %v1149_v49 = vpop.f32.mrb[0].mxu1  ;;  %v1222_v50 = vpop.f32.mrb[8].mxu0 }
 0x227   : > { %v3994_v51 = vadd.f32 %v1149_v49, %v3976_v45  ;;  %v3997_v52 = vadd.f32 %v1222_v50, %v3981_v46  ;;  %v1151_v53 = vpop.f32.mrb[1].mxu1  ;;  %v1224_v54 = vpop.f32.mrb[9].mxu0  ;;  %v4061_v49 = vrot.slane %v3969_v43, %v593_v11  ;;  %v4064_v50 = vrot.slane %v3969_v43, %v601_v12 }
 0x228   : > { %v4000_v55 = vadd.f32 %v1151_v53, %v3986_v47  ;;  %v4003_v56 = vadd.f32 %v1224_v54, %v3991_v48  ;;  %v1153_v57 = vpop.f32.mrb[2].mxu1  ;;  %v1226_v58 = vpop.f32.mrb[10].mxu0 }
 0x229   : > { %v1553_v59 = vmul.f32 0.5, %v3994_v51  ;;  %v1555_v60 = vmul.f32 0.5, %v3997_v52  ;;  %v4008_v61 = vadd.f32 %v1153_v57, %v3976_v45  ;;  %v4011_v62 = vadd.f32 %v1226_v58, %v3981_v46  ;;  %v1155_v63 = vpop.f32.mrb[3].mxu1  ;;  %v1228_v0 = vpop.f32.mrb[11].mxu0 }
 0x22a   : > { %v1554_v1 = vmul.f32 0.5, %v4000_v55  ;;  %v1556_v2 = vmul.f32 0.5, %v4003_v56  ;;  %v4016_v3 = vadd.f32 %v1155_v63, %v3986_v47  ;;  %v4019_v4 = vadd.f32 %v1228_v0, %v3991_v48  ;;  %v572_v63 = vld [vmem:[#allocation7 + $0x8] sm:$0xf] }
 0x22b   : > { %3139 = vtanh.f32 %v1553_v59  ;;  %v1565_v5 = vmul.f32 0.5, %v4008_v61  ;;  %v1567_v6 = vmul.f32 0.5, %v4011_v62 }
 0x22c   : > { %3141 = vtanh.f32 %v1555_v60  ;;  %v1566_v7 = vmul.f32 0.5, %v4016_v3  ;;  %v1568_v8 = vmul.f32 0.5, %v4019_v4  ;;  %v4068_v60 = vrot.slane %v3969_v43, %v597_v17 }
 0x22d   : > { %3143 = vtanh.f32 %v1554_v1 }
 0x22e   : > { %3145 = vtanh.f32 %v1556_v2  ;;  %v1159_v9 = vpop.f32.mrb[4].mxu1  ;;  %v1232_v10 = vpop.f32.mrb[12].mxu0 }
 0x22f   : > { %3147 = vtanh.f32 %v1565_v5  ;;  %v4028_v13 = vadd.f32 %v1159_v9, %v3976_v45  ;;  %v4031_v14 = vadd.f32 %v1232_v10, %v3981_v46  ;;  %v1161_v15 = vpop.f32.mrb[5].mxu1  ;;  %v1234_v16 = vpop.f32.mrb[13].mxu0 }
 0x230   : > { %3149 = vtanh.f32 %v1567_v6  ;;  %v4035_v18 = vadd.f32 %v1161_v15, %v3986_v47  ;;  %v4038_v19 = vadd.f32 %v1234_v16, %v3991_v48  ;;  %v1163_v21 = vpop.f32.mrb[6].mxu1  ;;  %v1236_v22 = vpop.f32.mrb[14].mxu0 }
 0x231   : > { %3151 = vtanh.f32 %v1566_v7  ;;  %v1577_v24 = vmul.f32 0.5, %v4028_v13  ;;  %v1579_v26 = vmul.f32 0.5, %v4031_v14  ;;  %v4044_v27 = vadd.f32 %v1163_v21, %v3976_v45  ;;  %v1165_v28 = vpop.f32.mrb[7].mxu1  ;;  %v1238_v29 = vpop.f32.mrb[15].mxu0 }
 0x232   : > { %3153 = vtanh.f32 %v1568_v8  ;;  %v1578_v30 = vmul.f32 0.5, %v4035_v18  ;;  %v1580_v31 = vmul.f32 0.5, %v4038_v19  ;;  %v4049_v32 = vadd.f32 %v1236_v22, %v3981_v46 }
 0x233   : > { %3155 = vtanh.f32 %v1577_v24  ;;  %v1589_v33 = vmul.f32 0.5, %v4044_v27  ;;  %v4053_v34 = vadd.f32 %v1165_v28, %v3986_v47  ;;  %v4056_v35 = vadd.f32 %v1238_v29, %v3991_v48 }
 0x234   : > { %3157 = vtanh.f32 %v1579_v26  ;;  %v1591_v36 = vmul.f32 0.5, %v4049_v32  ;;  %v4076_v7 = vrot.slane %v3969_v43, %v605_v23  ;;  %v4092_v43 = vrot.slane %v572_v63, %v577_v41 }
 0x235   : > { %v3140_v37 = vpop.eup %3139  ;;  %3159 = vtanh.f32 %v1578_v30  ;;  %v1590_v38 = vmul.f32 0.5, %v4053_v34  ;;  %v1592_v57 = vmul.f32 0.5, %v4056_v35 }
 0x236   : > { %v3142_v53 = vpop.eup %3141  ;;  %v1745_v54 = vadd.f32 1.0, %v3140_v37  ;;  %3161 = vtanh.f32 %v1580_v31  ;;  %v1169_v58 = vpop.f32.mrb[8].mxu1  ;;  %5093 = vst [vmem:[#allocation11_spill] sm:$0xff] %v4092_v43 }
 0x237   : > { %v1242_v59 = vpop.f32.mrb[16].mxu0  ;;  %v3144_v0 = vpop.eup %3143  ;;  %v1747_v1 = vadd.f32 1.0, %v3142_v53  ;;  %3163 = vtanh.f32 %v1589_v33  ;;  %v4071_v2 = vadd.f32 %v1169_v58, %v3976_v45  ;;  %v4099_v33 = vrot.slane %v572_v63, %v585_v42 }
 0x238   : > { %v1171_v5 = vpop.f32.mrb[9].mxu1  ;;  %v4073_v6 = vpop.f32.mrb[17].mxu0  ;;  %v1746_v9 = vadd.f32 1.0, %v3144_v0  ;;  %3165 = vtanh.f32 %v1591_v36  ;;  %v4079_v10 = vadd.f32 %v1242_v59, %v3981_v46  ;;  %v1841_v24 = vmul.f32 0.5, %v1745_v54 }
 0x239   : > { %v3146_v8 = vpop.eup %3145  ;;  %v4081_v11 = vpop.f32.mrb[10].mxu1  ;;  %3167 = vtanh.f32 %v1590_v38  ;;  %v1601_v17 = vmul.f32 0.5, %v4071_v2  ;;  %v1843_v26 = vmul.f32 0.5, %v1747_v1  ;;  %v4095_v31 = vadd.f32 %v1171_v5, %v3986_v47  ;;  %5094 = vst [vmem:[#allocation12_spill] sm:$0xff] %v4099_v33 }
 0x23a   : > { %v4083_v12 = vpop.f32.mrb[18].mxu0  ;;  %v3148_v15 = vpop.eup %3147  ;;  %v1748_v16 = vadd.f32 1.0, %v3146_v8  ;;  %3169 = vtanh.f32 %v1592_v57  ;;  %v1842_v37 = vmul.f32 0.5, %v1746_v9  ;;  %v1603_v53 = vmul.f32 0.5, %v4079_v10 }
 0x23b   : > { %v4086_v21 = vpop.f32.mrb[11].mxu1  ;;  %v4088_v22 = vpop.f32.mrb[19].mxu0  ;;  %v1757_v28 = vadd.f32 1.0, %v3148_v15  ;;  %3171 = vtanh.f32 %v1601_v17  ;;  %v4104_v57 = vrot.slane %v572_v63, %v581_v40  ;;  %v4108_v0 = vrot.slane %v572_v63, %v589_v44 }
 0x23c   : > { %v3150_v23 = vpop.eup %3149  ;;  %v1844_v58 = vmul.f32 0.5, %v1748_v16  ;;  %v4111_v42 = vmul.f32 %v1841_v24, %v3994_v51  ;;  %v4114_v5 = vmul.f32 %v1843_v26, %v3997_v52  ;;  %v1602_v51 = vmul.f32 0.5, %v4095_v31 }
 0x23d   : > { %v3152_v29 = vpop.eup %3151  ;;  %v1759_v30 = vadd.f32 1.0, %v3150_v23  ;;  %v1853_v38 = vmul.f32 0.5, %v1757_v28  ;;  %5095 = vst [vmem:[#allocation13_spill] sm:$0xff] %v4104_v57  ;;  %5096 = vst [vmem:[#allocation14_spill] sm:$0xff] %v4108_v0  ;;  %3173 = vtanh.f32 %v1603_v53  ;;  %v4151_v25 = vadd.f32 %v4073_v6, %v3991_v48 }
 0x23e   : > { %v3154_v36 = vpop.eup %3153  ;;  %v1758_v41 = vadd.f32 1.0, %v3152_v29  ;;  %v4119_v15 = vpop.f32.mrb[12].mxu1  ;;  %3175 = vtanh.f32 %v1602_v51 }
 0x23f   : > { %v3156_v54 = vpop.eup %3155  ;;  %v1855_v59 = vmul.f32 0.5, %v1759_v30  ;;  %v4117_v8 = vmul.f32 %v1853_v38, %v4008_v61  ;;  %v4121_v16 = vpop.f32.mrb[20].mxu0  ;;  %v1760_v44 = vadd.f32 1.0, %v3154_v36  ;;  %v4132_v61 = vmul.f32 %v1842_v37, %v4000_v55 }
 0x240   : > { %v3158_v1 = vpop.eup %3157  ;;  %v1769_v9 = vadd.f32 1.0, %v3156_v54  ;;  %v4127_v23 = vpop.f32.mrb[13].mxu1  ;;  %v1854_v28 = vmul.f32 0.5, %v1758_v41  ;;  %v4141_v36 = vmul.f32 %v1844_v58, %v4003_v56 }
 0x241   : > { %v3160_v40 = vpop.eup %3159  ;;  %v4124_v17 = vmul.f32 %v1855_v59, %v4011_v62  ;;  %v1771_v63 = vadd.f32 1.0, %v3158_v1  ;;  %v4129_v52 = vpop.f32.mrb[21].mxu0  ;;  %v1856_v56 = vmul.f32 0.5, %v1760_v44 }
 0x242   : > { %v3162_v24 = vpop.eup %3161  ;;  %v4136_v29 = vpop.f32.mrb[14].mxu1  ;;  %v1865_v54 = vmul.f32 0.5, %v1769_v9  ;;  %v1770_v59 = vadd.f32 1.0, %v3160_v40  ;;  %v4155_v9 = vadd.f32 %v4081_v11, %v3976_v45  ;;  %v4158_v38 = vmul.f32 %v1854_v28, %v4016_v3 }
 0x243   : > { %v4138_v62 = vpop.f32.mrb[22].mxu0  ;;  %v3164_v30 = vpop.eup %3163  ;;  %v1867_v41 = vmul.f32 0.5, %v1771_v63  ;;  %v1772_v53 = vadd.f32 1.0, %v3162_v24  ;;  %v1604_v24 = vmul.f32 0.5, %v4151_v25 }
 0x244   : > { %v4145_v55 = vpop.f32.mrb[15].mxu1  ;;  %v4147_v37 = vpop.f32.mrb[23].mxu0  ;;  %v1781_v20 = vadd.f32 1.0, %v3164_v30  ;;  %v4162_v6 = vmul.f32 %v1865_v54, %v4028_v13  ;;  %v1866_v0 = vmul.f32 0.5, %v1770_v59  ;;  %v1613_v51 = vmul.f32 0.5, %v4155_v9 }
 0x245   : > { %v3166_v1 = vpop.eup %3165  ;;  %v1868_v11 = vmul.f32 0.5, %v1772_v53  ;;  %v4180_v54 = vadd.f32 %v4083_v12, %v3981_v46  ;;  %v1952_v12 = vmul.f32 %v1856_v56, %v4019_v4  ;;  %v4213_v4 = vadd.f32 %v4088_v22, %v3991_v48 }
 0x246   : > { %v3168_v26 = vpop.eup %3167  ;;  %v1783_v58 = vadd.f32 1.0, %v3166_v1  ;;  %v1877_v39 = vmul.f32 0.5, %v1781_v20  ;;  %v4166_v1 = vmul.f32 %v1867_v41, %v4031_v14  ;;  %v4171_v20 = vpop.f32.mrb[16].mxu1  ;;  %3177 = vtanh.f32 %v1613_v51 }
 0x247   : > { %v3170_v40 = vpop.eup %3169  ;;  %v1782_v63 = vadd.f32 1.0, %v3168_v26  ;;  %v4173_v26 = vpop.f32.mrb[24].mxu0  ;;  %3179 = vtanh.f32 %v1604_v24  ;;  %v4190_v41 = vadd.f32 %v4086_v21, %v3986_v47  ;;  %v4223_v56 = vadd.f32 %v4121_v16, %v3981_v46 }
 0x248   : > { %v3172_v30 = vpop.eup %3171  ;;  %v1879_v44 = vmul.f32 0.5, %v1783_v58  ;;  %v4169_v57 = vmul.f32 %v1877_v39, %v4044_v27  ;;  %v1784_v13 = vadd.f32 1.0, %v3170_v40  ;;  %v4182_v14 = vpop.f32.mrb[17].mxu1  ;;  %v4198_v58 = vmul.f32 %v1866_v0, %v4035_v18 }
 0x249   : > { %v1793_v3 = vadd.f32 1.0, %v3172_v30  ;;  %v4184_v59 = vpop.f32.mrb[25].mxu0  ;;  %v1878_v27 = vmul.f32 0.5, %v1782_v63  ;;  %v1615_v30 = vmul.f32 0.5, %v4180_v54  ;;  %v3174_v21 = vpop.eup %3173  ;;  %v1614_v39 = vmul.f32 0.5, %v4190_v41 }
 0x24a   : > { %v4176_v28 = vmul.f32 %v1879_v44, %v4049_v32  ;;  %v4192_v32 = vpop.f32.mrb[18].mxu1  ;;  %v4194_v53 = vpop.f32.mrb[26].mxu0  ;;  %v4208_v44 = vmul.f32 %v1868_v11, %v4038_v19  ;;  %v4215_v18 = vmul.f32 0.5, %v1784_v13  ;;  %v4219_v0 = vadd.f32 %v4119_v15, %v3976_v45 }
 0x24b   : > { %v4203_v63 = vpop.f32.mrb[19].mxu1  ;;  %v4205_v24 = vpop.f32.mrb[27].mxu0  ;;  %v1889_v51 = vmul.f32 0.5, %v1793_v3  ;;  %3181 = vtanh.f32 %v1615_v30  ;;  %v4226_v19 = vmul.f32 %v1878_v27, %v4053_v34  ;;  %v1616_v11 = vmul.f32 0.5, %v4213_v4 }
 0x24c   : > { %3183 = vtanh.f32 %v1614_v39  ;;  %v4231_v22 = vadd.f32 %v4127_v23, %v3986_v47  ;;  %v3176_v3 = vpop.eup %3175  ;;  %v1795_v13 = vadd.f32 1.0, %v3174_v21  ;;  %v1625_v30 = vmul.f32 0.5, %v4219_v0 }
 0x24d   : > { %v1627_v15 = vmul.f32 0.5, %v4223_v56  ;;  %v4237_v16 = vadd.f32 %v4129_v52, %v3991_v48  ;;  %v4240_v34 = vmul.f32 %v1889_v51, %v4071_v2  ;;  %3185 = vtanh.f32 %v1616_v11 }
 0x24e   : > { %v1626_v39 = vmul.f32 0.5, %v4231_v22  ;;  %v4245_v23 = vadd.f32 %v4136_v29, %v3976_v45  ;;  %v4247_v27 = vpop.f32.mrb[20].mxu1  ;;  %v4249_v21 = vpop.f32.mrb[28].mxu0  ;;  %3187 = vtanh.f32 %v1625_v30  ;;  %v4254_v52 = vadd.f32 %v4138_v62, %v3981_v46 }
 0x24f   : > { %5097 = vst [vmem:[#allocation15_spill] sm:$0xff] %v4240_v34  ;;  %v1628_v40 = vmul.f32 0.5, %v4237_v16  ;;  %v4258_v2 = vadd.f32 %v4145_v55, %v3986_v47  ;;  %v4260_v51 = vpop.f32.mrb[21].mxu1  ;;  %v4262_v11 = vpop.f32.mrb[29].mxu0  ;;  %3189 = vtanh.f32 %v1627_v15  ;;  %v4267_v29 = vadd.f32 %v4147_v37, %v3991_v48 }
 0x250   : > { %5098 = vst [vmem:[#allocation16_spill] sm:$0xff] %v4262_v11  ;;  %v1637_v45 = vmul.f32 0.5, %v4245_v23  ;;  %v2815_v30 = vpack.c.bf16 %v4158_v38, %v4132_v61  ;;  %v4271_v46 = vpop.f32.mrb[22].mxu1  ;;  %v4273_v62 = vpop.f32.mrb[30].mxu0  ;;  %v1794_v55 = vadd.f32 1.0, %v3176_v3  ;;  %3191 = vtanh.f32 %v1626_v39 }
 0x251   : > { %5099 = vst [vmem:[#allocation17_spill] sm:$0xff] %v4273_v62  ;;  %v3178_v47 = vpop.eup %3177  ;;  %v1639_v33 = vmul.f32 0.5, %v4254_v52  ;;  %v1638_v15 = vmul.f32 0.5, %v4258_v2  ;;  %v4277_v43 = vpop.f32.mrb[23].mxu1  ;;  %3193 = vtanh.f32 %v1628_v40  ;;  %v1640_v61 = vmul.f32 0.5, %v4267_v29 }
 0x252   : > { %v4279_v11 = vpop.f32.mrb[31].mxu0  ;;  %v3180_v48 = vpop.eup %3179  ;;  %v1805_v37 = vadd.f32 1.0, %v3178_v47  ;;  %2816 = vmatprep.subr.bf16.mxu1 %v2815_v30  ;;  %v2831_v38 = vpack.c.bf16 %v1952_v12, %v4141_v36  ;;  %v1891_v62 = vmul.f32 0.5, %v1795_v13  ;;  %3195 = vtanh.f32 %v1637_v45 }
 0x253   : > { %5100 = vst [vmem:[#allocation18_spill] sm:$0xff] %v4279_v11  ;;  %v5101_v3 = vpack.c.bf16 %v4117_v8, %v4111_v42  ;;  %v4288_v39 = vadd.f32 %v4171_v20, %v4061_v49  ;;  %v4292_v11 = vadd.f32 %v4173_v26, %v4064_v50  ;;  %3197 = vtanh.f32 %v1639_v33 }
 0x254   : > { %v1901_v40 = vmul.f32 0.5, %v1805_v37  ;;  %2832 = vmatprep.subr.bf16.mxu0 %v2831_v38  ;;  %v4296_v36 = vadd.f32 %v4182_v14, %v4068_v60  ;;  %v4300_v12 = vadd.f32 %v4184_v59, %v4076_v7  ;;  %v1796_v8 = vadd.f32 1.0, %v3180_v48 }
 0x255   : > { %2818 = vmatpush1.bf16.msra.mxu1 %v5101_v3  ;;  %v3182_v42 = vpop.eup %3181  ;;  %3199 = vtanh.f32 %v1638_v15  ;;  %v5103_v20 = vpack.c.bf16 %v4124_v17, %v4114_v5  ;;  %v1557_v26 = vmul.f32 0.5, %v4288_v39  ;;  %v1559_v33 = vmul.f32 0.5, %v4292_v11 }
 0x256   : > { %5102 = vst [vmem:[#allocation19_spill] sm:$0xff] %v4300_v12  ;;  %v3184_v13 = vpop.eup %3183  ;;  %v4308_v45 = vmul.f32 %v1901_v40, %v4155_v9  ;;  %v1807_v14 = vadd.f32 1.0, %v3182_v42  ;;  %3201 = vtanh.f32 %v1640_v61  ;;  %v1558_v59 = vmul.f32 0.5, %v4296_v36  ;;  %v4311_v30 = vpop.f32.mrb[24].mxu1 }
 0x257   : > { %2834 = vmatpush1.bf16.msra.mxu0 %v5103_v20  ;;  %v4313_v47 = vpop.f32.mrb[32].mxu0  ;;  %v1806_v15 = vadd.f32 1.0, %v3184_v13  ;;  %3203 = vtanh.f32 %v1557_v26  ;;  %v1560_v5 = vmul.f32 0.5, %v4300_v12  ;;  %v4318_v17 = vadd.f32 %v4192_v32, %v4061_v49  ;;  %v4320_v48 = vpop.f32.mrb[25].mxu1 }
 0x258   : > { %5104 = vst [vmem:[#allocation20_spill] sm:$0xff] %v4320_v48  ;;  %v4322_v9 = vpop.f32.mrb[33].mxu0  ;;  %v3186_v37 = vpop.eup %3185  ;;  %v1903_v38 = vmul.f32 0.5, %v1807_v14  ;;  %3205 = vtanh.f32 %v1559_v33  ;;  %v4328_v3 = vadd.f32 %v4194_v53, %v4064_v50  ;;  %v4335_v20 = vmul.f32 %v1891_v62, %v4079_v10 }
 0x259   : > { %5105 = vst [vmem:[#allocation21_spill] sm:$0xff] %v4322_v9  ;;  %v4330_v40 = vpop.f32.mrb[26].mxu1  ;;  %v4332_v42 = vpop.f32.mrb[34].mxu0  ;;  %v1890_v26 = vmul.f32 0.5, %v1794_v55  ;;  %3207 = vtanh.f32 %v1558_v59  ;;  %v1569_v13 = vmul.f32 0.5, %v4318_v17  ;;  %v1892_v9 = vmul.f32 0.5, %v1796_v8 }
 0x25a   : > { %5106 = vst [vmem:[#allocation22_spill] sm:$0xff] %v4330_v40  ;;  %5107 = vst [vmem:[#allocation23_spill] sm:$0xff] %v4332_v42  ;;  %v3188_v32 = vpop.eup %3187  ;;  %v4338_v12 = vpop.f32.mrb[27].mxu1  ;;  %v4343_v53 = vmul.f32 %v1903_v38, %v4180_v54  ;;  %3209 = vtanh.f32 %v1560_v5  ;;  %v1571_v42 = vmul.f32 0.5, %v4328_v3  ;;  %v1902_v10 = vmul.f32 0.5, %v1806_v15 }
 0x25b   : > { %5108 = vst [vmem:[#allocation24_spill] sm:$0xff] %v4338_v12  ;;  %v4340_v14 = vpop.f32.mrb[35].mxu0  ;;  %v3190_v33 = vpop.eup %3189  ;;  %v1817_v61 = vadd.f32 1.0, %v3188_v32  ;;  %3211 = vtanh.f32 %v1569_v13  ;;  %v1808_v12 = vadd.f32 1.0, %v3186_v37  ;;  %v4350_v5 = vadd.f32 %v4203_v63, %v4068_v60 }
 0x25c   : > { %5109 = vst [vmem:[#allocation25_spill] sm:$0xff] %v4340_v14  ;;  %v3192_v40 = vpop.eup %3191  ;;  %v1819_v62 = vadd.f32 1.0, %v3190_v33  ;;  %3213 = vtanh.f32 %v1571_v42  ;;  %v4354_v8 = vmul.f32 %v4215_v18, %v4056_v35  ;;  %v4357_v15 = vmul.f32 %v1890_v26, %v4095_v31 }
 0x25d   : > { %v3194_v55 = vpop.eup %3193  ;;  %v1913_v48 = vmul.f32 0.5, %v1817_v61  ;;  %v1818_v54 = vadd.f32 1.0, %v3192_v40  ;;  %5110 = vst [vmem:[#allocation26_spill] sm:$0xff] %v4350_v5  ;;  %v4361_v37 = vadd.f32 %v4205_v24, %v4076_v7  ;;  %v4368_v63 = vmul.f32 %v1892_v9, %v4151_v25 }
 0x25e   : > { %v3196_v14 = vpop.eup %3195  ;;  %v1915_v34 = vmul.f32 0.5, %v1819_v62  ;;  %v1820_v38 = vadd.f32 1.0, %v3194_v55  ;;  %v4363_v61 = vpop.f32.mrb[28].mxu1  ;;  %v4371_v33 = vmul.f32 %v1902_v10, %v4190_v41  ;;  %v1570_v31 = vmul.f32 0.5, %v4350_v5 }
 0x25f   : > { %v3198_v32 = vpop.eup %3197  ;;  %v1829_v13 = vadd.f32 1.0, %v3196_v14  ;;  %5111 = vst [vmem:[#allocation27_spill] sm:$0xff] %v4361_v37  ;;  %v4365_v40 = vpop.f32.mrb[36].mxu0  ;;  %v1904_v14 = vmul.f32 0.5, %v1808_v12  ;;  %v4379_v62 = vmul.f32 %v1913_v48, %v4219_v0  ;;  %v1572_v59 = vmul.f32 0.5, %v4361_v37 }
 0x260   : > { %5112 = vst [vmem:[#allocation28_spill] sm:$0xff] %v4365_v40  ;;  %v3200_v42 = vpop.eup %3199  ;;  %v1831_v35 = vadd.f32 1.0, %v3198_v32  ;;  %v4374_v18 = vpop.f32.mrb[29].mxu1  ;;  %v4387_v10 = vmul.f32 %v1915_v34, %v4223_v56  ;;  %v1914_v32 = vmul.f32 0.5, %v1818_v54  ;;  %3215 = vtanh.f32 %v1570_v31 }
 0x261   : > { %5113 = vst [vmem:[#allocation29_spill] sm:$0xff] %v4374_v18  ;;  %v4376_v26 = vpop.f32.mrb[37].mxu0  ;;  %v3202_v24 = vpop.eup %3201  ;;  %v1925_v55 = vmul.f32 0.5, %v1829_v13  ;;  %v1916_v18 = vmul.f32 0.5, %v1820_v38  ;;  %v1830_v13 = vadd.f32 1.0, %v3200_v42  ;;  %v2819_v34 = vpack.c.bf16 %v4226_v19, %v4198_v58 }
 0x262   : > { %5114 = vst [vmem:[#allocation30_spill] sm:$0xff] %v4376_v26  ;;  %v4382_v25 = vpop.f32.mrb[30].mxu1  ;;  %v4384_v9 = vpop.f32.mrb[38].mxu0  ;;  %v1927_v5 = vmul.f32 0.5, %v1831_v35  ;;  %v1832_v37 = vadd.f32 1.0, %v3202_v24  ;;  %v4402_v38 = vmul.f32 %v1904_v14, %v4213_v4  ;;  %3217 = vtanh.f32 %v1572_v59 }
 0x263   : > { %5115 = vst [vmem:[#allocation31_spill] sm:$0xff] %v4382_v25  ;;  %5116 = vst [vmem:[#allocation32_spill] sm:$0xff] %v4384_v9  ;;  %v3204_v41 = vpop.eup %3203  ;;  %v4389_v26 = vpop.f32.mrb[31].mxu1  ;;  %v4394_v48 = vmul.f32 %v1925_v55, %v4245_v23  ;;  %v4407_v24 = vmul.f32 %v1914_v32, %v4231_v22  ;;  %2820 = vmatprep.subr.bf16.mxu1 %v2819_v34  ;;  %v1926_v4 = vmul.f32 0.5, %v1830_v13  ;;  %v5136_v23 = vld [vmem:[#allocation25_spill] sm:$0xff] }
 0x264   : > { %v4391_v12 = vpop.f32.mrb[39].mxu0  ;;  %v3206_v0 = vpop.eup %3205  ;;  %v1749_v25 = vadd.f32 1.0, %v3204_v41  ;;  %v4397_v9 = vmul.f32 %v1927_v5, %v4254_v52  ;;  %v4410_v52 = vmul.f32 %v1916_v18, %v4237_v16  ;;  %v1928_v31 = vmul.f32 0.5, %v1832_v37 }
 0x265   : > { %v3208_v40 = vpop.eup %3207  ;;  %v1751_v56 = vadd.f32 1.0, %v3206_v0  ;;  %v2835_v55 = vpack.c.bf16 %v4354_v8, %v4208_v44  ;;  %v5117_v59 = vpack.c.bf16 %v4169_v57, %v4162_v6  ;;  %v4425_v32 = vadd.f32 %v4247_v27, %v4061_v49 }
 0x266   : > { %v3210_v54 = vpop.eup %3209  ;;  %v1845_v35 = vmul.f32 0.5, %v1749_v25  ;;  %v4419_v22 = vpop.f32.mrb[32].mxu1  ;;  %v1750_v18 = vadd.f32 1.0, %v3208_v40  ;;  %v4436_v6 = vadd.f32 %v4249_v21, %v4064_v50  ;;  %v4440_v8 = vadd.f32 %v4260_v51, %v4068_v60  ;;  %v5119_v21 = vld [vmem:[#allocation16_spill] sm:$0xff] }
 0x267   : > { %v3212_v42 = vpop.eup %3211  ;;  %v1847_v58 = vmul.f32 0.5, %v1751_v56  ;;  %2822 = vmatpush1.bf16.msra.mxu1 %v5117_v59  ;;  %v4421_v16 = vpop.f32.mrb[40].mxu0  ;;  %v1752_v25 = vadd.f32 1.0, %v3210_v54  ;;  %2836 = vmatprep.subr.bf16.mxu0 %v2835_v55  ;;  %v1581_v34 = vmul.f32 0.5, %v4425_v32  ;;  %v4455_v54 = vadd.f32 %v5119_v21, %v4076_v7  ;;  %v5128_v59 = vld [vmem:[#allocation15_spill] sm:$0xff] }
 0x268   : > { %v3214_v19 = vpop.eup %3213  ;;  %v1761_v14 = vadd.f32 1.0, %v3212_v42  ;;  %v4427_v37 = vpop.f32.mrb[33].mxu1  ;;  %v4432_v44 = vmul.f32 %v1845_v35, %v4288_v39  ;;  %v5118_v39 = vpack.c.bf16 %v4176_v28, %v4166_v1  ;;  %v4468_v1 = vadd.f32 %v4271_v46, %v4061_v49 }
 0x269   : > { %v1763_v41 = vadd.f32 1.0, %v3214_v19  ;;  %v4429_v0 = vpop.f32.mrb[41].mxu0  ;;  %v4442_v40 = vpop.f32.mrb[34].mxu1  ;;  %v4447_v13 = vmul.f32 %v1847_v58, %v4292_v11  ;;  %v1583_v11 = vmul.f32 0.5, %v4436_v6  ;;  %v1582_v58 = vmul.f32 0.5, %v4440_v8 }
 0x26a   : > { %v1857_v57 = vmul.f32 0.5, %v1761_v14  ;;  %v4444_v27 = vpop.f32.mrb[42].mxu0  ;;  %2838 = vmatpush1.bf16.msra.mxu0 %v5118_v39  ;;  %v4457_v51 = vpop.f32.mrb[35].mxu1  ;;  %3219 = vtanh.f32 %v1581_v34  ;;  %v1584_v19 = vmul.f32 0.5, %v4455_v54  ;;  %v5120_v14 = vld [vmem:[#allocation17_spill] sm:$0xff]  ;;  %v1593_v46 = vmul.f32 0.5, %v4468_v1 }
 0x26b   : > { %v1859_v56 = vmul.f32 0.5, %v1763_v41  ;;  %v4459_v35 = vpop.f32.mrb[43].mxu0  ;;  %v4476_v55 = vadd.f32 %v5120_v14, %v4064_v50  ;;  %3221 = vtanh.f32 %v1583_v11  ;;  %v3216_v41 = vpop.eup %3215  ;;  %v4488_v34 = vmul.f32 %v1928_v31, %v4267_v29 }
 0x26c   : > { %v4462_v42 = vmul.f32 %v1857_v57, %v4318_v17  ;;  %v4479_v17 = vmul.f32 %v1926_v4, %v4258_v2  ;;  %v1846_v57 = vmul.f32 0.5, %v1750_v18  ;;  %3223 = vtanh.f32 %v1582_v58  ;;  %v3218_v39 = vpop.eup %3217  ;;  %v5121_v4 = vld [vmem:[#allocation18_spill] sm:$0xff] }
 0x26d   : > { %v4471_v28 = vmul.f32 %v1859_v56, %v4328_v3  ;;  %v1595_v56 = vmul.f32 0.5, %v4476_v55  ;;  %3225 = vtanh.f32 %v1584_v19  ;;  %v4492_v2 = vadd.f32 %v4277_v43, %v4068_v60 }
 0x26e   : > { %v4496_v21 = vadd.f32 %v5121_v4, %v4076_v7  ;;  %v4498_v18 = vpop.f32.mrb[36].mxu1  ;;  %v4500_v11 = vpop.f32.mrb[44].mxu0  ;;  %v4502_v58 = vmul.f32 0.5, %v1752_v25  ;;  %3227 = vtanh.f32 %v1593_v46  ;;  %v2823_v29 = vpack.c.bf16 %v4371_v33, %v4357_v15 }
 0x26f   : > { %v2839_v31 = vpack.c.bf16 %v4402_v38, %v4368_v63  ;;  %v4508_v19 = vpop.f32.mrb[37].mxu1  ;;  %v4510_v43 = vpop.f32.mrb[45].mxu0  ;;  %v1762_v14 = vadd.f32 1.0, %v3216_v41  ;;  %3229 = vtanh.f32 %v1595_v56  ;;  %v1594_v4 = vmul.f32 0.5, %v4492_v2 }
 0x270   : > { %5122 = vst [vmem:[#allocation16_spill] sm:$0xff] %v4508_v19  ;;  %5123 = vst [vmem:[#allocation17_spill] sm:$0xff] %v4510_v43  ;;  %v1596_v3 = vmul.f32 0.5, %v4496_v21  ;;  %v4514_v25 = vpop.f32.mrb[38].mxu1  ;;  %v4516_v46 = vpop.f32.mrb[46].mxu0  ;;  %v4519_v15 = vmul.f32 %v1846_v57, %v4296_v36  ;;  %v1764_v33 = vadd.f32 1.0, %v3218_v39  ;;  %2824 = vmatprep.subr.bf16.mxu1 %v2823_v29  ;;  %v4523_v63 = vadd.f32 %v4311_v30, %v4061_v49 }
 0x271   : > { %5124 = vst [vmem:[#allocation18_spill] sm:$0xff] %v4514_v25  ;;  %5125 = vst [vmem:[#allocation33_spill] sm:$0xff] %v4516_v46  ;;  %2840 = vmatprep.subr.bf16.mxu0 %v2839_v31  ;;  %v4527_v38 = vadd.f32 %v4313_v47, %v4064_v50  ;;  %v4529_v41 = vpop.f32.mrb[39].mxu1  ;;  %v4531_v56 = vpop.f32.mrb[47].mxu0  ;;  %3231 = vtanh.f32 %v1594_v4  ;;  %v5129_v36 = vpack.c.bf16 %v4308_v45, %v5128_v59  ;;  %v5131_v30 = vld [vmem:[#allocation20_spill] sm:$0xff]  ;;  %v5132_v47 = vld [vmem:[#allocation21_spill] sm:$0xff] }
 0x272   : > { %5126 = vst [vmem:[#allocation34_spill] sm:$0xff] %v4529_v41  ;;  %5127 = vst [vmem:[#allocation35_spill] sm:$0xff] %v4531_v56  ;;  %v5130_v57 = vpack.c.bf16 %v4343_v53, %v4335_v20  ;;  %v4541_v39 = vadd.f32 %v5131_v30, %v4068_v60  ;;  %v4545_v29 = vadd.f32 %v5132_v47, %v4076_v7  ;;  %v5133_v31 = vld [vmem:[#allocation22_spill] sm:$0xff]  ;;  %3233 = vtanh.f32 %v1596_v3  ;;  %v5134_v20 = vld [vmem:[#allocation23_spill] sm:$0xff] }
 0x273   : > { %2826 = vmatpush1.bf16.msra.mxu1 %v5129_v36  ;;  %v4549_v5 = vadd.f32 %v5133_v31, %v4061_v49  ;;  %v1605_v45 = vmul.f32 0.5, %v4523_v63  ;;  %v1607_v59 = vmul.f32 0.5, %v4527_v38  ;;  %v4555_v53 = vadd.f32 %v5134_v20, %v4064_v50  ;;  %v5135_v30 = vld [vmem:[#allocation24_spill] sm:$0xff] }
 0x274   : > { %2842 = vmatpush1.bf16.msra.mxu0 %v5130_v57  ;;  %v1858_v4 = vmul.f32 0.5, %v1762_v14  ;;  %v1606_v36 = vmul.f32 0.5, %v4541_v39  ;;  %v1608_v57 = vmul.f32 0.5, %v4545_v29  ;;  %v4561_v47 = vadd.f32 %v5135_v30, %v4068_v60  ;;  %v3220_v31 = vpop.eup %3219 }
 0x275   : > { %3235 = vtanh.f32 %v1605_v45  ;;  %v1617_v3 = vmul.f32 0.5, %v4549_v5  ;;  %v4566_v56 = vadd.f32 %v5136_v23, %v4076_v7  ;;  %v2827_v20 = vpack.c.bf16 %v4479_v17, %v4407_v24  ;;  %v3222_v14 = vpop.eup %3221 }
 0x276   : > { %v1773_v41 = vadd.f32 1.0, %v3220_v31  ;;  %3237 = vtanh.f32 %v1607_v59  ;;  %v1619_v46 = vmul.f32 0.5, %v4555_v53  ;;  %v2843_v30 = vpack.c.bf16 %v4488_v34, %v4410_v52  ;;  %v4573_v25 = vpop.f32.mrb[40].mxu1  ;;  %v4575_v45 = vpop.f32.mrb[48].mxu0 }
 0x277   : > { %5137 = vst [vmem:[#allocation15_spill] sm:$0xff] %v4566_v56  ;;  %5138 = vst [vmem:[#allocation20_spill] sm:$0xff] %v4573_v25  ;;  %v3224_v43 = vpop.eup %3223  ;;  %v1775_v19 = vadd.f32 1.0, %v3222_v14  ;;  %3239 = vtanh.f32 %v1606_v36  ;;  %v1618_v23 = vmul.f32 0.5, %v4561_v47  ;;  %2828 = vmatprep.subr.bf16.mxu1 %v2827_v20  ;;  %v4580_v24 = vadd.f32 %v4363_v61, %v4061_v49  ;;  %v4582_v17 = vpop.f32.mrb[41].mxu1  ;;  %v5143_v20 = vld [vmem:[#allocation28_spill] sm:$0xff] }
 0x278   : > { %5139 = vst [vmem:[#allocation21_spill] sm:$0xff] %v4575_v45  ;;  %5140 = vst [vmem:[#allocation22_spill] sm:$0xff] %v4582_v17  ;;  %v4584_v59 = vpop.f32.mrb[49].mxu0  ;;  %v3226_v31 = vpop.eup %3225  ;;  %v1869_v52 = vmul.f32 0.5, %v1773_v41  ;;  %3241 = vtanh.f32 %v1608_v57  ;;  %v1620_v34 = vmul.f32 0.5, %v4566_v56  ;;  %2844 = vmatprep.subr.bf16.mxu0 %v2843_v30  ;;  %v5142_v36 = vpack.c.bf16 %v4394_v48, %v4379_v62  ;;  %v5150_v56 = vld [vmem:[#allocation26_spill] sm:$0xff] }
 0x279   : > { %5141 = vst [vmem:[#allocation23_spill] sm:$0xff] %v4584_v59  ;;  %v4592_v14 = vadd.f32 %v5143_v20, %v4064_v50  ;;  %v4594_v61 = vpop.f32.mrb[42].mxu1  ;;  %v4596_v45 = vpop.f32.mrb[50].mxu0  ;;  %v5146_v59 = vld [vmem:[#allocation19_spill] sm:$0xff]  ;;  %v1774_v57 = vadd.f32 1.0, %v3224_v43  ;;  %3243 = vtanh.f32 %v1617_v3  ;;  %v5147_v30 = vpack.c.bf16 %v4397_v9, %v4387_v10 }
 0x27a   : > { %2830 = vmatpush1.bf16.msra.mxu1 %v5142_v36  ;;  %5144 = vst [vmem:[#allocation24_spill] sm:$0xff] %v4594_v61  ;;  %5145 = vst [vmem:[#allocation25_spill] sm:$0xff] %v4596_v45  ;;  %v3228_v17 = vpop.eup %3227  ;;  %v4600_v41 = vmul.f32 %v4502_v58, %v5146_v59  ;;  %v1629_v62 = vmul.f32 0.5, %v4580_v24  ;;  %v4606_v48 = vpop.f32.mrb[43].mxu1  ;;  %v1860_v61 = vmul.f32 0.5, %v1764_v33  ;;  %v1776_v45 = vadd.f32 1.0, %v3226_v31 }
 0x27b   : > { %2846 = vmatpush1.bf16.msra.mxu0 %v5147_v30  ;;  %5148 = vst [vmem:[#allocation28_spill] sm:$0xff] %v4606_v48  ;;  %v4608_v36 = vpop.f32.mrb[51].mxu0  ;;  %v3230_v20 = vpop.eup %3229  ;;  %v1785_v25 = vadd.f32 1.0, %v3228_v17  ;;  %3245 = vtanh.f32 %v1619_v46  ;;  %v4611_v58 = vmul.f32 %v1858_v4, %v5150_v56  ;;  %v1871_v43 = vmul.f32 0.5, %v1775_v19 }
 0x27c   : > { %5149 = vst [vmem:[#allocation19_spill] sm:$0xff] %v4608_v36  ;;  %v1787_v3 = vadd.f32 1.0, %v3230_v20  ;;  %3247 = vtanh.f32 %v1618_v23  ;;  %v5079_v59 = vmov 1.0   ;;  %v3232_v9 = vpop.eup %3231  ;;  %v4616_v10 = vmul.f32 %v1869_v52, %v4425_v32 }
 0x27d   : > { %2788 = vmatmul.mubr.msk.f32.vlgmr.msra.gmra.mrb[48].mxu1 %vm2035_vm1, %v5079_v59  ;;  %v1881_v30 = vmul.f32 0.5, %v1785_v25  ;;  %3249 = vtanh.f32 %v1620_v34  ;;  %v1631_v33 = vmul.f32 0.5, %v4592_v14  ;;  %v5151_v46 = vmov 0.0   ;;  %v3234_v19 = vpop.eup %3233  ;;  %v5152_v25 = vld [vmem:[#allocation29_spill] sm:$0xff] }
 0x27e   : > { %2789 = vmatmul.mubr.msk.f32.vlgmr.msra.gmra.mrb[56].mxu0 %vm2035_vm1, %v5079_v59  ;;  %2245 = vmatprep.mubr.f32.mxu1 %v5151_v46  ;;  %v1870_v56 = vmul.f32 0.5, %v1774_v57  ;;  %v1883_v4 = vmul.f32 0.5, %v1787_v3  ;;  %v1786_v23 = vadd.f32 1.0, %v3232_v9  ;;  %3251 = vtanh.f32 %v1629_v62  ;;  %v4630_v52 = vpop.f32.mrb[44].mxu1  ;;  %v4632_v34 = vpop.f32.mrb[52].mxu0  ;;  %v5158_v3 = vld [vmem:[#allocation31_spill] sm:$0xff] }
 0x27f   : > { %2316 = vmatprep.mubr.f32.mxu0 %v5151_v46  ;;  %v1872_v17 = vmul.f32 0.5, %v1776_v45  ;;  %v4624_v32 = vmul.f32 %v1881_v30, %v4468_v1  ;;  %3253 = vtanh.f32 %v1631_v33  ;;  %v4628_v31 = vadd.f32 %v5152_v25, %v4068_v60  ;;  %5154 = vst [vmem:[#allocation29_spill] sm:$0xff] %v4630_v52  ;;  %5155 = vst [vmem:[#allocation36_spill] sm:$0xff] %v4632_v34  ;;  %v3236_v20 = vpop.eup %3235  ;;  %v5156_v45 = vld [vmem:[#allocation30_spill] sm:$0xff]  ;;  %v4648_v30 = vpop.f32.mrb[45].mxu1 }
 0x280   : > { %v4635_v57 = vmul.f32 %v1871_v43, %v4436_v6  ;;  %v4638_v62 = vmul.f32 %v1883_v4, %v4476_v55  ;;  %v4642_v1 = vadd.f32 %v5156_v45, %v4076_v7  ;;  %v4646_v9 = vadd.f32 %v5158_v3, %v4061_v49  ;;  %5159 = vst [vmem:[#allocation31_spill] sm:$0xff] %v4648_v30  ;;  %v4650_v33 = vpop.f32.mrb[53].mxu0  ;;  %v3238_v25 = vpop.eup %3237 }
 0x281   : > { %5153 = vst [vmem:[#allocation26_spill] sm:$0xff] %v4628_v31  ;;  %5160 = vst [vmem:[#allocation37_spill] sm:$0xff] %v4650_v33  ;;  %v1788_v43 = vadd.f32 1.0, %v3234_v19  ;;  %v1797_v59 = vadd.f32 1.0, %v3236_v20  ;;  %v1630_v55 = vmul.f32 0.5, %v4628_v31  ;;  %v4655_v4 = vpop.f32.mrb[46].mxu1  ;;  %v3240_v46 = vpop.eup %3239  ;;  %v4668_v36 = vmul.f32 %v1870_v56, %v4440_v8 }
 0x282   : > { %5157 = vst [vmem:[#allocation30_spill] sm:$0xff] %v4642_v1  ;;  %5161 = vst [vmem:[#allocation38_spill] sm:$0xff] %v4655_v4  ;;  %v4657_v45 = vpop.f32.mrb[54].mxu0  ;;  %v1882_v3 = vmul.f32 0.5, %v1786_v23  ;;  %v1799_v30 = vadd.f32 1.0, %v3238_v25  ;;  %v1632_v33 = vmul.f32 0.5, %v4642_v1  ;;  %v3242_v19 = vpop.eup %3241 }
 0x283   : > { %5162 = vst [vmem:[#allocation39_spill] sm:$0xff] %v4657_v45  ;;  %v4662_v34 = vpop.f32.mrb[47].mxu1  ;;  %v4664_v52 = vpop.f32.mrb[55].mxu0  ;;  %v5165_v20 = vld [vmem:[#allocation27_spill] sm:$0xff]  ;;  %v4671_v45 = vmul.f32 %v1872_v17, %v4455_v54  ;;  %v1893_v4 = vmul.f32 0.5, %v1797_v59  ;;  %v1798_v23 = vadd.f32 1.0, %v3240_v46  ;;  %3255 = vtanh.f32 %v1630_v55 }
 0x284   : > { %5163 = vst [vmem:[#allocation40_spill] sm:$0xff] %v4662_v34  ;;  %5164 = vst [vmem:[#allocation41_spill] sm:$0xff] %v4664_v52  ;;  %v1956_v6 = vmul.f32 %v1860_v61, %v5165_v20  ;;  %v3244_v48 = vpop.eup %3243  ;;  %v1895_v49 = vmul.f32 0.5, %v1799_v30  ;;  %v1641_v25 = vmul.f32 0.5, %v4646_v9  ;;  %v1800_v34 = vadd.f32 1.0, %v3242_v19  ;;  %v5166_v52 = vld [vmem:[#allocation32_spill] sm:$0xff] }
 0x285   : > { %v3246_v1 = vpop.eup %3245  ;;  %v1809_v31 = vadd.f32 1.0, %v3244_v48  ;;  %3257 = vtanh.f32 %v1632_v33  ;;  %v4676_v61 = vadd.f32 %v5166_v52, %v4064_v50  ;;  %v4679_v56 = vmul.f32 %v1882_v3, %v4492_v2 }
 0x286   : > { %v3248_v8 = vpop.eup %3247  ;;  %v1884_v54 = vmul.f32 0.5, %v1788_v43  ;;  %v1811_v59 = vadd.f32 1.0, %v3246_v1  ;;  %3259 = vtanh.f32 %v1641_v25  ;;  %v4682_v46 = vmul.f32 %v1893_v4, %v4523_v63 }
 0x287   : > { %v3250_v17 = vpop.eup %3249  ;;  %v1905_v30 = vmul.f32 0.5, %v1809_v31  ;;  %v1810_v55 = vadd.f32 1.0, %v3248_v8  ;;  %v1643_v48 = vmul.f32 0.5, %v4676_v61  ;;  %v4686_v19 = vmul.f32 %v1895_v49, %v4527_v38 }
 0x288   : > { %v3252_v33 = vpop.eup %3251  ;;  %v1894_v50 = vmul.f32 0.5, %v1798_v23  ;;  %v1907_v52 = vmul.f32 0.5, %v1811_v59  ;;  %v4690_v2 = vadd.f32 %v4389_v26, %v4068_v60  ;;  %v1896_v43 = vmul.f32 0.5, %v1800_v34 }
 0x289   : > { %v3254_v1 = vpop.eup %3253  ;;  %v4693_v3 = vmul.f32 %v1905_v30, %v4549_v5  ;;  %v1821_v63 = vadd.f32 1.0, %v3252_v33  ;;  %3261 = vtanh.f32 %v1643_v48  ;;  %v1906_v4 = vmul.f32 0.5, %v1810_v55  ;;  %v5168_v55 = vld [vmem:[#allocation12_spill] sm:$0xff] }
 0x28a   : > { %v4696_v31 = vmul.f32 %v1907_v52, %v4555_v53  ;;  %v1812_v20 = vadd.f32 1.0, %v3250_v17  ;;  %v1823_v38 = vadd.f32 1.0, %v3254_v1  ;;  %v1642_v60 = vmul.f32 0.5, %v4690_v2 }
 0x28b   : > { %v2857_v49 = vpack.c.bf16 %v4693_v3, %v4682_v46  ;;  %v1917_v23 = vmul.f32 0.5, %v1821_v63  ;;  %v4703_v26 = vadd.f32 %v4391_v12, %v4076_v7  ;;  %v1980_v5 = vmul.f32 %v1884_v54, %v4496_v21  ;;  %v5167_v54 = vld [vmem:[#allocation11_spill] sm:$0xff] }
 0x28c   : > { %v4707_v34 = vmul.f32 %v1894_v50, %v4541_v39  ;;  %v2873_v53 = vpack.c.bf16 %v4696_v31, %v4686_v19  ;;  %v1919_v25 = vmul.f32 0.5, %v1823_v38  ;;  %v4712_v8 = vmul.f32 %v1896_v43, %v4545_v29 }
 0x28d   : > { %v1644_v59 = vmul.f32 0.5, %v4703_v26  ;;  %v2847_v17 = vpack.c.bf16 %v4611_v58, %v4519_v15  ;;  %v2863_v7 = vpack.c.bf16 %v1956_v6, %v4600_v41  ;;  %v3256_v12 = vpop.eup %3255  ;;  %v4719_v21 = vmul.f32 %v1906_v4, %v4561_v47  ;;  %v5169_v15 = vld [vmem:[#allocation13_spill] sm:$0xff]  ;;  %v5170_v41 = vld [vmem:[#allocation14_spill] sm:$0xff] }
 0x28e   : > { %v1908_v39 = vmul.f32 0.5, %v1812_v20  ;;  %v4723_v30 = vadd.f32 %v4419_v22, %v5167_v54  ;;  %v4727_v29 = vadd.f32 %v4421_v16, %v5168_v55  ;;  %v4730_v33 = vmul.f32 %v1917_v23, %v4580_v24 }
 0x28f   : > { %v3258_v48 = vpop.eup %3257  ;;  %3263 = vtanh.f32 %v1642_v60  ;;  %2848 = vmatprep.subr.bf16.mxu1 %v2847_v17  ;;  %2864 = vmatprep.subr.bf16.mxu0 %v2863_v7  ;;  %v4734_v47 = vadd.f32 %v4427_v37, %v5169_v15  ;;  %v4738_v58 = vadd.f32 %v4429_v0, %v5170_v41  ;;  %v4741_v6 = vmul.f32 %v1919_v25, %v4592_v14 }
 0x290   : > { %v3260_v22 = vpop.eup %3259  ;;  %v5171_v16 = vpack.c.bf16 %v4462_v42, %v4432_v44  ;;  %v5172_v24 = vpack.c.bf16 %v4471_v28, %v4447_v13  ;;  %v1561_v50 = vmul.f32 0.5, %v4723_v30  ;;  %v1563_v37 = vmul.f32 0.5, %v4727_v29 }
 0x291   : > { %v4753_v0 = vadd.f32 %v4442_v40, %v5167_v54  ;;  %v1833_v52 = vadd.f32 1.0, %v3260_v22  ;;  %3265 = vtanh.f32 %v1644_v59  ;;  %v1562_v14 = vmul.f32 0.5, %v4734_v47 }
 0x292   : > { %2850 = vmatpush1.bf16.msra.mxu1 %v5171_v16  ;;  %2866 = vmatpush1.bf16.msra.mxu0 %v5172_v24  ;;  %v1564_v1 = vmul.f32 0.5, %v4738_v58  ;;  %v1822_v44 = vadd.f32 1.0, %v3256_v12  ;;  %3267 = vtanh.f32 %v1561_v50  ;;  %v4760_v13 = vadd.f32 %v4444_v27, %v5168_v55 }
 0x293   : > { %v1573_v42 = vmul.f32 0.5, %v4753_v0  ;;  %v3262_v28 = vpop.eup %3261  ;;  %v1824_v43 = vadd.f32 1.0, %v3258_v48  ;;  %v1929_v63 = vmul.f32 0.5, %v1833_v52  ;;  %3269 = vtanh.f32 %v1563_v37  ;;  %v5178_v37 = vld [vmem:[#allocation26_spill] sm:$0xff] }
 0x294   : > { %v4764_v40 = vadd.f32 %v4457_v51, %v5169_v15  ;;  %v1835_v4 = vadd.f32 1.0, %v3262_v28  ;;  %3271 = vtanh.f32 %v1562_v14  ;;  %v1575_v20 = vmul.f32 0.5, %v4760_v13 }
 0x295   : > { %v4769_v38 = vadd.f32 %v4459_v35, %v5170_v41  ;;  %v4772_v23 = vmul.f32 %v1929_v63, %v4646_v9  ;;  %3273 = vtanh.f32 %v1564_v1  ;;  %v2851_v60 = vpack.c.bf16 %v4679_v56, %v4668_v36  ;;  %v5174_v56 = vld [vmem:[#allocation16_spill] sm:$0xff] }
 0x296   : > { %v1574_v27 = vmul.f32 0.5, %v4764_v40  ;;  %v1931_v25 = vmul.f32 0.5, %v1835_v4  ;;  %3275 = vtanh.f32 %v1573_v42  ;;  %v2867_v59 = vpack.c.bf16 %v1980_v5, %v4671_v45  ;;  %v5180_v42 = vld [vmem:[#allocation33_spill] sm:$0xff] }
 0x297   : > { %v1576_v51 = vmul.f32 0.5, %v4769_v38  ;;  %v1918_v17 = vmul.f32 0.5, %v1822_v44  ;;  %v2861_v35 = vpack.c.bf16 %v4772_v23, %v4730_v33  ;;  %3277 = vtanh.f32 %v1575_v20  ;;  %2852 = vmatprep.subr.bf16.mxu1 %v2851_v60  ;;  %v5182_v60 = vld [vmem:[#allocation35_spill] sm:$0xff] }
 0x298   : > { %v4783_v9 = vadd.f32 %v4498_v18, %v5167_v54  ;;  %v4786_v7 = vmul.f32 %v1931_v25, %v4676_v61  ;;  %3279 = vtanh.f32 %v1574_v27  ;;  %2868 = vmatprep.subr.bf16.mxu0 %v2867_v59  ;;  %v5173_v36 = vpack.c.bf16 %v4624_v32, %v4616_v10  ;;  %v5175_v18 = vld [vmem:[#allocation15_spill] sm:$0xff]  ;;  %v5177_v32 = vld [vmem:[#allocation17_spill] sm:$0xff] }
 0x299   : > { %v4793_v45 = vadd.f32 %v4500_v11, %v5168_v55  ;;  %v4797_v5 = vadd.f32 %v5174_v56, %v5169_v15  ;;  %v3264_v12 = vpop.eup %3263  ;;  %v4800_v48 = vmul.f32 %v1908_v39, %v5175_v18  ;;  %3281 = vtanh.f32 %v1576_v51 }
 0x29a   : > { %2854 = vmatpush1.bf16.msra.mxu1 %v5173_v36  ;;  %v5176_v61 = vpack.c.bf16 %v4638_v62, %v4635_v57  ;;  %v1585_v10 = vmul.f32 0.5, %v4783_v9  ;;  %v4808_v22 = vadd.f32 %v5177_v32, %v5170_v41  ;;  %v1920_v11 = vmul.f32 0.5, %v1824_v43  ;;  %v5179_v62 = vld [vmem:[#allocation18_spill] sm:$0xff] }
 0x29b   : > { %v2877_v16 = vpack.c.bf16 %v4786_v7, %v4741_v6  ;;  %v1587_v24 = vmul.f32 0.5, %v4793_v45  ;;  %v1586_v39 = vmul.f32 0.5, %v4797_v5  ;;  %v3266_v50 = vpop.eup %3265  ;;  %v4815_v52 = vmul.f32 %v1918_v17, %v5178_v37  ;;  %v5181_v43 = vld [vmem:[#allocation34_spill] sm:$0xff] }
 0x29c   : > { %2870 = vmatpush1.bf16.msra.mxu0 %v5176_v61  ;;  %3283 = vtanh.f32 %v1585_v10  ;;  %v1588_v57 = vmul.f32 0.5, %v4808_v22  ;;  %v4820_v14 = vadd.f32 %v5179_v62, %v5167_v54  ;;  %v3268_v1 = vpop.eup %3267  ;;  %v1834_v44 = vadd.f32 1.0, %v3264_v12  ;;  %v5183_v32 = vld [vmem:[#allocation30_spill] sm:$0xff] }
 0x29d   : > { %3285 = vtanh.f32 %v1587_v24  ;;  %v4824_v28 = vadd.f32 %v5180_v42, %v5168_v55  ;;  %v4828_v63 = vadd.f32 %v5181_v43, %v5169_v15  ;;  %v3270_v4 = vpop.eup %3269  ;;  %v1753_v20 = vadd.f32 1.0, %v3268_v1 }
 0x29e   : > { %3287 = vtanh.f32 %v1586_v39  ;;  %v1597_v27 = vmul.f32 0.5, %v4820_v14  ;;  %v4833_v25 = vadd.f32 %v5182_v60, %v5170_v41  ;;  %v3272_v51 = vpop.eup %3271  ;;  %v1836_v59 = vadd.f32 1.0, %v3266_v50 }
 0x29f   : > { %v1755_v17 = vadd.f32 1.0, %v3270_v4  ;;  %3289 = vtanh.f32 %v1588_v57  ;;  %v1599_v36 = vmul.f32 0.5, %v4824_v28  ;;  %v3274_v56 = vpop.eup %3273  ;;  %v1849_v12 = vmul.f32 0.5, %v1753_v20 }
 0x2a0   : > { %v1754_v18 = vadd.f32 1.0, %v3272_v51  ;;  %3291 = vtanh.f32 %v1597_v27  ;;  %v1598_v61 = vmul.f32 0.5, %v4828_v63  ;;  %v3276_v10 = vpop.eup %3275  ;;  %v4838_v24 = vmul.f32 %v1920_v11, %v5183_v32 }
 0x2a1   : > { %v1851_v39 = vmul.f32 0.5, %v1755_v17  ;;  %3293 = vtanh.f32 %v1599_v36  ;;  %v1600_v37 = vmul.f32 0.5, %v4833_v25  ;;  %v3278_v62 = vpop.eup %3277  ;;  %v1930_v50 = vmul.f32 0.5, %v1834_v44 }
 0x2a2   : > { %v1756_v1 = vadd.f32 1.0, %v3274_v56  ;;  %v1765_v57 = vadd.f32 1.0, %v3276_v10  ;;  %3295 = vtanh.f32 %v1598_v61  ;;  %v3280_v42 = vpop.eup %3279  ;;  %v1932_v43 = vmul.f32 0.5, %v1836_v59 }
 0x2a3   : > { %v4842_v4 = vmul.f32 %v1849_v12, %v4723_v30  ;;  %v1850_v20 = vmul.f32 0.5, %v1754_v18  ;;  %v1767_v27 = vadd.f32 1.0, %v3278_v62  ;;  %v3282_v60 = vpop.eup %3281  ;;  %v1766_v11 = vadd.f32 1.0, %v3280_v42  ;;  %v5184_v18 = vld [vmem:[#allocation20_spill] sm:$0xff] }
 0x2a4   : > { %v1861_v51 = vmul.f32 0.5, %v1765_v57  ;;  %3297 = vtanh.f32 %v1600_v37  ;;  %v2855_v17 = vpack.c.bf16 %v4719_v21, %v4707_v34  ;;  %v4847_v36 = vmul.f32 %v1851_v39, %v4727_v29  ;;  %v5185_v34 = vld [vmem:[#allocation21_spill] sm:$0xff] }
 0x2a5   : > { %v1863_v44 = vmul.f32 0.5, %v1767_v27  ;;  %v1768_v56 = vadd.f32 1.0, %v3282_v60  ;;  %v2871_v59 = vpack.c.bf16 %v4800_v48, %v4712_v8  ;;  %v1852_v30 = vmul.f32 0.5, %v1756_v1 }
 0x2a6   : > { %v3284_v61 = vpop.eup %3283  ;;  %v4852_v12 = vmul.f32 %v1861_v51, %v4753_v0  ;;  %2856 = vmatprep.subr.bf16.mxu1 %v2855_v17  ;;  %v4856_v10 = vadd.f32 %v5184_v18, %v5167_v54  ;;  %v4860_v21 = vadd.f32 %v5185_v34, %v5168_v55  ;;  %v1862_v39 = vmul.f32 0.5, %v1766_v11  ;;  %v5186_v0 = vld [vmem:[#allocation22_spill] sm:$0xff]  ;;  %v5187_v18 = vld [vmem:[#allocation23_spill] sm:$0xff] }
 0x2a7   : > { %v3286_v29 = vpop.eup %3285  ;;  %v4863_v32 = vmul.f32 %v1863_v44, %v4760_v13  ;;  %v1777_v8 = vadd.f32 1.0, %v3284_v61  ;;  %2872 = vmatprep.subr.bf16.mxu0 %v2871_v59  ;;  %2858 = vmatpush1.bf16.msra.mxu1 %v2857_v49  ;;  %v4870_v48 = vadd.f32 %v5186_v0, %v5169_v15  ;;  %v1864_v1 = vmul.f32 0.5, %v1768_v56 }
 0x2a8   : > { %v3288_v37 = vpop.eup %3287  ;;  %v2881_v62 = vpack.c.bf16 %v4852_v12, %v4842_v4  ;;  %v1779_v57 = vadd.f32 1.0, %v3286_v29  ;;  %2874 = vmatpush1.bf16.msra.mxu0 %v2873_v53  ;;  %v1609_v13 = vmul.f32 0.5, %v4856_v10  ;;  %v2026_v46 = vmul.f32 %v1930_v50, %v4690_v2 }
 0x2a9   : > { %v3290_v42 = vpop.eup %3289  ;;  %v2897_v3 = vpack.c.bf16 %v4863_v32, %v4847_v36  ;;  %v1873_v49 = vmul.f32 0.5, %v1777_v8  ;;  %v1778_v27 = vadd.f32 1.0, %v3288_v37  ;;  %v2028_v51 = vmul.f32 %v1932_v43, %v4703_v26  ;;  %v5189_v8 = vld [vmem:[#allocation25_spill] sm:$0xff] }
 0x2aa   : > { %v3292_v60 = vpop.eup %3291  ;;  %v4883_v11 = vmul.f32 %v1850_v20, %v4734_v47  ;;  %v4886_v17 = vmul.f32 %v1852_v30, %v4738_v58  ;;  %v1611_v19 = vmul.f32 0.5, %v4860_v21  ;;  %v4890_v53 = vmul.f32 %v1862_v39, %v4764_v40 }
 0x2ab   : > { %v3294_v31 = vpop.eup %3293  ;;  %v1875_v2 = vmul.f32 0.5, %v1779_v57  ;;  %v1789_v50 = vadd.f32 1.0, %v3292_v60  ;;  %v1610_v44 = vmul.f32 0.5, %v4870_v48  ;;  %v4894_v59 = vmul.f32 %v1864_v1, %v4769_v38 }
 0x2ac   : > { %v3296_v56 = vpop.eup %3295  ;;  %v1780_v26 = vadd.f32 1.0, %v3290_v42  ;;  %v1791_v47 = vadd.f32 1.0, %v3294_v31  ;;  %3299 = vtanh.f32 %v1609_v13  ;;  %v4897_v58 = vmul.f32 %v1873_v49, %v4783_v9  ;;  %v5188_v9 = vld [vmem:[#allocation24_spill] sm:$0xff]  ;;  %v5191_v31 = vld [vmem:[#allocation19_spill] sm:$0xff] }
 0x2ad   : > { %v1874_v43 = vmul.f32 0.5, %v1778_v27  ;;  %v1885_v20 = vmul.f32 0.5, %v1789_v50  ;;  %3301 = vtanh.f32 %v1611_v19  ;;  %v1790_v30 = vadd.f32 1.0, %v3296_v56  ;;  %v5192_v56 = vld [vmem:[#allocation29_spill] sm:$0xff] }
 0x2ae   : > { %v3298_v61 = vpop.eup %3297  ;;  %v1887_v40 = vmul.f32 0.5, %v1791_v47  ;;  %3303 = vtanh.f32 %v1610_v44  ;;  %v4901_v34 = vadd.f32 %v5187_v18, %v5170_v41  ;;  %v4904_v38 = vmul.f32 %v1875_v2, %v4793_v45  ;;  %v5190_v45 = vld [vmem:[#allocation28_spill] sm:$0xff] }
 0x2af   : > { %v4907_v29 = vmul.f32 %v1885_v20, %v4820_v14  ;;  %v4911_v39 = vadd.f32 %v5188_v9, %v5167_v54  ;;  %v4915_v0 = vadd.f32 %v5189_v8, %v5168_v55  ;;  %v1876_v37 = vmul.f32 0.5, %v1780_v26  ;;  %v5193_v47 = vld [vmem:[#allocation36_spill] sm:$0xff] }
 0x2b0   : > { %v4918_v1 = vmul.f32 %v1887_v40, %v4824_v28  ;;  %v1612_v57 = vmul.f32 0.5, %v4901_v34  ;;  %v4923_v13 = vadd.f32 %v5190_v45, %v5169_v15  ;;  %v1792_v42 = vadd.f32 1.0, %v3298_v61  ;;  %v5194_v61 = vld [vmem:[#allocation31_spill] sm:$0xff] }
 0x2b1   : > { %v2885_v14 = vpack.c.bf16 %v4907_v29, %v4897_v58  ;;  %v1621_v49 = vmul.f32 0.5, %v4911_v39  ;;  %v1623_v27 = vmul.f32 0.5, %v4915_v0  ;;  %v1886_v19 = vmul.f32 0.5, %v1790_v30 }
 0x2b2   : > { %v2901_v60 = vpack.c.bf16 %v4918_v1, %v4904_v38  ;;  %3305 = vtanh.f32 %v1612_v57  ;;  %v1622_v28 = vmul.f32 0.5, %v4923_v13  ;;  %v4934_v2 = vadd.f32 %v5191_v31, %v5170_v41  ;;  %v5196_v57 = vld [vmem:[#allocation38_spill] sm:$0xff] }
 0x2b3   : > { %3307 = vtanh.f32 %v1621_v49  ;;  %v2859_v50 = vpack.c.bf16 %v2026_v46, %v4815_v52  ;;  %v2875_v44 = vpack.c.bf16 %v2028_v51, %v4838_v24  ;;  %v4940_v26 = vadd.f32 %v5192_v56, %v5167_v54  ;;  %v5195_v52 = vld [vmem:[#allocation37_spill] sm:$0xff] }
 0x2b4   : > { %3309 = vtanh.f32 %v1623_v27  ;;  %v4944_v20 = vadd.f32 %v5193_v47, %v5168_v55  ;;  %v4948_v40 = vadd.f32 %v5194_v61, %v5169_v15  ;;  %v1888_v30 = vmul.f32 0.5, %v1792_v42 }
 0x2b5   : > { %3311 = vtanh.f32 %v1622_v28  ;;  %v1624_v18 = vmul.f32 0.5, %v4934_v2  ;;  %2860 = vmatprep.subr.bf16.mxu1 %v2859_v50  ;;  %2876 = vmatprep.subr.bf16.mxu0 %v2875_v44  ;;  %v4953_v24 = vadd.f32 %v5195_v52, %v5170_v41  ;;  %v1633_v51 = vmul.f32 0.5, %v4940_v26 }
 0x2b6   : > { %v3300_v46 = vpop.eup %3299  ;;  %2862 = vmatpush1.bf16.msra.mxu1 %v2861_v35  ;;  %2878 = vmatpush1.bf16.msra.mxu0 %v2877_v16  ;;  %v1635_v9 = vmul.f32 0.5, %v4944_v20  ;;  %v1634_v8 = vmul.f32 0.5, %v4948_v40  ;;  %v4966_v45 = vadd.f32 %v5196_v57, %v5167_v54  ;;  %v1970_v49 = vmul.f32 %v1874_v43, %v4797_v5  ;;  %v5197_v16 = vld [vmem:[#allocation39_spill] sm:$0xff]  ;;  %v5199_v5 = vld [vmem:[#allocation40_spill] sm:$0xff] }
 0x2b7   : > { %v3302_v42 = vpop.eup %3301  ;;  %v1972_v33 = vmul.f32 %v1876_v37, %v4808_v22  ;;  %3313 = vtanh.f32 %v1624_v18  ;;  %v1636_v23 = vmul.f32 0.5, %v4953_v24  ;;  %v1982_v35 = vmul.f32 %v1886_v19, %v4828_v63 }
 0x2b8   : > { %v3304_v6 = vpop.eup %3303  ;;  %3315 = vtanh.f32 %v1633_v51  ;;  %v1645_v7 = vmul.f32 0.5, %v4966_v45  ;;  %v4975_v27 = vadd.f32 %v5197_v16, %v5168_v55  ;;  %v1984_v54 = vmul.f32 %v1888_v30, %v4833_v25  ;;  %v5200_v55 = vld [vmem:[#allocation41_spill] sm:$0xff] }
 0x2b9   : > { %v1801_v28 = vadd.f32 1.0, %v3300_v46  ;;  %v5198_v31 = vmov 1.0   ;;  %3317 = vtanh.f32 %v1635_v9  ;;  %v4984_v22 = vadd.f32 %v5199_v5, %v5169_v15 }
 0x2ba   : > { %2790 = vmatmul.mubr.msk.f32.vlgmr.msra.gmra.mrb[50].mxu1 %vm2035_vm1, %v5198_v31  ;;  %2791 = vmatmul.mubr.msk.f32.vlgmr.msra.gmra.mrb[58].mxu0 %vm2035_vm1, %v5198_v31  ;;  %v1803_v63 = vadd.f32 1.0, %v3302_v42  ;;  %3319 = vtanh.f32 %v1634_v8  ;;  %v1647_v43 = vmul.f32 0.5, %v4975_v27  ;;  %v4989_v37 = vadd.f32 %v5200_v55, %v5170_v41 }
 0x2bb   : > { %v5201_v25 = vmov 0.0   ;;  %v1802_v19 = vadd.f32 1.0, %v3304_v6  ;;  %3321 = vtanh.f32 %v1636_v23  ;;  %v1646_v50 = vmul.f32 0.5, %v4984_v22 }
 0x2bc   : > { %2387 = vmatprep.mubr.f32.mxu1 %v5201_v25  ;;  %2458 = vmatprep.mubr.f32.mxu0 %v5201_v25  ;;  %v2879_v15 = vpack.c.bf16 %v4890_v53, %v4883_v11  ;;  %v3306_v44 = vpop.eup %3305  ;;  %3323 = vtanh.f32 %v1645_v7  ;;  %v1648_v56 = vmul.f32 0.5, %v4989_v37  ;;  %v2895_v47 = vpack.c.bf16 %v4894_v59, %v4886_v17 }
 0x2bd   : > { %v3308_v41 = vpop.eup %3307  ;;  %v1897_v61 = vmul.f32 0.5, %v1801_v28  ;;  %3325 = vtanh.f32 %v1647_v43  ;;  %v2883_v30 = vpack.c.bf16 %v1982_v35, %v1970_v49  ;;  %v2899_v18 = vpack.c.bf16 %v1984_v54, %v1972_v33 }
 0x2be   : > { %2880 = vmatprep.subr.bf16.mxu1 %v2879_v15  ;;  %v3310_v52 = vpop.eup %3309  ;;  %v1804_v46 = vadd.f32 1.0, %v3306_v44  ;;  %v1813_v51 = vadd.f32 1.0, %v3308_v41  ;;  %3327 = vtanh.f32 %v1646_v50  ;;  %2896 = vmatprep.subr.bf16.mxu0 %v2895_v47  ;;  %v1899_v53 = vmul.f32 0.5, %v1803_v63 }
 0x2bf   : > { %2882 = vmatpush1.bf16.msra.mxu1 %v2881_v62  ;;  %v3312_v11 = vpop.eup %3311  ;;  %v1898_v9 = vmul.f32 0.5, %v1802_v19  ;;  %v1815_v8 = vadd.f32 1.0, %v3310_v52  ;;  %3329 = vtanh.f32 %v1648_v56  ;;  %2898 = vmatpush1.bf16.msra.mxu0 %v2897_v3  ;;  %v1993_v42 = vmul.f32 %v1897_v61, %v4856_v10 }
 0x2c0   : > { %2884 = vmatprep.subr.bf16.mxu1 %v2883_v30  ;;  %v1909_v17 = vmul.f32 0.5, %v1813_v51  ;;  %v1814_v59 = vadd.f32 1.0, %v3312_v11  ;;  %2900 = vmatprep.subr.bf16.mxu0 %v2899_v18  ;;  %v1900_v4 = vmul.f32 0.5, %v1804_v46  ;;  %v1995_v32 = vmul.f32 %v1899_v53, %v4860_v21 }
 0x2c1   : > { %v3314_v57 = vpop.eup %3313  ;;  %v1911_v49 = vmul.f32 0.5, %v1815_v8  ;;  %v1994_v3 = vmul.f32 %v1898_v9, %v4870_v48 }
 0x2c2   : > { %v3316_v33 = vpop.eup %3315  ;;  %v2005_v12 = vmul.f32 %v1909_v17, %v4911_v39  ;;  %v1910_v62 = vmul.f32 0.5, %v1814_v59  ;;  %v1816_v23 = vadd.f32 1.0, %v3314_v57  ;;  %v1996_v21 = vmul.f32 %v1900_v4, %v4901_v34 }
 0x2c3   : > { %2886 = vmatpush1.bf16.msra.mxu1 %v2885_v14  ;;  %v3318_v36 = vpop.eup %3317  ;;  %v2007_v6 = vmul.f32 %v1911_v49, %v4915_v0  ;;  %v1825_v35 = vadd.f32 1.0, %v3316_v33  ;;  %2902 = vmatpush1.bf16.msra.mxu0 %v2901_v60 }
 0x2c4   : > { %v3320_v10 = vpop.eup %3319  ;;  %v2889_v39 = vpack.c.bf16 %v2005_v12, %v1993_v42  ;;  %v2006_v7 = vmul.f32 %v1910_v62, %v4923_v13  ;;  %v1912_v16 = vmul.f32 0.5, %v1816_v23  ;;  %v1827_v54 = vadd.f32 1.0, %v3318_v36 }
 0x2c5   : > { %v3322_v58 = vpop.eup %3321  ;;  %v2905_v29 = vpack.c.bf16 %v2007_v6, %v1995_v32  ;;  %v1826_v14 = vadd.f32 1.0, %v3320_v10  ;;  %v1921_v43 = vmul.f32 0.5, %v1825_v35 }
 0x2c6   : > { %v3324_v28 = vpop.eup %3323  ;;  %v2008_v48 = vmul.f32 %v1912_v16, %v4934_v2  ;;  %v1828_v0 = vadd.f32 1.0, %v3322_v58  ;;  %v2887_v5 = vpack.c.bf16 %v2006_v7, %v1994_v3  ;;  %v1923_v60 = vmul.f32 0.5, %v1827_v54 }
 0x2c7   : > { %v3326_v63 = vpop.eup %3325  ;;  %v1837_v38 = vadd.f32 1.0, %v3324_v28  ;;  %v1922_v50 = vmul.f32 0.5, %v1826_v14  ;;  %v2017_v2 = vmul.f32 %v1921_v43, %v4940_v26 }
 0x2c8   : > { %v3328_v1 = vpop.eup %3327  ;;  %v1839_v55 = vadd.f32 1.0, %v3326_v63  ;;  %2888 = vmatprep.subr.bf16.mxu1 %v2887_v5  ;;  %v2903_v13 = vpack.c.bf16 %v2008_v48, %v1996_v21  ;;  %v1924_v56 = vmul.f32 0.5, %v1828_v0  ;;  %v2019_v30 = vmul.f32 %v1923_v60, %v4944_v20 }
 0x2c9   : > { %v3330_v19 = vpop.eup %3329  ;;  %v1933_v15 = vmul.f32 0.5, %v1837_v38  ;;  %v1838_v44 = vadd.f32 1.0, %v3328_v1  ;;  %2890 = vmatpush1.bf16.msra.mxu1 %v2889_v39  ;;  %v2018_v46 = vmul.f32 %v1922_v50, %v4948_v40  ;;  %v5202_v20 = vlaneseq }
 0x2ca   : > { %v1935_v47 = vmul.f32 0.5, %v1839_v55  ;;  %v1840_v34 = vadd.f32 1.0, %v3330_v19  ;;  %2904 = vmatprep.subr.bf16.mxu0 %v2903_v13  ;;  %v2020_v53 = vmul.f32 %v1924_v56, %v4953_v24  ;;  %v3455_v24 = vmov 1966171168  }
 0x2cb   : > { %v2029_v41 = vmul.f32 %v1933_v15, %v4966_v45  ;;  %v1934_v61 = vmul.f32 0.5, %v1838_v44  ;;  %2906 = vmatpush1.bf16.msra.mxu0 %v2905_v29  ;;  %vm5032_vm2 = vcmp.lt.s32.totalorder %v5202_v20, 512  ;;  %v2482_v45 = vunpack.c.l.s4 %v3455_v24 }
 0x2cc   : > { %v2031_v18 = vmul.f32 %v1935_v47, %v4975_v27  ;;  %v1936_v52 = vmul.f32 0.5, %v1840_v34  ;;  %301 = vst.msk [vmem:[#allocation2 + $0x8] sm:$0xf] %vm5032_vm2, %v5201_v25 }
 0x2cd   : > { %v2893_v51 = vpack.c.bf16 %v2029_v41, %v2017_v2  ;;  %v2030_v11 = vmul.f32 %v1934_v61, %v4984_v22  ;;  %v2483_v27 = vunpack.c.0.s8 %v2482_v45 }
 0x2ce   : > { %v2909_v9 = vpack.c.bf16 %v2031_v18, %v2019_v30  ;;  %v2032_v8 = vmul.f32 %v1936_v52, %v4989_v37  ;;  %v5205_v37 = vld [vmem:[#allocation10_spill] sm:$0xff] }
 0x2cf   : > { %v2891_v26 = vpack.c.bf16 %v2030_v11, %v2018_v46  ;;  %v2486_v59 = vsub.s32 %v2483_v27, %v5205_v37 }
 0x2d0   : > { %v2907_v17 = vpack.c.bf16 %v2032_v8, %v2020_v53 }
 0x2d1   : > { %2892 = vmatprep.subr.bf16.mxu1 %v2891_v26 }
 0x2d2   : > { %2908 = vmatprep.subr.bf16.mxu0 %v2907_v17  ;;  %2894 = vmatpush1.bf16.msra.mxu1 %v2893_v51 }
 0x2d3   : > { %2910 = vmatpush1.bf16.msra.mxu0 %v2909_v9  ;;  %v2034_v38 = vld [vmem:[#allocation2 + $0x8] sm:$0xf] }
 0x2d5   : > { %2792 = vmatmul.mubr.msk.f32.vlgmr.msra.gmra.mrb[52].mxu1 %vm2035_vm1, %v5198_v31 }
 0x2d6   : > { %2793 = vmatmul.mubr.msk.f32.vlgmr.msra.gmra.mrb[60].mxu0 %vm2035_vm1, %v5198_v31 }
 0x350   : > { %v2105_v22 = vpop.f32.mrb[48].mxu1 }
 0x351   : > { %v2176_v57 = vpop.f32.mrb[56].mxu0  ;;  %v2107_v42 = vpop.f32.mrb[49].mxu1 }
 0x352   : > { %v2477_v49 = vcombine.low %v2105_v22, %v2107_v42  ;;  %v2178_v33 = vpop.f32.mrb[57].mxu0 }
 0x353   : > { %v2478_v31 = vcombine.low %v2176_v57, %v2178_v33 }
 0x354   : > { %v2487_v4 = vrot.slane %v2477_v49, %v2486_v59 }
 0x355   : > { %v2494_v12 = vrot.slane %v2478_v31, %v2486_v59 }
 0x357   : > { %v2509_v62 = vcombine.low %v2487_v4, %v2494_v12 }
 0x359   : > { %v2517_v39 = vrot.slane %v2509_v62, %v2486_v59 }
 0x38d   : > { %v2247_v23 = vpop.f32.mrb[50].mxu1  ;;  %v2318_v36 = vpop.f32.mrb[58].mxu0 }
 0x38e   : > { %v2249_v32 = vpop.f32.mrb[51].mxu1  ;;  %v2320_v3 = vpop.f32.mrb[59].mxu0 }
 0x38f   : > { %v2479_v25 = vcombine.low %v2247_v23, %v2249_v32  ;;  %v2480_v6 = vcombine.low %v2318_v36, %v2320_v3 }
 0x391   : > { %v2501_v35 = vrot.slane %v2479_v25, %v2486_v59  ;;  %v2508_v10 = vrot.slane %v2480_v6, %v2486_v59 }
 0x393   : > { %v2510_v7 = vcombine.low %v2501_v35, %v2508_v10 }
 0x395   : > { %v2524_v16 = vrot.slane %v2510_v7, %v2486_v59 }
 0x397   : > { %v2525_v54 = vcombine.low %v2517_v39, %v2524_v16 }
 0x399   : > { %v2565_v58 = vmul.f32 0.015625, %v2525_v54 }
 0x39b   : > { %2567 = vst [vmem:[%s290_s15] sm:$0xff] %v2565_v58 }
 0x3a8   : > { %v2389_v29 = vpop.f32.mrb[52].mxu1 }
 0x3a9   : > { %v2460_v14 = vpop.f32.mrb[60].mxu0  ;;  %v2391_v28 = vpop.f32.mrb[53].mxu1 }
 0x3aa   : > { %v2526_v21 = vcombine.low %v2389_v29, %v2391_v28  ;;  %v2462_v48 = vpop.f32.mrb[61].mxu0 }
 0x3ab   : > { %v2527_v0 = vcombine.low %v2460_v14, %v2462_v48 }
 0x3ac   : > { %v2534_v5 = vrot.slane %v2526_v21, %v2486_v59 }
 0x3ad   : > { %v2541_v63 = vrot.slane %v2527_v0, %v2486_v59 }
 0x3af   : > { %v2542_v43 = vcombine.low %v2534_v5, %v2541_v63 }
 0x3b1   : > { %v2549_v1 = vrot.slane %v2542_v43, %v2486_v59 }
 0x3b3   : > { %v2553_v60 = vadd.f32 %v2549_v1, %v2034_v38 }
 0x3b5   : > { %2559 = vst.msk [vmem:[#allocation2 + $0x8] sm:$0xf] %vm5032_vm2, %v2553_v60 }
 0x3bc   : > { %v2564_v55 = vld [vmem:[#allocation2 + $0x8] sm:$0xf] }
 0x3bd   : > { %v2566_v13 = vmul.f32 0.015625, %v2564_v55 }
 0x3bf   : > { %2568 = vst.msk [vmem:[%s290_s15 + $0x8] sm:$0xf] %vm5032_vm2, %v2566_v13 }
 0x3c0 PF: > { %s17_s20 = sadd.s32 1, %s3445_s20   ;;  %s5206_s18 = smov %s3441_s19 }
 0x3c1   : > { %p14_p5 = scmp.ge.s32.totalorder %s17_s20, 4   ;;  %s5207_s19 = smov %s5209_s26 }
 0x3c3   :  { %16 = sbr.rel (!%p14_p5) target bundleno = 3 (0x3), region = 91 }
 0x3ca   :  { %2588 = vsyncpa [#allocation4], 1 }
 0x3cb   :  { %2590 = vsyncpa [#allocation4 + $0x1], 1 }
 0x3cc   :  { %2591 = vsyncpa [#allocation6], 1 }

// kernel: eye_disease_classifier_forward.3
= control target key start
LH: loop header
LB: loop body
LE: loop exit
PB: predicated region body
PF: predicated region fallthrough
CT: control target
= control target key end

     0   :  { %12 = vsyncpa [#allocation3], 0  ;;  %s6302_s0 = inlined_call_operand.vmem [shape: f32[2,1536], index: 0, kind: input, shape index: {}]   ;;  %s6303_s1 = inlined_call_operand.vmem [shape: bf16[1536,512], index: 1, kind: input, shape index: {}]   ;;  %s6304_s2 = inlined_call_operand.vmem [shape: f32[1,512], index: 2, kind: input, shape index: {}]   ;;  %s6305_s3 = inlined_call_operand.hbm [shape: bf16[512,256], index: 3, kind: input, shape index: {}]   ;;  %s6306_s4 = inlined_call_operand.vmem [shape: f32[1,256], index: 4, kind: input, shape index: {}]   ;;  %s6307_s5 = inlined_call_operand.vmem [shape: bf16[256,5], index: 5, kind: input, shape index: {}]   ;;  %s6308_s6 = inlined_call_operand.vmem [shape: f32[1,5], index: 6, kind: input, shape index: {}]   ;;  %s6309_s7 = inlined_call_operand.hbm [shape: f32[2,5], index: 7, kind: output, shape index: {}]  }
   0x1   :  { %13 = vsyncpa [#allocation4], 0  ;;  %s4902_s24 = smov [#allocation2]   ;;  %s4854_s28 = scalar_lea.hbm %s6305_s3, 8192 }
   0x2   :  { %s25_s25 = sshll.u32 %s4902_s24, 4  ;;  %p4855_p0 = scmp.ne.s32.totalorder %s6305_s3, %s4854_s28  ;;  %s26_s25 = int_to_ptr.vmem [resolvable:$true] %s25_s25 }
   0x3   :  { %p4858_p1 = scmp.lt.u32.totalorder %s4854_s28, %s6305_s3 }
   0x5   :  { %p4860_p2 = pnand %p4858_p1, %p4855_p0 }
   0x7   :  { %4863 = shalt.err (!%p4860_p2)
}
   0x8   :  { %s4864_s10 = scalar_lea.vmem %s26_s25, 8192  ;;  %p4869_p4 = scmp.lt.s32.totalorder %s26_s25, %s26_s25 }
   0x9   :  { %p4865_p3 = scmp.ne.s32.totalorder %s26_s25, %s4864_s10  ;;  %p4870_p5 = scmp.lt.s32.totalorder %s4864_s10, %s4864_s10 }
   0xb   :  { %p4871_p6 = por %p4870_p5, %p4869_p4 }
   0xd   :  { %p4872_p7 = pnand %p4871_p6, %p4865_p3 }
   0xf   :  { %4875 = shalt.err (!%p4872_p7)
}
  0x10   :  { %s4903_s11 = smov 128   ;;  %s4904_s12 = smov 8  }
  0x11   :  { %31 = dma.hbm_to_vmem [thread:$0]  %s6305_s3, 8192, %s26_s25, [#allocation3], %s4903_s11, %s4903_s11, %s4904_s12  }
  0x12   :  { %4898 = dma.done.wait [#allocation3], 8192  }
  0x13   :  { %4899 = vsyncadd [#allocation3], 4294959104  ;;  %v4163_v0 = vld [vmem:[%s6303_s1 + $0x4] ss:$16 sps:$4 sm:$0xff]   ;;  %v4167_v2 = vld [vmem:[%s6303_s1] ss:$16 sps:$4 sm:$0xff]   ;;  %v52_v38 = vlaneseq }
  0x14   :  { %v4165_v1 = vld [vmem:[%s6303_s1 + $0x204] ss:$16 sps:$4 sm:$0xff]   ;;  %2449 = vmatprep.subr.bf16.mxu1 %v4163_v0  ;;  %v4168_v3 = vld [vmem:[%s6303_s1 + $0x200] ss:$16 sps:$4 sm:$0xff]   ;;  %v4905_v36 = vmov 1983009808  }
  0x15   :  { %2490 = vmatprep.subr.bf16.mxu0 %v4165_v1  ;;  %v4169_v4 = vld [vmem:[%s6303_s1 + $0x24] ss:$16 sps:$4 sm:$0xff]   ;;  %2450 = vmatpush1.bf16.msra.mxu1 %v4167_v2  ;;  %v4173_v6 = vld [vmem:[%s6303_s1 + $0x20] ss:$16 sps:$4 sm:$0xff]   ;;  %v50_v37 = vunpack.c.l.s4 %v4905_v36  ;;  %v5076_v43 = vshrl.u32 %v52_v38, 7  ;;  %s4906_s12 = smov [#allocation5]  }
  0x16   :  { %2491 = vmatpush1.bf16.msra.mxu0 %v4168_v3  ;;  %v4171_v5 = vld [vmem:[%s6303_s1 + $0x224] ss:$16 sps:$4 sm:$0xff]   ;;  %2451 = vmatprep.subr.bf16.mxu1 %v4169_v4  ;;  %v4174_v7 = vld [vmem:[%s6303_s1 + $0x220] ss:$16 sps:$4 sm:$0xff]   ;;  %s3614_s13 = sshll.u32 %s4906_s12, 4  ;;  %vm3606_vm0 = vcmask 33792   ;;  %s3615_s13 = int_to_ptr.vmem [resolvable:$true] %s3614_s13 }
  0x17   :  { %2492 = vmatprep.subr.bf16.mxu0 %v4171_v5  ;;  %v4175_v8 = vld [vmem:[%s6303_s1 + $0x44] ss:$16 sps:$4 sm:$0xff]   ;;  %v4179_v10 = vld [vmem:[%s6303_s1 + $0x40] ss:$16 sps:$4 sm:$0xff]   ;;  %v51_v42 = vunpack.c.0.s8 %v50_v37  ;;  %v4295_v37 = vld [vmem:[%s6303_s1 + $0xac] ss:$16 sps:$4 sm:$0xff]   ;;  %p4881_p9 = scmp.lt.s32.totalorder %s3615_s13, %s3615_s13 }
  0x18   :  { %v4177_v9 = vld [vmem:[%s6303_s1 + $0x244] ss:$16 sps:$4 sm:$0xff]   ;;  %v4180_v11 = vld [vmem:[%s6303_s1 + $0x240] ss:$16 sps:$4 sm:$0xff]   ;;  %s4876_s14 = scalar_lea.vmem %s3615_s13, 32 }
  0x19   :  { %2452 = vmatpush1.bf16.msra.mxu1 %v4173_v6  ;;  %v4181_v12 = vld [vmem:[%s6303_s1 + $0x64] ss:$16 sps:$4 sm:$0xff]   ;;  %v4185_v14 = vld [vmem:[%s6303_s1 + $0x60] ss:$16 sps:$4 sm:$0xff]   ;;  %v5094_v49 = vsub.s32 %v51_v42, %v5076_v43  ;;  %v5251_v42 = vld [vmem:[%s6302_s0 + $0x8] sm:$0xff]  ;;  %p4877_p8 = scmp.ne.s32.totalorder %s3615_s13, %s4876_s14  ;;  %p4882_p10 = scmp.lt.s32.totalorder %s4876_s14, %s4876_s14 }
  0x1a   :  { %2493 = vmatpush1.bf16.msra.mxu0 %v4174_v7  ;;  %2453 = vmatprep.subr.bf16.mxu1 %v4175_v8  ;;  %v4183_v13 = vld [vmem:[%s6303_s1 + $0x264] ss:$16 sps:$4 sm:$0xff]   ;;  %v4186_v15 = vld [vmem:[%s6303_s1 + $0x260] ss:$16 sps:$4 sm:$0xff]  }
  0x1b   :  { %2494 = vmatprep.subr.bf16.mxu0 %v4177_v9  ;;  %v4187_v16 = vld [vmem:[%s6303_s1 + $0x84] ss:$16 sps:$4 sm:$0xff]   ;;  %v4191_v18 = vld [vmem:[%s6303_s1 + $0x80] ss:$16 sps:$4 sm:$0xff]   ;;  %p4883_p11 = por %p4882_p10, %p4881_p9 }
  0x1c   :  { %v4189_v17 = vld [vmem:[%s6303_s1 + $0x284] ss:$16 sps:$4 sm:$0xff]   ;;  %v4192_v19 = vld [vmem:[%s6303_s1 + $0x280] ss:$16 sps:$4 sm:$0xff]  }
  0x1d   :  { %2454 = vmatpush1.bf16.msra.mxu1 %v4179_v10  ;;  %v4193_v20 = vld [vmem:[%s6303_s1 + $0xa4] ss:$16 sps:$4 sm:$0xff]   ;;  %v4197_v22 = vld [vmem:[%s6303_s1 + $0xa0] ss:$16 sps:$4 sm:$0xff]   ;;  %p4884_p12 = pnand %p4883_p11, %p4877_p8 }
  0x1e   :  { %2495 = vmatpush1.bf16.msra.mxu0 %v4180_v11  ;;  %2455 = vmatprep.subr.bf16.mxu1 %v4181_v12  ;;  %v4195_v21 = vld [vmem:[%s6303_s1 + $0x2a4] ss:$16 sps:$4 sm:$0xff]   ;;  %v4198_v23 = vld [vmem:[%s6303_s1 + $0x2a0] ss:$16 sps:$4 sm:$0xff]  }
  0x1f   :  { %2496 = vmatprep.subr.bf16.mxu0 %v4183_v13  ;;  %v4199_v24 = vld [vmem:[%s6303_s1 + $0xc4] ss:$16 sps:$4 sm:$0xff]   ;;  %v4203_v26 = vld [vmem:[%s6303_s1 + $0xc0] ss:$16 sps:$4 sm:$0xff]  }
  0x20   :  { %v4201_v25 = vld [vmem:[%s6303_s1 + $0x2c4] ss:$16 sps:$4 sm:$0xff]   ;;  %v4204_v27 = vld [vmem:[%s6303_s1 + $0x2c0] ss:$16 sps:$4 sm:$0xff]  }
  0x21   :  { %2456 = vmatpush1.bf16.msra.mxu1 %v4185_v14  ;;  %v4205_v28 = vld [vmem:[%s6303_s1 + $0xe4] ss:$16 sps:$4 sm:$0xff]   ;;  %v4209_v30 = vld [vmem:[%s6303_s1 + $0xe0] ss:$16 sps:$4 sm:$0xff]  }
  0x22   :  { %2497 = vmatpush1.bf16.msra.mxu0 %v4186_v15  ;;  %2457 = vmatprep.subr.bf16.mxu1 %v4187_v16  ;;  %v4207_v29 = vld [vmem:[%s6303_s1 + $0x2e4] ss:$16 sps:$4 sm:$0xff]   ;;  %v4210_v31 = vld [vmem:[%s6303_s1 + $0x2e0] ss:$16 sps:$4 sm:$0xff]   ;;  %v4265_v15 = vld [vmem:[%s6303_s1 + $0xc] ss:$16 sps:$4 sm:$0xff]  }
  0x23   :  { %2498 = vmatprep.subr.bf16.mxu0 %v4189_v17  ;;  %v4211_v32 = vld [vmem:[%s6303_s1 + $0x104] ss:$16 sps:$4 sm:$0xff]   ;;  %v4215_v34 = vld [vmem:[%s6303_s1 + $0x100] ss:$16 sps:$4 sm:$0xff]  }
  0x24   :  { %v4213_v33 = vld [vmem:[%s6303_s1 + $0x304] ss:$16 sps:$4 sm:$0xff]   ;;  %v4216_v35 = vld [vmem:[%s6303_s1 + $0x300] ss:$16 sps:$4 sm:$0xff]  }
  0x25   :  { %2458 = vmatpush1.bf16.msra.mxu1 %v4191_v18  ;;  %v4217_v39 = vld [vmem:[%s6303_s1 + $0x124] ss:$16 sps:$4 sm:$0xff]   ;;  %v4221_v41 = vld [vmem:[%s6303_s1 + $0x120] ss:$16 sps:$4 sm:$0xff]  }
  0x26   :  { %2499 = vmatpush1.bf16.msra.mxu0 %v4192_v19  ;;  %2459 = vmatprep.subr.bf16.mxu1 %v4193_v20  ;;  %v4219_v40 = vld [vmem:[%s6303_s1 + $0x324] ss:$16 sps:$4 sm:$0xff]   ;;  %v4222_v44 = vld [vmem:[%s6303_s1 + $0x320] ss:$16 sps:$4 sm:$0xff]   ;;  %v4263_v19 = vld [vmem:[%s6303_s1 + $0x8] ss:$16 sps:$4 sm:$0xff]  }
  0x27   :  { %2500 = vmatprep.subr.bf16.mxu0 %v4195_v21  ;;  %v4223_v45 = vld [vmem:[%s6303_s1 + $0x144] ss:$16 sps:$4 sm:$0xff]   ;;  %v4227_v47 = vld [vmem:[%s6303_s1 + $0x140] ss:$16 sps:$4 sm:$0xff]   ;;  %v4271_v21 = vld [vmem:[%s6303_s1 + $0x2c] ss:$16 sps:$4 sm:$0xff]  }
  0x28   :  { %v4225_v46 = vld [vmem:[%s6303_s1 + $0x344] ss:$16 sps:$4 sm:$0xff]   ;;  %v4228_v48 = vld [vmem:[%s6303_s1 + $0x340] ss:$16 sps:$4 sm:$0xff]  }
  0x29   :  { %2460 = vmatpush1.bf16.msra.mxu1 %v4197_v22  ;;  %v4229_v50 = vld [vmem:[%s6303_s1 + $0x164] ss:$16 sps:$4 sm:$0xff]   ;;  %v4233_v53 = vld [vmem:[%s6303_s1 + $0x160] ss:$16 sps:$4 sm:$0xff]  }
  0x2a   :  { %2501 = vmatpush1.bf16.msra.mxu0 %v4198_v23  ;;  %2461 = vmatprep.subr.bf16.mxu1 %v4199_v24  ;;  %v4231_v51 = vld [vmem:[%s6303_s1 + $0x364] ss:$16 sps:$4 sm:$0xff]   ;;  %v4234_v56 = vld [vmem:[%s6303_s1 + $0x360] ss:$16 sps:$4 sm:$0xff]   ;;  %v4269_v23 = vld [vmem:[%s6303_s1 + $0x28] ss:$16 sps:$4 sm:$0xff]  }
  0x2b   :  { %2502 = vmatprep.subr.bf16.mxu0 %v4201_v25  ;;  %v42_v52 = vld [vmem:[%s6302_s0] sm:$0xff]  ;;  %v4277_v25 = vld [vmem:[%s6303_s1 + $0x4c] ss:$16 sps:$4 sm:$0xff]  }
  0x2c   :  { %v55_v54 = vrot.slane %v42_v52, %v5094_v49  ;;  %v48_v55 = vcombine.high %v42_v52, %v42_v52  ;;  %v4235_v57 = vld [vmem:[%s6303_s1 + $0x184] ss:$16 sps:$4 sm:$0xff]   ;;  %v4239_v61 = vld [vmem:[%s6303_s1 + $0x180] ss:$16 sps:$4 sm:$0xff]  }
  0x2d   :  { %2462 = vmatpush1.bf16.msra.mxu1 %v4203_v26  ;;  %v4237_v58 = vld [vmem:[%s6303_s1 + $0x384] ss:$16 sps:$4 sm:$0xff]   ;;  %v4240_v0 = vld [vmem:[%s6303_s1 + $0x380] ss:$16 sps:$4 sm:$0xff]  }
  0x2e   :  { %2503 = vmatpush1.bf16.msra.mxu0 %v4204_v27  ;;  %2463 = vmatprep.subr.bf16.mxu1 %v4205_v28  ;;  %v63_v59 = vcombine.high %v55_v54, %v55_v54  ;;  %v62_v60 = vrot.slane %v48_v55, %v5094_v49  ;;  %v4241_v1 = vld [vmem:[%s6303_s1 + $0x1a4] ss:$16 sps:$4 sm:$0xff]   ;;  %v4245_v4 = vld [vmem:[%s6303_s1 + $0x1a0] ss:$16 sps:$4 sm:$0xff]   ;;  %v5170_v16 = vpack.c.bf16 %v55_v54, %v55_v54  ;;  %v4275_v27 = vld [vmem:[%s6303_s1 + $0x48] ss:$16 sps:$4 sm:$0xff]  }
  0x2f   :  { %2504 = vmatprep.subr.bf16.mxu0 %v4207_v29  ;;  %v4243_v2 = vld [vmem:[%s6303_s1 + $0x3a4] ss:$16 sps:$4 sm:$0xff]   ;;  %v4246_v5 = vld [vmem:[%s6303_s1 + $0x3a0] ss:$16 sps:$4 sm:$0xff]   ;;  %v4283_v29 = vld [vmem:[%s6303_s1 + $0x6c] ss:$16 sps:$4 sm:$0xff]  }
  0x30   :  { %v112_v62 = vpack.c.bf16 %v63_v59, %v63_v59  ;;  %v64_v63 = vcombine.high %v62_v60, %v62_v60  ;;  %v4247_v6 = vld [vmem:[%s6303_s1 + $0x1c4] ss:$16 sps:$4 sm:$0xff]   ;;  %v4251_v8 = vld [vmem:[%s6303_s1 + $0x1c0] ss:$16 sps:$4 sm:$0xff]   ;;  %v5175_v18 = vpack.c.bf16 %v62_v60, %v62_v60  ;;  %v4313_v55 = vld [vmem:[%s6303_s1 + $0x10c] ss:$16 sps:$4 sm:$0xff]  }
  0x31   :  { %2464 = vmatpush1.bf16.msra.mxu1 %v4209_v30  ;;  %v4249_v7 = vld [vmem:[%s6303_s1 + $0x3c4] ss:$16 sps:$4 sm:$0xff]   ;;  %v4252_v9 = vld [vmem:[%s6303_s1 + $0x3c0] ss:$16 sps:$4 sm:$0xff]   ;;  %v4319_v59 = vld [vmem:[%s6303_s1 + $0x12c] ss:$16 sps:$4 sm:$0xff]  }
  0x32   :  { %2505 = vmatpush1.bf16.msra.mxu0 %v4210_v31  ;;  %2465 = vmatprep.subr.bf16.mxu1 %v4211_v32  ;;  %v5131_v3 = vpack.c.bf16 %v64_v63, %v64_v63  ;;  %v4253_v10 = vld [vmem:[%s6303_s1 + $0x1e4] ss:$16 sps:$4 sm:$0xff]   ;;  %v4257_v12 = vld [vmem:[%s6303_s1 + $0x1e0] ss:$16 sps:$4 sm:$0xff]   ;;  %v4281_v31 = vld [vmem:[%s6303_s1 + $0x68] ss:$16 sps:$4 sm:$0xff]  }
  0x33   :  { %2506 = vmatprep.subr.bf16.mxu0 %v4213_v33  ;;  %2481 = vmatprep.mubr.bf16.mxu1 %v112_v62  ;;  %v4255_v11 = vld [vmem:[%s6303_s1 + $0x3e4] ss:$16 sps:$4 sm:$0xff]   ;;  %v4258_v13 = vld [vmem:[%s6303_s1 + $0x3e0] ss:$16 sps:$4 sm:$0xff]   ;;  %v4289_v33 = vld [vmem:[%s6303_s1 + $0x8c] ss:$16 sps:$4 sm:$0xff]  }
  0x34   :  { %2522 = vmatprep.mubr.bf16.mxu0 %v5131_v3  ;;  %v4262_v14 = vld [vmem:[%s6303_s1 + $0x404] ss:$16 sps:$4 sm:$0xff]   ;;  %v4260_v17 = vld [vmem:[%s6303_s1 + $0x400] ss:$16 sps:$4 sm:$0xff]   ;;  %v4325_v63 = vld [vmem:[%s6303_s1 + $0x14c] ss:$16 sps:$4 sm:$0xff]  }
  0x35   :  { %2466 = vmatpush1.bf16.msra.mxu1 %v4215_v34  ;;  %v4268_v20 = vld [vmem:[%s6303_s1 + $0x424] ss:$16 sps:$4 sm:$0xff]   ;;  %v4266_v22 = vld [vmem:[%s6303_s1 + $0x420] ss:$16 sps:$4 sm:$0xff]  }
  0x36   :  { %2507 = vmatpush1.bf16.msra.mxu0 %v4216_v35  ;;  %2467 = vmatprep.subr.bf16.mxu1 %v4217_v39  ;;  %v4274_v24 = vld [vmem:[%s6303_s1 + $0x444] ss:$16 sps:$4 sm:$0xff]   ;;  %v4272_v26 = vld [vmem:[%s6303_s1 + $0x440] ss:$16 sps:$4 sm:$0xff]   ;;  %v4287_v35 = vld [vmem:[%s6303_s1 + $0x88] ss:$16 sps:$4 sm:$0xff]  }
  0x37   :  { %2508 = vmatprep.subr.bf16.mxu0 %v4219_v40  ;;  %v4280_v28 = vld [vmem:[%s6303_s1 + $0x464] ss:$16 sps:$4 sm:$0xff]   ;;  %v4278_v30 = vld [vmem:[%s6303_s1 + $0x460] ss:$16 sps:$4 sm:$0xff]   ;;  %v4293_v39 = vld [vmem:[%s6303_s1 + $0xa8] ss:$16 sps:$4 sm:$0xff]  }
  0x38   :  { %v4286_v32 = vld [vmem:[%s6303_s1 + $0x484] ss:$16 sps:$4 sm:$0xff]   ;;  %v4284_v34 = vld [vmem:[%s6303_s1 + $0x480] ss:$16 sps:$4 sm:$0xff]  }
  0x39   :  { %2468 = vmatpush1.bf16.msra.mxu1 %v4221_v41  ;;  %v4292_v36 = vld [vmem:[%s6303_s1 + $0x4a4] ss:$16 sps:$4 sm:$0xff]   ;;  %v4290_v38 = vld [vmem:[%s6303_s1 + $0x4a0] ss:$16 sps:$4 sm:$0xff]   ;;  %v4301_v41 = vld [vmem:[%s6303_s1 + $0xcc] ss:$16 sps:$4 sm:$0xff]  }
  0x3a   :  { %2509 = vmatpush1.bf16.msra.mxu0 %v4222_v44  ;;  %2469 = vmatprep.subr.bf16.mxu1 %v4223_v45  ;;  %v4298_v40 = vld [vmem:[%s6303_s1 + $0x4c4] ss:$16 sps:$4 sm:$0xff]   ;;  %v5255_v44 = vrot.slane %v5251_v42, %v5094_v49  ;;  %v4296_v45 = vld [vmem:[%s6303_s1 + $0x4c0] ss:$16 sps:$4 sm:$0xff]  }
  0x3b   :  { %2510 = vmatprep.subr.bf16.mxu0 %v4225_v46  ;;  %v4299_v46 = vld [vmem:[%s6303_s1 + $0xc8] ss:$16 sps:$4 sm:$0xff]   ;;  %v4302_v52 = vld [vmem:[%s6303_s1 + $0x4e0] ss:$16 sps:$4 sm:$0xff]   ;;  %v4310_v54 = vld [vmem:[%s6303_s1 + $0x504] ss:$16 sps:$4 sm:$0xff]  }
  0x3c   :  { %v4314_v60 = vld [vmem:[%s6303_s1 + $0x520] ss:$16 sps:$4 sm:$0xff]  }
  0x3d   :  { %2470 = vmatpush1.bf16.msra.mxu1 %v4227_v47  ;;  %v80_v47 = vcombine.high %v5255_v44, %v5255_v44 }
  0x3e   :  { %2511 = vmatpush1.bf16.msra.mxu0 %v4228_v48  ;;  %2471 = vmatprep.subr.bf16.mxu1 %v4229_v50  ;;  %v4304_v48 = vld [vmem:[%s6303_s1 + $0x4e4] ss:$16 sps:$4 sm:$0xff]   ;;  %v4307_v50 = vld [vmem:[%s6303_s1 + $0xec] ss:$16 sps:$4 sm:$0xff]  }
  0x3f   :  { %2512 = vmatprep.subr.bf16.mxu0 %v4231_v51  ;;  %v5271_v51 = vpack.c.bf16 %v80_v47, %v80_v47  ;;  %v4380_v47 = vld [vmem:[%s6303_s1 + $0x680] ss:$16 sps:$4 sm:$0xff]  }
  0x41   :  { %2472 = vmatpush1.bf16.msra.mxu1 %v4233_v53  ;;  %v4305_v53 = vld [vmem:[%s6303_s1 + $0xe8] ss:$16 sps:$4 sm:$0xff]  }
  0x42   :  { %2513 = vmatpush1.bf16.msra.mxu0 %v4234_v56  ;;  %2473 = vmatprep.subr.bf16.mxu1 %v4235_v57  ;;  %v4308_v56 = vld [vmem:[%s6303_s1 + $0x500] ss:$16 sps:$4 sm:$0xff]   ;;  %v4311_v57 = vld [vmem:[%s6303_s1 + $0x108] ss:$16 sps:$4 sm:$0xff]  }
  0x43   :  { %2514 = vmatprep.subr.bf16.mxu0 %v4237_v58  ;;  %v4316_v58 = vld [vmem:[%s6303_s1 + $0x524] ss:$16 sps:$4 sm:$0xff]  }
  0x45   :  { %2474 = vmatpush1.bf16.msra.mxu1 %v4239_v61  ;;  %v4317_v61 = vld [vmem:[%s6303_s1 + $0x128] ss:$16 sps:$4 sm:$0xff]  }
  0x46   :  { %2515 = vmatpush1.bf16.msra.mxu0 %v4240_v0  ;;  %2475 = vmatprep.subr.bf16.mxu1 %v4241_v1  ;;  %v4320_v0 = vld [vmem:[%s6303_s1 + $0x540] ss:$16 sps:$4 sm:$0xff]   ;;  %v4323_v1 = vld [vmem:[%s6303_s1 + $0x148] ss:$16 sps:$4 sm:$0xff]  }
  0x47   :  { %2516 = vmatprep.subr.bf16.mxu0 %v4243_v2  ;;  %v4328_v2 = vld [vmem:[%s6303_s1 + $0x564] ss:$16 sps:$4 sm:$0xff]  }
  0x49   :  { %2476 = vmatpush1.bf16.msra.mxu1 %v4245_v4  ;;  %v4331_v4 = vld [vmem:[%s6303_s1 + $0x16c] ss:$16 sps:$4 sm:$0xff]  }
  0x4a   :  { %2517 = vmatpush1.bf16.msra.mxu0 %v4246_v5  ;;  %2477 = vmatprep.subr.bf16.mxu1 %v4247_v6  ;;  %v4326_v5 = vld [vmem:[%s6303_s1 + $0x560] ss:$16 sps:$4 sm:$0xff]   ;;  %v4329_v6 = vld [vmem:[%s6303_s1 + $0x168] ss:$16 sps:$4 sm:$0xff]  }
  0x4b   :  { %2518 = vmatprep.subr.bf16.mxu0 %v4249_v7  ;;  %v4334_v7 = vld [vmem:[%s6303_s1 + $0x584] ss:$16 sps:$4 sm:$0xff]  }
  0x4d   :  { %2478 = vmatpush1.bf16.msra.mxu1 %v4251_v8  ;;  %v4337_v8 = vld [vmem:[%s6303_s1 + $0x18c] ss:$16 sps:$4 sm:$0xff]  }
  0x4e   :  { %2519 = vmatpush1.bf16.msra.mxu0 %v4252_v9  ;;  %2479 = vmatprep.subr.bf16.mxu1 %v4253_v10  ;;  %v4332_v9 = vld [vmem:[%s6303_s1 + $0x580] ss:$16 sps:$4 sm:$0xff]   ;;  %v4335_v10 = vld [vmem:[%s6303_s1 + $0x188] ss:$16 sps:$4 sm:$0xff]  }
  0x4f   :  { %2520 = vmatprep.subr.bf16.mxu0 %v4255_v11  ;;  %v4340_v11 = vld [vmem:[%s6303_s1 + $0x5a4] ss:$16 sps:$4 sm:$0xff]  }
  0x51   :  { %2480 = vmatpush1.bf16.msra.mxu1 %v4257_v12  ;;  %v4343_v12 = vld [vmem:[%s6303_s1 + $0x1ac] ss:$16 sps:$4 sm:$0xff]  }
  0x52   :  { %2521 = vmatpush1.bf16.msra.mxu0 %v4258_v13  ;;  %2695 = vmatprep.subr.bf16.mxu1 %v4265_v15  ;;  %v4338_v13 = vld [vmem:[%s6303_s1 + $0x5a0] ss:$16 sps:$4 sm:$0xff]   ;;  %v4346_v15 = vld [vmem:[%s6303_s1 + $0x5c4] ss:$16 sps:$4 sm:$0xff]  }
  0x53   :  { %2531 = vmatprep.subr.bf16.mxu0 %v4262_v14  ;;  %v4341_v14 = vld [vmem:[%s6303_s1 + $0x1a8] ss:$16 sps:$4 sm:$0xff]  }
  0x54   :  { %2482 = vmatmul.mubr.bf16.vlgmr.msra.gmra.mrb[0].mxu1 %v5170_v16 }
  0x55   :  { %2523 = vmatmul.mubr.bf16.vlgmr.msra.gmra.mrb[0].mxu0 %v5175_v18  ;;  %2696 = vmatpush1.bf16.msra.mxu1 %v4263_v19  ;;  %v65_v19 = vcombine.high %v5251_v42, %v5251_v42  ;;  %v4374_v42 = vld [vmem:[%s6303_s1 + $0x660] ss:$16 sps:$4 sm:$0xff]  }
  0x56   :  { %2532 = vmatpush1.bf16.msra.mxu0 %v4260_v17  ;;  %2697 = vmatprep.subr.bf16.mxu1 %v4271_v21  ;;  %v4349_v17 = vld [vmem:[%s6303_s1 + $0x1cc] ss:$16 sps:$4 sm:$0xff]   ;;  %v4347_v21 = vld [vmem:[%s6303_s1 + $0x1c8] ss:$16 sps:$4 sm:$0xff]  }
  0x57   :  { %2533 = vmatprep.subr.bf16.mxu0 %v4268_v20  ;;  %2727 = vmatprep.mubr.bf16.mxu1 %v112_v62  ;;  %v4322_v62 = vld [vmem:[%s6303_s1 + $0x544] ss:$16 sps:$4 sm:$0xff]   ;;  %v4344_v20 = vld [vmem:[%s6303_s1 + $0x5c0] ss:$16 sps:$4 sm:$0xff]  }
  0x58   :  { %2563 = vmatprep.mubr.bf16.mxu0 %v5271_v51 }
  0x59   :  { %2698 = vmatpush1.bf16.msra.mxu1 %v4269_v23  ;;  %v4355_v23 = vld [vmem:[%s6303_s1 + $0x1ec] ss:$16 sps:$4 sm:$0xff]  }
  0x5a   :  { %2534 = vmatpush1.bf16.msra.mxu0 %v4266_v22  ;;  %2699 = vmatprep.subr.bf16.mxu1 %v4277_v25  ;;  %v4352_v22 = vld [vmem:[%s6303_s1 + $0x5e4] ss:$16 sps:$4 sm:$0xff]   ;;  %v4350_v25 = vld [vmem:[%s6303_s1 + $0x5e0] ss:$16 sps:$4 sm:$0xff]  }
  0x5b   :  { %2535 = vmatprep.subr.bf16.mxu0 %v4274_v24  ;;  %v5373_v24 = vrot.slane %v65_v19, %v5094_v49  ;;  %v4433_v19 = vld [vmem:[%s6303_s1 + $0x38c] ss:$16 sps:$4 sm:$0xff]  }
  0x5d   :  { %2700 = vmatpush1.bf16.msra.mxu1 %v4275_v27  ;;  %v4358_v27 = vld [vmem:[%s6303_s1 + $0x604] ss:$16 sps:$4 sm:$0xff]  }
  0x5e   :  { %2536 = vmatpush1.bf16.msra.mxu0 %v4272_v26  ;;  %2701 = vmatprep.subr.bf16.mxu1 %v4283_v29  ;;  %v4353_v26 = vld [vmem:[%s6303_s1 + $0x1e8] ss:$16 sps:$4 sm:$0xff]   ;;  %v81_v29 = vcombine.high %v5373_v24, %v5373_v24 }
  0x5f   :  { %2537 = vmatprep.subr.bf16.mxu0 %v4280_v28  ;;  %v4361_v28 = vld [vmem:[%s6303_s1 + $0x20c] ss:$16 sps:$4 sm:$0xff]  }
  0x61   :  { %2702 = vmatpush1.bf16.msra.mxu1 %v4281_v31  ;;  %v4356_v31 = vld [vmem:[%s6303_s1 + $0x600] ss:$16 sps:$4 sm:$0xff]  }
  0x62   :  { %2538 = vmatpush1.bf16.msra.mxu0 %v4278_v30  ;;  %2703 = vmatprep.subr.bf16.mxu1 %v4289_v33  ;;  %v5391_v30 = vpack.c.bf16 %v5255_v44, %v5255_v44  ;;  %v4364_v33 = vld [vmem:[%s6303_s1 + $0x624] ss:$16 sps:$4 sm:$0xff]   ;;  %v4377_v44 = vld [vmem:[%s6303_s1 + $0x268] ss:$16 sps:$4 sm:$0xff]  }
  0x63   :  { %2539 = vmatprep.subr.bf16.mxu0 %v4286_v32  ;;  %v4359_v32 = vld [vmem:[%s6303_s1 + $0x208] ss:$16 sps:$4 sm:$0xff]  }
  0x65   :  { %2704 = vmatpush1.bf16.msra.mxu1 %v4287_v35  ;;  %v5405_v35 = vpack.c.bf16 %v81_v29, %v81_v29  ;;  %v4440_v29 = vld [vmem:[%s6303_s1 + $0x7c0] ss:$16 sps:$4 sm:$0xff]  }
  0x66   :  { %2540 = vmatpush1.bf16.msra.mxu0 %v4284_v34  ;;  %2705 = vmatprep.subr.bf16.mxu1 %v4295_v37  ;;  %v4367_v34 = vld [vmem:[%s6303_s1 + $0x22c] ss:$16 sps:$4 sm:$0xff]   ;;  %v4365_v37 = vld [vmem:[%s6303_s1 + $0x228] ss:$16 sps:$4 sm:$0xff]  }
  0x67   :  { %2541 = vmatprep.subr.bf16.mxu0 %v4292_v36  ;;  %v4362_v36 = vld [vmem:[%s6303_s1 + $0x620] ss:$16 sps:$4 sm:$0xff]  }
  0x69   :  { %2706 = vmatpush1.bf16.msra.mxu1 %v4293_v39  ;;  %v4368_v39 = vld [vmem:[%s6303_s1 + $0x640] ss:$16 sps:$4 sm:$0xff]  }
  0x6a   :  { %2542 = vmatpush1.bf16.msra.mxu0 %v4290_v38  ;;  %2707 = vmatprep.subr.bf16.mxu1 %v4301_v41  ;;  %v4370_v38 = vld [vmem:[%s6303_s1 + $0x644] ss:$16 sps:$4 sm:$0xff]  }
  0x6b   :  { %2543 = vmatprep.subr.bf16.mxu0 %v4298_v40  ;;  %v4371_v40 = vld [vmem:[%s6303_s1 + $0x248] ss:$16 sps:$4 sm:$0xff]   ;;  %v4376_v41 = vld [vmem:[%s6303_s1 + $0x664] ss:$16 sps:$4 sm:$0xff]  }
  0x6d   :  { %2708 = vmatpush1.bf16.msra.mxu1 %v4299_v46  ;;  %v4385_v46 = vld [vmem:[%s6303_s1 + $0x28c] ss:$16 sps:$4 sm:$0xff]  }
  0x6e   :  { %2544 = vmatpush1.bf16.msra.mxu0 %v4296_v45  ;;  %2709 = vmatprep.subr.bf16.mxu1 %v4307_v50  ;;  %v4382_v45 = vld [vmem:[%s6303_s1 + $0x684] ss:$16 sps:$4 sm:$0xff]  }
  0x6f   :  { %2545 = vmatprep.subr.bf16.mxu0 %v4304_v48  ;;  %v4383_v48 = vld [vmem:[%s6303_s1 + $0x288] ss:$16 sps:$4 sm:$0xff]   ;;  %v4388_v50 = vld [vmem:[%s6303_s1 + $0x6a4] ss:$16 sps:$4 sm:$0xff]  }
  0x71   :  { %2710 = vmatpush1.bf16.msra.mxu1 %v4305_v53  ;;  %v4386_v53 = vld [vmem:[%s6303_s1 + $0x6a0] ss:$16 sps:$4 sm:$0xff]  }
  0x72   :  { %2546 = vmatpush1.bf16.msra.mxu0 %v4302_v52  ;;  %2711 = vmatprep.subr.bf16.mxu1 %v4313_v55  ;;  %v4391_v52 = vld [vmem:[%s6303_s1 + $0x2ac] ss:$16 sps:$4 sm:$0xff]   ;;  %v4394_v55 = vld [vmem:[%s6303_s1 + $0x6c4] ss:$16 sps:$4 sm:$0xff]  }
  0x73   :  { %2547 = vmatprep.subr.bf16.mxu0 %v4310_v54  ;;  %v4389_v54 = vld [vmem:[%s6303_s1 + $0x2a8] ss:$16 sps:$4 sm:$0xff]  }
  0x75   :  { %2712 = vmatpush1.bf16.msra.mxu1 %v4311_v57  ;;  %v4392_v57 = vld [vmem:[%s6303_s1 + $0x6c0] ss:$16 sps:$4 sm:$0xff]  }
  0x76   :  { %2548 = vmatpush1.bf16.msra.mxu0 %v4308_v56  ;;  %2713 = vmatprep.subr.bf16.mxu1 %v4319_v59  ;;  %v4397_v56 = vld [vmem:[%s6303_s1 + $0x2cc] ss:$16 sps:$4 sm:$0xff]   ;;  %v4400_v59 = vld [vmem:[%s6303_s1 + $0x6e4] ss:$16 sps:$4 sm:$0xff]  }
  0x77   :  { %2549 = vmatprep.subr.bf16.mxu0 %v4316_v58  ;;  %v4395_v58 = vld [vmem:[%s6303_s1 + $0x2c8] ss:$16 sps:$4 sm:$0xff]  }
  0x79   :  { %2714 = vmatpush1.bf16.msra.mxu1 %v4317_v61  ;;  %v4398_v61 = vld [vmem:[%s6303_s1 + $0x6e0] ss:$16 sps:$4 sm:$0xff]  }
  0x7a   :  { %2550 = vmatpush1.bf16.msra.mxu0 %v4314_v60  ;;  %2715 = vmatprep.subr.bf16.mxu1 %v4325_v63  ;;  %v4403_v60 = vld [vmem:[%s6303_s1 + $0x2ec] ss:$16 sps:$4 sm:$0xff]   ;;  %v4406_v63 = vld [vmem:[%s6303_s1 + $0x704] ss:$16 sps:$4 sm:$0xff]  }
  0x7b   :  { %2551 = vmatprep.subr.bf16.mxu0 %v4322_v62  ;;  %v4401_v62 = vld [vmem:[%s6303_s1 + $0x2e8] ss:$16 sps:$4 sm:$0xff]  }
  0x7d   :  { %2716 = vmatpush1.bf16.msra.mxu1 %v4323_v1  ;;  %v4404_v1 = vld [vmem:[%s6303_s1 + $0x700] ss:$16 sps:$4 sm:$0xff]  }
  0x7e   :  { %2552 = vmatpush1.bf16.msra.mxu0 %v4320_v0  ;;  %2717 = vmatprep.subr.bf16.mxu1 %v4331_v4  ;;  %v4409_v0 = vld [vmem:[%s6303_s1 + $0x30c] ss:$16 sps:$4 sm:$0xff]   ;;  %v4412_v4 = vld [vmem:[%s6303_s1 + $0x724] ss:$16 sps:$4 sm:$0xff]  }
  0x7f   :  { %2553 = vmatprep.subr.bf16.mxu0 %v4328_v2  ;;  %v4407_v2 = vld [vmem:[%s6303_s1 + $0x308] ss:$16 sps:$4 sm:$0xff]  }
  0x81   :  { %2718 = vmatpush1.bf16.msra.mxu1 %v4329_v6  ;;  %v4410_v6 = vld [vmem:[%s6303_s1 + $0x720] ss:$16 sps:$4 sm:$0xff]  }
  0x82   :  { %2554 = vmatpush1.bf16.msra.mxu0 %v4326_v5  ;;  %2719 = vmatprep.subr.bf16.mxu1 %v4337_v8  ;;  %v4415_v5 = vld [vmem:[%s6303_s1 + $0x32c] ss:$16 sps:$4 sm:$0xff]   ;;  %v4418_v8 = vld [vmem:[%s6303_s1 + $0x744] ss:$16 sps:$4 sm:$0xff]  }
  0x83   :  { %2555 = vmatprep.subr.bf16.mxu0 %v4334_v7  ;;  %v4413_v7 = vld [vmem:[%s6303_s1 + $0x328] ss:$16 sps:$4 sm:$0xff]  }
  0x85   :  { %2720 = vmatpush1.bf16.msra.mxu1 %v4335_v10  ;;  %v4416_v10 = vld [vmem:[%s6303_s1 + $0x740] ss:$16 sps:$4 sm:$0xff]  }
  0x86   :  { %2556 = vmatpush1.bf16.msra.mxu0 %v4332_v9  ;;  %2721 = vmatprep.subr.bf16.mxu1 %v4343_v12  ;;  %v4421_v9 = vld [vmem:[%s6303_s1 + $0x34c] ss:$16 sps:$4 sm:$0xff]   ;;  %v4424_v12 = vld [vmem:[%s6303_s1 + $0x764] ss:$16 sps:$4 sm:$0xff]  }
  0x87   :  { %2557 = vmatprep.subr.bf16.mxu0 %v4340_v11  ;;  %v4419_v11 = vld [vmem:[%s6303_s1 + $0x348] ss:$16 sps:$4 sm:$0xff]  }
  0x89   :  { %2722 = vmatpush1.bf16.msra.mxu1 %v4341_v14  ;;  %v4422_v14 = vld [vmem:[%s6303_s1 + $0x760] ss:$16 sps:$4 sm:$0xff]  }
  0x8a   :  { %2558 = vmatpush1.bf16.msra.mxu0 %v4338_v13  ;;  %2723 = vmatprep.subr.bf16.mxu1 %v4349_v17  ;;  %v4427_v13 = vld [vmem:[%s6303_s1 + $0x36c] ss:$16 sps:$4 sm:$0xff]   ;;  %v4430_v17 = vld [vmem:[%s6303_s1 + $0x784] ss:$16 sps:$4 sm:$0xff]  }
  0x8b   :  { %2559 = vmatprep.subr.bf16.mxu0 %v4346_v15  ;;  %v4425_v15 = vld [vmem:[%s6303_s1 + $0x368] ss:$16 sps:$4 sm:$0xff]  }
  0x8d   :  { %2724 = vmatpush1.bf16.msra.mxu1 %v4347_v21  ;;  %v4431_v21 = vld [vmem:[%s6303_s1 + $0x388] ss:$16 sps:$4 sm:$0xff]  }
  0x8e   :  { %2560 = vmatpush1.bf16.msra.mxu0 %v4344_v20  ;;  %2725 = vmatprep.subr.bf16.mxu1 %v4355_v23  ;;  %v4428_v20 = vld [vmem:[%s6303_s1 + $0x780] ss:$16 sps:$4 sm:$0xff]   ;;  %v4439_v23 = vld [vmem:[%s6303_s1 + $0x3ac] ss:$16 sps:$4 sm:$0xff]  }
  0x8f   :  { %2561 = vmatprep.subr.bf16.mxu0 %v4352_v22  ;;  %v4436_v22 = vld [vmem:[%s6303_s1 + $0x7a4] ss:$16 sps:$4 sm:$0xff]  }
  0x91   :  { %2726 = vmatpush1.bf16.msra.mxu1 %v4353_v26  ;;  %v4437_v26 = vld [vmem:[%s6303_s1 + $0x3a8] ss:$16 sps:$4 sm:$0xff]  }
  0x92   :  { %2562 = vmatpush1.bf16.msra.mxu0 %v4350_v25  ;;  %2736 = vmatprep.subr.bf16.mxu1 %v4361_v28  ;;  %v4434_v25 = vld [vmem:[%s6303_s1 + $0x7a0] ss:$16 sps:$4 sm:$0xff]   ;;  %v4445_v28 = vld [vmem:[%s6303_s1 + $0x3cc] ss:$16 sps:$4 sm:$0xff]  }
  0x93   :  { %2572 = vmatprep.subr.bf16.mxu0 %v4358_v27  ;;  %v4442_v27 = vld [vmem:[%s6303_s1 + $0x7c4] ss:$16 sps:$4 sm:$0xff]  }
  0x94   :  { %2728 = vmatmul.mubr.bf16.vlgmr.msra.gmra.mrb[4].mxu1 %v5170_v16  ;;  %v4373_v16 = vld [vmem:[%s6303_s1 + $0x24c] ss:$16 sps:$4 sm:$0xff]  }
  0x95   :  { %2564 = vmatmul.mubr.bf16.vlgmr.msra.gmra.mrb[0].mxu0 %v5391_v30  ;;  %2737 = vmatpush1.bf16.msra.mxu1 %v4359_v32  ;;  %v4443_v32 = vld [vmem:[%s6303_s1 + $0x3c8] ss:$16 sps:$4 sm:$0xff]  }
  0x96   :  { %2573 = vmatpush1.bf16.msra.mxu0 %v4356_v31  ;;  %2738 = vmatprep.subr.bf16.mxu1 %v4367_v34  ;;  %v5573_v31 = vld [vmem:[%s6302_s0 + $0x10] sm:$0xff]  ;;  %v4451_v34 = vld [vmem:[%s6303_s1 + $0x3ec] ss:$16 sps:$4 sm:$0xff]  }
  0x97   :  { %2574 = vmatprep.subr.bf16.mxu0 %v4364_v33  ;;  %2604 = vmatprep.mubr.bf16.mxu0 %v5405_v35  ;;  %v4448_v33 = vld [vmem:[%s6303_s1 + $0x7e4] ss:$16 sps:$4 sm:$0xff]  }
  0x98   :  { %2768 = vmatprep.mubr.bf16.mxu1 %v5131_v3  ;;  %v4379_v3 = vld [vmem:[%s6303_s1 + $0x26c] ss:$16 sps:$4 sm:$0xff]  }
  0x99   :  { %2739 = vmatpush1.bf16.msra.mxu1 %v4365_v37  ;;  %v4446_v37 = vld [vmem:[%s6303_s1 + $0x7e0] ss:$16 sps:$4 sm:$0xff]  }
  0x9a   :  { %2575 = vmatpush1.bf16.msra.mxu0 %v4362_v36  ;;  %2740 = vmatprep.subr.bf16.mxu1 %v4373_v16  ;;  %v5586_v36 = vrot.slane %v5573_v31, %v5094_v49  ;;  %v4455_v16 = vld [vmem:[%s6303_s1 + $0x804] ss:$16 sps:$4 sm:$0xff]  }
  0x9b   :  { %2576 = vmatprep.subr.bf16.mxu0 %v4370_v38  ;;  %v4449_v38 = vld [vmem:[%s6303_s1 + $0x3e8] ss:$16 sps:$4 sm:$0xff]  }
  0x9d   :  { %2741 = vmatpush1.bf16.msra.mxu1 %v4371_v40  ;;  %v97_v40 = vcombine.high %v5586_v36, %v5586_v36 }
  0x9e   :  { %2577 = vmatpush1.bf16.msra.mxu0 %v4368_v39  ;;  %2742 = vmatprep.subr.bf16.mxu1 %v4379_v3  ;;  %v4458_v39 = vld [vmem:[%s6303_s1 + $0x40c] ss:$16 sps:$4 sm:$0xff]   ;;  %v4456_v3 = vld [vmem:[%s6303_s1 + $0x408] ss:$16 sps:$4 sm:$0xff]  }
  0x9f   :  { %2578 = vmatprep.subr.bf16.mxu0 %v4376_v41  ;;  %v4453_v41 = vld [vmem:[%s6303_s1 + $0x800] ss:$16 sps:$4 sm:$0xff]  }
  0xa1   :  { %2743 = vmatpush1.bf16.msra.mxu1 %v4377_v44  ;;  %v4461_v44 = vld [vmem:[%s6303_s1 + $0x824] ss:$16 sps:$4 sm:$0xff]  }
  0xa2   :  { %2579 = vmatpush1.bf16.msra.mxu0 %v4374_v42  ;;  %2744 = vmatprep.subr.bf16.mxu1 %v4385_v46  ;;  %v5610_v42 = vpack.c.bf16 %v5373_v24, %v5373_v24  ;;  %v5618_v46 = vpack.c.bf16 %v97_v40, %v97_v40  ;;  %v4459_v24 = vld [vmem:[%s6303_s1 + $0x820] ss:$16 sps:$4 sm:$0xff]   ;;  %v4542_v40 = vld [vmem:[%s6303_s1 + $0x5cc] ss:$16 sps:$4 sm:$0xff]  }
  0xa3   :  { %2580 = vmatprep.subr.bf16.mxu0 %v4382_v45  ;;  %v4464_v45 = vld [vmem:[%s6303_s1 + $0x42c] ss:$16 sps:$4 sm:$0xff]  }
  0xa5   :  { %2745 = vmatpush1.bf16.msra.mxu1 %v4383_v48  ;;  %v4467_v48 = vld [vmem:[%s6303_s1 + $0x844] ss:$16 sps:$4 sm:$0xff]  }
  0xa6   :  { %2581 = vmatpush1.bf16.msra.mxu0 %v4380_v47  ;;  %2746 = vmatprep.subr.bf16.mxu1 %v4391_v52  ;;  %v4462_v47 = vld [vmem:[%s6303_s1 + $0x428] ss:$16 sps:$4 sm:$0xff]  }
  0xa7   :  { %2582 = vmatprep.subr.bf16.mxu0 %v4388_v50  ;;  %v4465_v50 = vld [vmem:[%s6303_s1 + $0x840] ss:$16 sps:$4 sm:$0xff]   ;;  %v4468_v52 = vld [vmem:[%s6303_s1 + $0x448] ss:$16 sps:$4 sm:$0xff]  }
  0xa9   :  { %2747 = vmatpush1.bf16.msra.mxu1 %v4389_v54  ;;  %v4471_v54 = vld [vmem:[%s6303_s1 + $0x860] ss:$16 sps:$4 sm:$0xff]  }
  0xaa   :  { %2583 = vmatpush1.bf16.msra.mxu0 %v4386_v53  ;;  %2748 = vmatprep.subr.bf16.mxu1 %v4397_v56  ;;  %v4473_v53 = vld [vmem:[%s6303_s1 + $0x864] ss:$16 sps:$4 sm:$0xff]  }
  0xab   :  { %2584 = vmatprep.subr.bf16.mxu0 %v4394_v55  ;;  %v4474_v55 = vld [vmem:[%s6303_s1 + $0x468] ss:$16 sps:$4 sm:$0xff]   ;;  %v4479_v56 = vld [vmem:[%s6303_s1 + $0x884] ss:$16 sps:$4 sm:$0xff]  }
  0xad   :  { %2749 = vmatpush1.bf16.msra.mxu1 %v4395_v58  ;;  %v4477_v58 = vld [vmem:[%s6303_s1 + $0x880] ss:$16 sps:$4 sm:$0xff]  }
  0xae   :  { %2585 = vmatpush1.bf16.msra.mxu0 %v4392_v57  ;;  %2750 = vmatprep.subr.bf16.mxu1 %v4403_v60  ;;  %v4482_v57 = vld [vmem:[%s6303_s1 + $0x48c] ss:$16 sps:$4 sm:$0xff]   ;;  %v4485_v60 = vld [vmem:[%s6303_s1 + $0x8a4] ss:$16 sps:$4 sm:$0xff]  }
  0xaf   :  { %2586 = vmatprep.subr.bf16.mxu0 %v4400_v59  ;;  %v4480_v59 = vld [vmem:[%s6303_s1 + $0x488] ss:$16 sps:$4 sm:$0xff]  }
  0xb1   :  { %2751 = vmatpush1.bf16.msra.mxu1 %v4401_v62  ;;  %v4483_v62 = vld [vmem:[%s6303_s1 + $0x8a0] ss:$16 sps:$4 sm:$0xff]  }
  0xb2   :  { %2587 = vmatpush1.bf16.msra.mxu0 %v4398_v61  ;;  %2752 = vmatprep.subr.bf16.mxu1 %v4409_v0  ;;  %v4488_v61 = vld [vmem:[%s6303_s1 + $0x4ac] ss:$16 sps:$4 sm:$0xff]   ;;  %v4491_v0 = vld [vmem:[%s6303_s1 + $0x8c4] ss:$16 sps:$4 sm:$0xff]  }
  0xb3   :  { %2588 = vmatprep.subr.bf16.mxu0 %v4406_v63  ;;  %v4486_v63 = vld [vmem:[%s6303_s1 + $0x4a8] ss:$16 sps:$4 sm:$0xff]  }
  0xb5   :  { %2753 = vmatpush1.bf16.msra.mxu1 %v4407_v2  ;;  %v4489_v2 = vld [vmem:[%s6303_s1 + $0x8c0] ss:$16 sps:$4 sm:$0xff]  }
  0xb6   :  { %2589 = vmatpush1.bf16.msra.mxu0 %v4404_v1  ;;  %2754 = vmatprep.subr.bf16.mxu1 %v4415_v5  ;;  %v4494_v1 = vld [vmem:[%s6303_s1 + $0x4cc] ss:$16 sps:$4 sm:$0xff]   ;;  %v4497_v5 = vld [vmem:[%s6303_s1 + $0x8e4] ss:$16 sps:$4 sm:$0xff]  }
  0xb7   :  { %2590 = vmatprep.subr.bf16.mxu0 %v4412_v4  ;;  %v4492_v4 = vld [vmem:[%s6303_s1 + $0x4c8] ss:$16 sps:$4 sm:$0xff]  }
  0xb9   :  { %2755 = vmatpush1.bf16.msra.mxu1 %v4413_v7  ;;  %v4495_v7 = vld [vmem:[%s6303_s1 + $0x8e0] ss:$16 sps:$4 sm:$0xff]  }
  0xba   :  { %2591 = vmatpush1.bf16.msra.mxu0 %v4410_v6  ;;  %2756 = vmatprep.subr.bf16.mxu1 %v4421_v9  ;;  %v4500_v6 = vld [vmem:[%s6303_s1 + $0x4ec] ss:$16 sps:$4 sm:$0xff]   ;;  %v4503_v9 = vld [vmem:[%s6303_s1 + $0x904] ss:$16 sps:$4 sm:$0xff]  }
  0xbb   :  { %2592 = vmatprep.subr.bf16.mxu0 %v4418_v8  ;;  %v4498_v8 = vld [vmem:[%s6303_s1 + $0x4e8] ss:$16 sps:$4 sm:$0xff]  }
  0xbd   :  { %2757 = vmatpush1.bf16.msra.mxu1 %v4419_v11  ;;  %v4501_v11 = vld [vmem:[%s6303_s1 + $0x900] ss:$16 sps:$4 sm:$0xff]  }
  0xbe   :  { %2593 = vmatpush1.bf16.msra.mxu0 %v4416_v10  ;;  %2758 = vmatprep.subr.bf16.mxu1 %v4427_v13  ;;  %v4506_v10 = vld [vmem:[%s6303_s1 + $0x50c] ss:$16 sps:$4 sm:$0xff]   ;;  %v4509_v13 = vld [vmem:[%s6303_s1 + $0x924] ss:$16 sps:$4 sm:$0xff]  }
  0xbf   :  { %2594 = vmatprep.subr.bf16.mxu0 %v4424_v12  ;;  %v4504_v12 = vld [vmem:[%s6303_s1 + $0x508] ss:$16 sps:$4 sm:$0xff]  }
  0xc1   :  { %2759 = vmatpush1.bf16.msra.mxu1 %v4425_v15  ;;  %v4507_v15 = vld [vmem:[%s6303_s1 + $0x920] ss:$16 sps:$4 sm:$0xff]  }
  0xc2   :  { %2595 = vmatpush1.bf16.msra.mxu0 %v4422_v14  ;;  %2760 = vmatprep.subr.bf16.mxu1 %v4433_v19  ;;  %v4512_v14 = vld [vmem:[%s6303_s1 + $0x52c] ss:$16 sps:$4 sm:$0xff]   ;;  %v4515_v19 = vld [vmem:[%s6303_s1 + $0x944] ss:$16 sps:$4 sm:$0xff]  }
  0xc3   :  { %2596 = vmatprep.subr.bf16.mxu0 %v4430_v17  ;;  %v4510_v17 = vld [vmem:[%s6303_s1 + $0x528] ss:$16 sps:$4 sm:$0xff]  }
  0xc5   :  { %2761 = vmatpush1.bf16.msra.mxu1 %v4431_v21  ;;  %v4513_v21 = vld [vmem:[%s6303_s1 + $0x940] ss:$16 sps:$4 sm:$0xff]  }
  0xc6   :  { %2597 = vmatpush1.bf16.msra.mxu0 %v4428_v20  ;;  %2762 = vmatprep.subr.bf16.mxu1 %v4439_v23  ;;  %v4518_v20 = vld [vmem:[%s6303_s1 + $0x54c] ss:$16 sps:$4 sm:$0xff]   ;;  %v4521_v23 = vld [vmem:[%s6303_s1 + $0x964] ss:$16 sps:$4 sm:$0xff]  }
  0xc7   :  { %2598 = vmatprep.subr.bf16.mxu0 %v4436_v22  ;;  %v4516_v22 = vld [vmem:[%s6303_s1 + $0x548] ss:$16 sps:$4 sm:$0xff]  }
  0xc9   :  { %2763 = vmatpush1.bf16.msra.mxu1 %v4437_v26  ;;  %v4519_v26 = vld [vmem:[%s6303_s1 + $0x960] ss:$16 sps:$4 sm:$0xff]  }
  0xca   :  { %2599 = vmatpush1.bf16.msra.mxu0 %v4434_v25  ;;  %2764 = vmatprep.subr.bf16.mxu1 %v4445_v28  ;;  %v4524_v25 = vld [vmem:[%s6303_s1 + $0x56c] ss:$16 sps:$4 sm:$0xff]   ;;  %v4527_v28 = vld [vmem:[%s6303_s1 + $0x984] ss:$16 sps:$4 sm:$0xff]  }
  0xcb   :  { %2600 = vmatprep.subr.bf16.mxu0 %v4442_v27  ;;  %v4522_v27 = vld [vmem:[%s6303_s1 + $0x568] ss:$16 sps:$4 sm:$0xff]  }
  0xcd   :  { %2765 = vmatpush1.bf16.msra.mxu1 %v4443_v32  ;;  %v4525_v32 = vld [vmem:[%s6303_s1 + $0x980] ss:$16 sps:$4 sm:$0xff]  }
  0xce   :  { %2601 = vmatpush1.bf16.msra.mxu0 %v4440_v29  ;;  %2766 = vmatprep.subr.bf16.mxu1 %v4451_v34  ;;  %v4530_v29 = vld [vmem:[%s6303_s1 + $0x58c] ss:$16 sps:$4 sm:$0xff]   ;;  %v4533_v34 = vld [vmem:[%s6303_s1 + $0x9a4] ss:$16 sps:$4 sm:$0xff]  }
  0xcf   :  { %2602 = vmatprep.subr.bf16.mxu0 %v4448_v33  ;;  %v4528_v33 = vld [vmem:[%s6303_s1 + $0x588] ss:$16 sps:$4 sm:$0xff]  }
  0xd1   :  { %2767 = vmatpush1.bf16.msra.mxu1 %v4449_v38  ;;  %v4531_v38 = vld [vmem:[%s6303_s1 + $0x9a0] ss:$16 sps:$4 sm:$0xff]  }
  0xd2   :  { %2603 = vmatpush1.bf16.msra.mxu0 %v4446_v37  ;;  %2777 = vmatprep.subr.bf16.mxu1 %v4458_v39  ;;  %v4536_v37 = vld [vmem:[%s6303_s1 + $0x5ac] ss:$16 sps:$4 sm:$0xff]   ;;  %v4539_v39 = vld [vmem:[%s6303_s1 + $0x9c4] ss:$16 sps:$4 sm:$0xff]  }
  0xd3   :  { %2613 = vmatprep.subr.bf16.mxu0 %v4455_v16  ;;  %v4534_v16 = vld [vmem:[%s6303_s1 + $0x5a8] ss:$16 sps:$4 sm:$0xff]  }
  0xd4   :  { %2769 = vmatmul.mubr.bf16.vlgmr.msra.gmra.mrb[4].mxu1 %v5175_v18  ;;  %v4470_v18 = vld [vmem:[%s6303_s1 + $0x44c] ss:$16 sps:$4 sm:$0xff]  }
  0xd5   :  { %2605 = vmatmul.mubr.bf16.vlgmr.msra.gmra.mrb[0].mxu0 %v5610_v42  ;;  %2778 = vmatpush1.bf16.msra.mxu1 %v4456_v3  ;;  %v4540_v3 = vld [vmem:[%s6303_s1 + $0x5c8] ss:$16 sps:$4 sm:$0xff]  }
  0xd6   :  { %2614 = vmatpush1.bf16.msra.mxu0 %v4453_v41  ;;  %2779 = vmatprep.subr.bf16.mxu1 %v4464_v45  ;;  %v4537_v41 = vld [vmem:[%s6303_s1 + $0x9c0] ss:$16 sps:$4 sm:$0xff]   ;;  %v4545_v45 = vld [vmem:[%s6303_s1 + $0x9e4] ss:$16 sps:$4 sm:$0xff]  }
  0xd7   :  { %2615 = vmatprep.subr.bf16.mxu0 %v4461_v44  ;;  %2645 = vmatprep.mubr.bf16.mxu0 %v5618_v46  ;;  %v82_v44 = vcombine.high %v5573_v31, %v5573_v31  ;;  %v4546_v31 = vld [vmem:[%s6303_s1 + $0x5e8] ss:$16 sps:$4 sm:$0xff]  }
  0xd8   :  { %2809 = vmatprep.mubr.bf16.mxu1 %v5271_v51  ;;  %v4476_v51 = vld [vmem:[%s6303_s1 + $0x46c] ss:$16 sps:$4 sm:$0xff]  }
  0xd9   :  { %2780 = vmatpush1.bf16.msra.mxu1 %v4462_v47  ;;  %v4543_v47 = vld [vmem:[%s6303_s1 + $0x9e0] ss:$16 sps:$4 sm:$0xff]  }
  0xda   :  { %2616 = vmatpush1.bf16.msra.mxu0 %v4459_v24  ;;  %2781 = vmatprep.subr.bf16.mxu1 %v4470_v18  ;;  %v4548_v24 = vld [vmem:[%s6303_s1 + $0x5ec] ss:$16 sps:$4 sm:$0xff]   ;;  %v4551_v18 = vld [vmem:[%s6303_s1 + $0xa04] ss:$16 sps:$4 sm:$0xff]  }
  0xdb   :  { %2617 = vmatprep.subr.bf16.mxu0 %v4467_v48  ;;  %v5801_v48 = vrot.slane %v82_v44, %v5094_v49  ;;  %v4552_v49 = vld [vmem:[%s6303_s1 + $0x608] ss:$16 sps:$4 sm:$0xff]   ;;  %v4623_v44 = vld [vmem:[%s6303_s1 + $0xb84] ss:$16 sps:$4 sm:$0xff]  }
  0xdd   :  { %2782 = vmatpush1.bf16.msra.mxu1 %v4468_v52  ;;  %v4549_v52 = vld [vmem:[%s6303_s1 + $0xa00] ss:$16 sps:$4 sm:$0xff]  }
  0xde   :  { %2618 = vmatpush1.bf16.msra.mxu0 %v4465_v50  ;;  %2783 = vmatprep.subr.bf16.mxu1 %v4476_v51  ;;  %v4554_v50 = vld [vmem:[%s6303_s1 + $0x60c] ss:$16 sps:$4 sm:$0xff]   ;;  %v5819_v51 = vpack.c.bf16 %v5586_v36, %v5586_v36  ;;  %v4558_v36 = vld [vmem:[%s6303_s1 + $0x628] ss:$16 sps:$4 sm:$0xff]  }
  0xdf   :  { %2619 = vmatprep.subr.bf16.mxu0 %v4473_v53  ;;  %v98_v53 = vcombine.high %v5801_v48, %v5801_v48 }
  0xe1   :  { %2784 = vmatpush1.bf16.msra.mxu1 %v4474_v55  ;;  %v4560_v55 = vld [vmem:[%s6303_s1 + $0x62c] ss:$16 sps:$4 sm:$0xff]  }
  0xe2   :  { %2620 = vmatpush1.bf16.msra.mxu0 %v4471_v54  ;;  %2785 = vmatprep.subr.bf16.mxu1 %v4482_v57  ;;  %v4557_v54 = vld [vmem:[%s6303_s1 + $0xa24] ss:$16 sps:$4 sm:$0xff]   ;;  %v5833_v57 = vpack.c.bf16 %v98_v53, %v98_v53  ;;  %v4638_v53 = vld [vmem:[%s6303_s1 + $0x7cc] ss:$16 sps:$4 sm:$0xff]  }
  0xe3   :  { %2621 = vmatprep.subr.bf16.mxu0 %v4479_v56  ;;  %v4555_v56 = vld [vmem:[%s6303_s1 + $0xa20] ss:$16 sps:$4 sm:$0xff]  }
  0xe5   :  { %2786 = vmatpush1.bf16.msra.mxu1 %v4480_v59  ;;  %v4566_v59 = vld [vmem:[%s6303_s1 + $0x64c] ss:$16 sps:$4 sm:$0xff]  }
  0xe6   :  { %2622 = vmatpush1.bf16.msra.mxu0 %v4477_v58  ;;  %2787 = vmatprep.subr.bf16.mxu1 %v4488_v61  ;;  %v4563_v58 = vld [vmem:[%s6303_s1 + $0xa44] ss:$16 sps:$4 sm:$0xff]  }
  0xe7   :  { %2623 = vmatprep.subr.bf16.mxu0 %v4485_v60  ;;  %v4561_v60 = vld [vmem:[%s6303_s1 + $0xa40] ss:$16 sps:$4 sm:$0xff]   ;;  %v4569_v61 = vld [vmem:[%s6303_s1 + $0xa64] ss:$16 sps:$4 sm:$0xff]  }
  0xe9   :  { %2788 = vmatpush1.bf16.msra.mxu1 %v4486_v63  ;;  %v4567_v63 = vld [vmem:[%s6303_s1 + $0xa60] ss:$16 sps:$4 sm:$0xff]  }
  0xea   :  { %2624 = vmatpush1.bf16.msra.mxu0 %v4483_v62  ;;  %2789 = vmatprep.subr.bf16.mxu1 %v4494_v1  ;;  %v4572_v62 = vld [vmem:[%s6303_s1 + $0x66c] ss:$16 sps:$4 sm:$0xff]  }
  0xeb   :  { %2625 = vmatprep.subr.bf16.mxu0 %v4491_v0  ;;  %v4575_v0 = vld [vmem:[%s6303_s1 + $0xa84] ss:$16 sps:$4 sm:$0xff]   ;;  %v4578_v1 = vld [vmem:[%s6303_s1 + $0x68c] ss:$16 sps:$4 sm:$0xff]  }
  0xed   :  { %2790 = vmatpush1.bf16.msra.mxu1 %v4492_v4  ;;  %v4576_v4 = vld [vmem:[%s6303_s1 + $0x688] ss:$16 sps:$4 sm:$0xff]  }
  0xee   :  { %2626 = vmatpush1.bf16.msra.mxu0 %v4489_v2  ;;  %2791 = vmatprep.subr.bf16.mxu1 %v4500_v6  ;;  %v4573_v2 = vld [vmem:[%s6303_s1 + $0xa80] ss:$16 sps:$4 sm:$0xff]   ;;  %v4584_v6 = vld [vmem:[%s6303_s1 + $0x6ac] ss:$16 sps:$4 sm:$0xff]  }
  0xef   :  { %2627 = vmatprep.subr.bf16.mxu0 %v4497_v5  ;;  %v4581_v5 = vld [vmem:[%s6303_s1 + $0xaa4] ss:$16 sps:$4 sm:$0xff]  }
  0xf1   :  { %2792 = vmatpush1.bf16.msra.mxu1 %v4498_v8  ;;  %v4582_v8 = vld [vmem:[%s6303_s1 + $0x6a8] ss:$16 sps:$4 sm:$0xff]  }
  0xf2   :  { %2628 = vmatpush1.bf16.msra.mxu0 %v4495_v7  ;;  %2793 = vmatprep.subr.bf16.mxu1 %v4506_v10  ;;  %v4579_v7 = vld [vmem:[%s6303_s1 + $0xaa0] ss:$16 sps:$4 sm:$0xff]   ;;  %v4590_v10 = vld [vmem:[%s6303_s1 + $0x6cc] ss:$16 sps:$4 sm:$0xff]  }
  0xf3   :  { %2629 = vmatprep.subr.bf16.mxu0 %v4503_v9  ;;  %v4587_v9 = vld [vmem:[%s6303_s1 + $0xac4] ss:$16 sps:$4 sm:$0xff]  }
  0xf5   :  { %2794 = vmatpush1.bf16.msra.mxu1 %v4504_v12  ;;  %v4585_v12 = vld [vmem:[%s6303_s1 + $0xac0] ss:$16 sps:$4 sm:$0xff]  }
  0xf6   :  { %2630 = vmatpush1.bf16.msra.mxu0 %v4501_v11  ;;  %2795 = vmatprep.subr.bf16.mxu1 %v4512_v14 }
  0xf7   :  { %2631 = vmatprep.subr.bf16.mxu0 %v4509_v13  ;;  %v4588_v13 = vld [vmem:[%s6303_s1 + $0x6c8] ss:$16 sps:$4 sm:$0xff]  }
  0xf9   :  { %2796 = vmatpush1.bf16.msra.mxu1 %v4510_v17  ;;  %v4593_v17 = vld [vmem:[%s6303_s1 + $0xae4] ss:$16 sps:$4 sm:$0xff]  }
  0xfa   :  { %2632 = vmatpush1.bf16.msra.mxu0 %v4507_v15  ;;  %2797 = vmatprep.subr.bf16.mxu1 %v4518_v20 }
  0xfb   :  { %2633 = vmatprep.subr.bf16.mxu0 %v4515_v19  ;;  %v4596_v19 = vld [vmem:[%s6303_s1 + $0x6ec] ss:$16 sps:$4 sm:$0xff]  }
  0xfd   :  { %2798 = vmatpush1.bf16.msra.mxu1 %v4516_v22  ;;  %v4594_v22 = vld [vmem:[%s6303_s1 + $0x6e8] ss:$16 sps:$4 sm:$0xff]  }
  0xfe   :  { %2634 = vmatpush1.bf16.msra.mxu0 %v4513_v21  ;;  %2799 = vmatprep.subr.bf16.mxu1 %v4524_v25  ;;  %v4591_v21 = vld [vmem:[%s6303_s1 + $0xae0] ss:$16 sps:$4 sm:$0xff]   ;;  %v4602_v25 = vld [vmem:[%s6303_s1 + $0x70c] ss:$16 sps:$4 sm:$0xff]  }
  0xff   :  { %2635 = vmatprep.subr.bf16.mxu0 %v4521_v23  ;;  %v4599_v23 = vld [vmem:[%s6303_s1 + $0xb04] ss:$16 sps:$4 sm:$0xff]  }
 0x101   :  { %2800 = vmatpush1.bf16.msra.mxu1 %v4522_v27  ;;  %v4600_v27 = vld [vmem:[%s6303_s1 + $0x708] ss:$16 sps:$4 sm:$0xff]  }
 0x102   :  { %2636 = vmatpush1.bf16.msra.mxu0 %v4519_v26  ;;  %2801 = vmatprep.subr.bf16.mxu1 %v4530_v29  ;;  %v4597_v26 = vld [vmem:[%s6303_s1 + $0xb00] ss:$16 sps:$4 sm:$0xff]   ;;  %v4608_v29 = vld [vmem:[%s6303_s1 + $0x72c] ss:$16 sps:$4 sm:$0xff]  }
 0x103   :  { %2637 = vmatprep.subr.bf16.mxu0 %v4527_v28  ;;  %v4605_v28 = vld [vmem:[%s6303_s1 + $0xb24] ss:$16 sps:$4 sm:$0xff]  }
 0x105   :  { %2802 = vmatpush1.bf16.msra.mxu1 %v4528_v33  ;;  %v4606_v33 = vld [vmem:[%s6303_s1 + $0x728] ss:$16 sps:$4 sm:$0xff]  }
 0x106   :  { %2638 = vmatpush1.bf16.msra.mxu0 %v4525_v32  ;;  %2803 = vmatprep.subr.bf16.mxu1 %v4536_v37  ;;  %v4603_v32 = vld [vmem:[%s6303_s1 + $0xb20] ss:$16 sps:$4 sm:$0xff]   ;;  %v4614_v37 = vld [vmem:[%s6303_s1 + $0x74c] ss:$16 sps:$4 sm:$0xff]  }
 0x107   :  { %2639 = vmatprep.subr.bf16.mxu0 %v4533_v34  ;;  %v4611_v34 = vld [vmem:[%s6303_s1 + $0xb44] ss:$16 sps:$4 sm:$0xff]  }
 0x109   :  { %2804 = vmatpush1.bf16.msra.mxu1 %v4534_v16  ;;  %v4612_v16 = vld [vmem:[%s6303_s1 + $0x748] ss:$16 sps:$4 sm:$0xff]  }
 0x10a   :  { %2640 = vmatpush1.bf16.msra.mxu0 %v4531_v38  ;;  %2805 = vmatprep.subr.bf16.mxu1 %v4542_v40  ;;  %v4609_v38 = vld [vmem:[%s6303_s1 + $0xb40] ss:$16 sps:$4 sm:$0xff]   ;;  %v4620_v40 = vld [vmem:[%s6303_s1 + $0x76c] ss:$16 sps:$4 sm:$0xff]  }
 0x10b   :  { %2641 = vmatprep.subr.bf16.mxu0 %v4539_v39  ;;  %v4617_v39 = vld [vmem:[%s6303_s1 + $0xb64] ss:$16 sps:$4 sm:$0xff]  }
 0x10d   :  { %2806 = vmatpush1.bf16.msra.mxu1 %v4540_v3  ;;  %v4618_v3 = vld [vmem:[%s6303_s1 + $0x768] ss:$16 sps:$4 sm:$0xff]  }
 0x10e   :  { %2642 = vmatpush1.bf16.msra.mxu0 %v4537_v41  ;;  %2807 = vmatprep.subr.bf16.mxu1 %v4548_v24  ;;  %v4615_v41 = vld [vmem:[%s6303_s1 + $0xb60] ss:$16 sps:$4 sm:$0xff]  }
 0x10f   :  { %2643 = vmatprep.subr.bf16.mxu0 %v4545_v45  ;;  %v4626_v45 = vld [vmem:[%s6303_s1 + $0x78c] ss:$16 sps:$4 sm:$0xff]   ;;  %v4621_v24 = vld [vmem:[%s6303_s1 + $0xb80] ss:$16 sps:$4 sm:$0xff]  }
 0x111   :  { %2808 = vmatpush1.bf16.msra.mxu1 %v4546_v31  ;;  %v4629_v31 = vld [vmem:[%s6303_s1 + $0xba4] ss:$16 sps:$4 sm:$0xff]  }
 0x112   :  { %2644 = vmatpush1.bf16.msra.mxu0 %v4543_v47  ;;  %2818 = vmatprep.subr.bf16.mxu1 %v4554_v50  ;;  %v4624_v47 = vld [vmem:[%s6303_s1 + $0x788] ss:$16 sps:$4 sm:$0xff]   ;;  %v4627_v50 = vld [vmem:[%s6303_s1 + $0xba0] ss:$16 sps:$4 sm:$0xff]  }
 0x113   :  { %2654 = vmatprep.subr.bf16.mxu0 %v4551_v18  ;;  %v4632_v18 = vld [vmem:[%s6303_s1 + $0x7ac] ss:$16 sps:$4 sm:$0xff]  }
 0x114   :  { %2810 = vmatmul.mubr.bf16.vlgmr.msra.gmra.mrb[4].mxu1 %v5391_v30  ;;  %v4564_v30 = vld [vmem:[%s6303_s1 + $0x648] ss:$16 sps:$4 sm:$0xff]  }
 0x115   :  { %2646 = vmatmul.mubr.bf16.vlgmr.msra.gmra.mrb[0].mxu0 %v5819_v51  ;;  %2819 = vmatpush1.bf16.msra.mxu1 %v4552_v49  ;;  %v4635_v49 = vld [vmem:[%s6303_s1 + $0xbc4] ss:$16 sps:$4 sm:$0xff]  }
 0x116   :  { %2655 = vmatpush1.bf16.msra.mxu0 %v4549_v52  ;;  %2820 = vmatprep.subr.bf16.mxu1 %v4560_v55  ;;  %v4630_v52 = vld [vmem:[%s6303_s1 + $0x7a8] ss:$16 sps:$4 sm:$0xff]  }
 0x117   :  { %2656 = vmatprep.subr.bf16.mxu0 %v4557_v54  ;;  %2686 = vmatprep.mubr.bf16.mxu0 %v5833_v57  ;;  %v4633_v54 = vld [vmem:[%s6303_s1 + $0xbc0] ss:$16 sps:$4 sm:$0xff]   ;;  %v4636_v55 = vld [vmem:[%s6303_s1 + $0x7c8] ss:$16 sps:$4 sm:$0xff]  }
 0x118   :  { %2850 = vmatprep.mubr.bf16.mxu1 %v5405_v35  ;;  %v4570_v35 = vld [vmem:[%s6303_s1 + $0x668] ss:$16 sps:$4 sm:$0xff]  }
 0x119   :  { %2821 = vmatpush1.bf16.msra.mxu1 %v4558_v36  ;;  %v4644_v36 = vld [vmem:[%s6303_s1 + $0x7ec] ss:$16 sps:$4 sm:$0xff]  }
 0x11a   :  { %2657 = vmatpush1.bf16.msra.mxu0 %v4555_v56  ;;  %2822 = vmatprep.subr.bf16.mxu1 %v4566_v59  ;;  %v4641_v56 = vld [vmem:[%s6303_s1 + $0xbe4] ss:$16 sps:$4 sm:$0xff]   ;;  %v4642_v59 = vld [vmem:[%s6303_s1 + $0x7e8] ss:$16 sps:$4 sm:$0xff]  }
 0x11b   :  { %2658 = vmatprep.subr.bf16.mxu0 %v4563_v58  ;;  %v4639_v58 = vld [vmem:[%s6303_s1 + $0xbe0] ss:$16 sps:$4 sm:$0xff]  }
 0x11d   :  { %2823 = vmatpush1.bf16.msra.mxu1 %v4564_v30  ;;  %v6016_v30 = vpack.c.bf16 %v5801_v48, %v5801_v48  ;;  %v4649_v48 = vld [vmem:[%s6303_s1 + $0x828] ss:$16 sps:$4 sm:$0xff]  }
 0x11e   :  { %2659 = vmatpush1.bf16.msra.mxu0 %v4561_v60  ;;  %2824 = vmatprep.subr.bf16.mxu1 %v4572_v62  ;;  %v4648_v60 = vld [vmem:[%s6303_s1 + $0x80c] ss:$16 sps:$4 sm:$0xff]  }
 0x11f   :  { %2660 = vmatprep.subr.bf16.mxu0 %v4569_v61  ;;  %v4646_v61 = vld [vmem:[%s6303_s1 + $0x808] ss:$16 sps:$4 sm:$0xff]   ;;  %v4651_v62 = vld [vmem:[%s6303_s1 + $0x82c] ss:$16 sps:$4 sm:$0xff]  }
 0x121   :  { %2825 = vmatpush1.bf16.msra.mxu1 %v4570_v35  ;;  %v4744_v35 = vld [vmem:[#allocation2 + $0x4] ss:$8 sps:$4 sm:$0xff]  }
 0x122   :  { %2661 = vmatpush1.bf16.msra.mxu0 %v4567_v63  ;;  %2826 = vmatprep.subr.bf16.mxu1 %v4578_v1  ;;  %v4742_v63 = vld [vmem:[#allocation2] ss:$8 sps:$4 sm:$0xff]   ;;  %v4654_v1 = vld [vmem:[%s6303_s1 + $0x84c] ss:$16 sps:$4 sm:$0xff]  }
 0x123   :  { %2662 = vmatprep.subr.bf16.mxu0 %v4575_v0  ;;  %v4747_v0 = vld [vmem:[#allocation2 + $0x14] ss:$8 sps:$4 sm:$0xff]  }
 0x125   :  { %2827 = vmatpush1.bf16.msra.mxu1 %v4576_v4  ;;  %v4652_v4 = vld [vmem:[%s6303_s1 + $0x848] ss:$16 sps:$4 sm:$0xff]  }
 0x126   :  { %2663 = vmatpush1.bf16.msra.mxu0 %v4573_v2  ;;  %2828 = vmatprep.subr.bf16.mxu1 %v4584_v6  ;;  %v4745_v2 = vld [vmem:[#allocation2 + $0x10] ss:$8 sps:$4 sm:$0xff]   ;;  %v4753_v6 = vld [vmem:[#allocation2 + $0x34] ss:$8 sps:$4 sm:$0xff]  }
 0x127   :  { %2664 = vmatprep.subr.bf16.mxu0 %v4581_v5  ;;  %v5893_v11 = vpop.f32.mrb[0].mxu1  ;;  %v4748_v5 = vld [vmem:[#allocation2 + $0x20] ss:$8 sps:$4 sm:$0xff]  }
 0x128   :  { %v5901_v14 = vpop.f32.mrb[1].mxu1 }
 0x129   :  { %v2487_v15 = vpop.f32.mrb[2].mxu1  ;;  %2829 = vmatpush1.bf16.msra.mxu1 %v4582_v8  ;;  %v4660_v8 = vld [vmem:[%s6303_s1 + $0x88c] ss:$16 sps:$4 sm:$0xff]  }
 0x12a   :  { %2665 = vmatpush1.bf16.msra.mxu0 %v4579_v7  ;;  %v2488_v20 = vpop.f32.mrb[3].mxu1  ;;  %2830 = vmatprep.subr.bf16.mxu1 %v4590_v10  ;;  %v4655_v7 = vld [vmem:[%s6303_s1 + $0x868] ss:$16 sps:$4 sm:$0xff]   ;;  %v4756_v10 = vld [vmem:[#allocation2 + $0x44] ss:$8 sps:$4 sm:$0xff]  }
 0x12b   :  { %2666 = vmatprep.subr.bf16.mxu0 %v4587_v9  ;;  %v4751_v9 = vld [vmem:[#allocation2 + $0x30] ss:$8 sps:$4 sm:$0xff]   ;;  %v4754_v15 = vld [vmem:[#allocation2 + $0x40] ss:$8 sps:$4 sm:$0xff]   ;;  %v4666_v20 = vld [vmem:[%s6303_s1 + $0x8cc] ss:$16 sps:$4 sm:$0xff]  }
 0x12d   :  { %2831 = vmatpush1.bf16.msra.mxu1 %v4588_v13  ;;  %v4663_v13 = vld [vmem:[%s6303_s1 + $0x8ac] ss:$16 sps:$4 sm:$0xff]  }
 0x12e   :  { %2667 = vmatpush1.bf16.msra.mxu0 %v4585_v12  ;;  %2832 = vmatprep.subr.bf16.mxu1 %v4596_v19  ;;  %v4658_v12 = vld [vmem:[%s6303_s1 + $0x888] ss:$16 sps:$4 sm:$0xff]  }
 0x12f   :  { %2668 = vmatprep.subr.bf16.mxu0 %v4593_v17  ;;  %v4759_v17 = vld [vmem:[#allocation2 + $0x54] ss:$8 sps:$4 sm:$0xff]   ;;  %v4661_v19 = vld [vmem:[%s6303_s1 + $0x8a8] ss:$16 sps:$4 sm:$0xff]  }
 0x131   :  { %2833 = vmatpush1.bf16.msra.mxu1 %v4594_v22  ;;  %v4762_v22 = vld [vmem:[#allocation2 + $0x64] ss:$8 sps:$4 sm:$0xff]  }
 0x132   :  { %2669 = vmatpush1.bf16.msra.mxu0 %v4591_v21  ;;  %2834 = vmatprep.subr.bf16.mxu1 %v4602_v25  ;;  %v4757_v21 = vld [vmem:[#allocation2 + $0x50] ss:$8 sps:$4 sm:$0xff]   ;;  %v4669_v25 = vld [vmem:[%s6303_s1 + $0x8ec] ss:$16 sps:$4 sm:$0xff]  }
 0x133   :  { %2670 = vmatprep.subr.bf16.mxu0 %v4599_v23  ;;  %v4664_v23 = vld [vmem:[%s6303_s1 + $0x8c8] ss:$16 sps:$4 sm:$0xff]  }
 0x135   :  { %2835 = vmatpush1.bf16.msra.mxu1 %v4600_v27  ;;  %v4765_v27 = vld [vmem:[#allocation2 + $0x74] ss:$8 sps:$4 sm:$0xff]  }
 0x136   :  { %2671 = vmatpush1.bf16.msra.mxu0 %v4597_v26  ;;  %2836 = vmatprep.subr.bf16.mxu1 %v4608_v29  ;;  %v4760_v26 = vld [vmem:[#allocation2 + $0x60] ss:$8 sps:$4 sm:$0xff]   ;;  %v4672_v29 = vld [vmem:[%s6303_s1 + $0x90c] ss:$16 sps:$4 sm:$0xff]  }
 0x137   :  { %2672 = vmatprep.subr.bf16.mxu0 %v4605_v28  ;;  %v4667_v28 = vld [vmem:[%s6303_s1 + $0x8e8] ss:$16 sps:$4 sm:$0xff]  }
 0x139   :  { %2837 = vmatpush1.bf16.msra.mxu1 %v4606_v33  ;;  %v4768_v33 = vld [vmem:[#allocation2 + $0x84] ss:$8 sps:$4 sm:$0xff]  }
 0x13a   :  { %2673 = vmatpush1.bf16.msra.mxu0 %v4603_v32  ;;  %2838 = vmatprep.subr.bf16.mxu1 %v4614_v37  ;;  %v4763_v32 = vld [vmem:[#allocation2 + $0x70] ss:$8 sps:$4 sm:$0xff]   ;;  %v4675_v37 = vld [vmem:[%s6303_s1 + $0x92c] ss:$16 sps:$4 sm:$0xff]  }
 0x13b   :  { %2674 = vmatprep.subr.bf16.mxu0 %v4611_v34  ;;  %v4670_v34 = vld [vmem:[%s6303_s1 + $0x908] ss:$16 sps:$4 sm:$0xff]  }
 0x13d   :  { %2839 = vmatpush1.bf16.msra.mxu1 %v4612_v16  ;;  %v4771_v16 = vld [vmem:[#allocation2 + $0x94] ss:$8 sps:$4 sm:$0xff]  }
 0x13e   :  { %2675 = vmatpush1.bf16.msra.mxu0 %v4609_v38  ;;  %2840 = vmatprep.subr.bf16.mxu1 %v4620_v40  ;;  %v4766_v38 = vld [vmem:[#allocation2 + $0x80] ss:$8 sps:$4 sm:$0xff]   ;;  %v4678_v40 = vld [vmem:[%s6303_s1 + $0x94c] ss:$16 sps:$4 sm:$0xff]  }
 0x13f   :  { %2676 = vmatprep.subr.bf16.mxu0 %v4617_v39  ;;  %v4673_v39 = vld [vmem:[%s6303_s1 + $0x928] ss:$16 sps:$4 sm:$0xff]  }
 0x141   :  { %2841 = vmatpush1.bf16.msra.mxu1 %v4618_v3  ;;  %v4774_v3 = vld [vmem:[#allocation2 + $0xa4] ss:$8 sps:$4 sm:$0xff]  }
 0x142   :  { %2677 = vmatpush1.bf16.msra.mxu0 %v4615_v41  ;;  %2842 = vmatprep.subr.bf16.mxu1 %v4626_v45  ;;  %v4769_v41 = vld [vmem:[#allocation2 + $0x90] ss:$8 sps:$4 sm:$0xff]   ;;  %v4681_v45 = vld [vmem:[%s6303_s1 + $0x96c] ss:$16 sps:$4 sm:$0xff]  }
 0x143   :  { %2678 = vmatprep.subr.bf16.mxu0 %v4623_v44  ;;  %v4676_v44 = vld [vmem:[%s6303_s1 + $0x948] ss:$16 sps:$4 sm:$0xff]  }
 0x145   :  { %2843 = vmatpush1.bf16.msra.mxu1 %v4624_v47  ;;  %v4777_v47 = vld [vmem:[#allocation2 + $0xb4] ss:$8 sps:$4 sm:$0xff]  }
 0x146   :  { %2679 = vmatpush1.bf16.msra.mxu0 %v4621_v24  ;;  %2844 = vmatprep.subr.bf16.mxu1 %v4632_v18  ;;  %v4772_v24 = vld [vmem:[#allocation2 + $0xa0] ss:$8 sps:$4 sm:$0xff]   ;;  %v4684_v18 = vld [vmem:[%s6303_s1 + $0x98c] ss:$16 sps:$4 sm:$0xff]  }
 0x147   :  { %2680 = vmatprep.subr.bf16.mxu0 %v4629_v31  ;;  %v4679_v31 = vld [vmem:[%s6303_s1 + $0x968] ss:$16 sps:$4 sm:$0xff]  }
 0x149   :  { %2845 = vmatpush1.bf16.msra.mxu1 %v4630_v52  ;;  %v4780_v52 = vld [vmem:[#allocation2 + $0xc4] ss:$8 sps:$4 sm:$0xff]  }
 0x14a   :  { %2681 = vmatpush1.bf16.msra.mxu0 %v4627_v50  ;;  %2846 = vmatprep.subr.bf16.mxu1 %v4638_v53  ;;  %v4775_v50 = vld [vmem:[#allocation2 + $0xb0] ss:$8 sps:$4 sm:$0xff]   ;;  %v4687_v53 = vld [vmem:[%s6303_s1 + $0x9ac] ss:$16 sps:$4 sm:$0xff]  }
 0x14b   :  { %2682 = vmatprep.subr.bf16.mxu0 %v4635_v49  ;;  %v4682_v49 = vld [vmem:[%s6303_s1 + $0x988] ss:$16 sps:$4 sm:$0xff]  }
 0x14d   :  { %2847 = vmatpush1.bf16.msra.mxu1 %v4636_v55  ;;  %v4783_v55 = vld [vmem:[#allocation2 + $0xd4] ss:$8 sps:$4 sm:$0xff]  }
 0x14e   :  { %2683 = vmatpush1.bf16.msra.mxu0 %v4633_v54  ;;  %2848 = vmatprep.subr.bf16.mxu1 %v4644_v36  ;;  %v4778_v54 = vld [vmem:[#allocation2 + $0xc0] ss:$8 sps:$4 sm:$0xff]   ;;  %v4690_v36 = vld [vmem:[%s6303_s1 + $0x9cc] ss:$16 sps:$4 sm:$0xff]  }
 0x14f   :  { %2684 = vmatprep.subr.bf16.mxu0 %v4641_v56  ;;  %v4685_v56 = vld [vmem:[%s6303_s1 + $0x9a8] ss:$16 sps:$4 sm:$0xff]  }
 0x151   :  { %2849 = vmatpush1.bf16.msra.mxu1 %v4642_v59  ;;  %v4688_v59 = vld [vmem:[%s6303_s1 + $0x9c8] ss:$16 sps:$4 sm:$0xff]  }
 0x152   :  { %2685 = vmatpush1.bf16.msra.mxu0 %v4639_v58  ;;  %2859 = vmatprep.subr.bf16.mxu1 %v4648_v60  ;;  %v4781_v58 = vld [vmem:[#allocation2 + $0xd0] ss:$8 sps:$4 sm:$0xff]   ;;  %v4693_v60 = vld [vmem:[%s6303_s1 + $0x9ec] ss:$16 sps:$4 sm:$0xff]  }
 0x153   :  { %3345 = vmatprep.subr.bf16.mxu0 %v4744_v35  ;;  %v4699_v35 = vld [vmem:[%s6303_s1 + $0xa2c] ss:$16 sps:$4 sm:$0xff]  }
 0x154   :  { %2851 = vmatmul.mubr.bf16.vlgmr.msra.gmra.mrb[4].mxu1 %v5610_v42  ;;  %v4750_v42 = vld [vmem:[#allocation2 + $0x24] ss:$8 sps:$4 sm:$0xff]  }
 0x155   :  { %2687 = vmatmul.mubr.bf16.vlgmr.msra.gmra.mrb[0].mxu0 %v6016_v30  ;;  %2860 = vmatpush1.bf16.msra.mxu1 %v4646_v61  ;;  %v4691_v61 = vld [vmem:[%s6303_s1 + $0x9e8] ss:$16 sps:$4 sm:$0xff]  }
 0x156   :  { %2891 = vmatprep.mubr.bf16.mxu1 %v5618_v46  ;;  %2861 = vmatprep.subr.bf16.mxu1 %v4651_v62  ;;  %v4657_v46 = vld [vmem:[%s6303_s1 + $0x86c] ss:$16 sps:$4 sm:$0xff]  }
 0x157   :  { %3346 = vmatpush1.bf16.msra.mxu0 %v4742_v63  ;;  %v4696_v62 = vld [vmem:[%s6303_s1 + $0xa0c] ss:$16 sps:$4 sm:$0xff]   ;;  %v4694_v63 = vld [vmem:[%s6303_s1 + $0xa08] ss:$16 sps:$4 sm:$0xff]  }
 0x158   :  { %3347 = vmatprep.subr.bf16.mxu0 %v4747_v0  ;;  %v4702_v0 = vld [vmem:[%s6303_s1 + $0xa4c] ss:$16 sps:$4 sm:$0xff]  }
 0x159   :  { %2862 = vmatpush1.bf16.msra.mxu1 %v4649_v48  ;;  %v4697_v48 = vld [vmem:[%s6303_s1 + $0xa28] ss:$16 sps:$4 sm:$0xff]  }
 0x15a   :  { %2863 = vmatprep.subr.bf16.mxu1 %v4654_v1  ;;  %v4700_v1 = vld [vmem:[%s6303_s1 + $0xa48] ss:$16 sps:$4 sm:$0xff]  }
 0x15b   :  { %3348 = vmatpush1.bf16.msra.mxu0 %v4745_v2  ;;  %v4708_v2 = vld [vmem:[%s6303_s1 + $0xa8c] ss:$16 sps:$4 sm:$0xff]  }
 0x15c   :  { %3349 = vmatprep.subr.bf16.mxu0 %v4750_v42  ;;  %v4706_v42 = vld [vmem:[%s6303_s1 + $0xa88] ss:$16 sps:$4 sm:$0xff]  }
 0x15d   :  { %2864 = vmatpush1.bf16.msra.mxu1 %v4652_v4  ;;  %v4711_v4 = vld [vmem:[%s6303_s1 + $0xaac] ss:$16 sps:$4 sm:$0xff]  }
 0x15e   :  { %2865 = vmatprep.subr.bf16.mxu1 %v4657_v46  ;;  %v4709_v46 = vld [vmem:[%s6303_s1 + $0xaa8] ss:$16 sps:$4 sm:$0xff]  }
 0x15f   :  { %3350 = vmatpush1.bf16.msra.mxu0 %v4748_v5  ;;  %v4714_v5 = vld [vmem:[%s6303_s1 + $0xacc] ss:$16 sps:$4 sm:$0xff]  }
 0x160   :  { %3351 = vmatprep.subr.bf16.mxu0 %v4753_v6  ;;  %v4786_v6 = vld [vmem:[#allocation2 + $0xe4] ss:$8 sps:$4 sm:$0xff]  }
 0x161   :  { %2866 = vmatpush1.bf16.msra.mxu1 %v4655_v7  ;;  %v4784_v7 = vld [vmem:[#allocation2 + $0xe0] ss:$8 sps:$4 sm:$0xff]  }
 0x162   :  { %2867 = vmatprep.subr.bf16.mxu1 %v4660_v8  ;;  %v4712_v8 = vld [vmem:[%s6303_s1 + $0xac8] ss:$16 sps:$4 sm:$0xff]  }
 0x163   :  { %3352 = vmatpush1.bf16.msra.mxu0 %v4751_v9  ;;  %v4717_v9 = vld [vmem:[%s6303_s1 + $0xaec] ss:$16 sps:$4 sm:$0xff]  }
 0x164   :  { %3353 = vmatprep.subr.bf16.mxu0 %v4756_v10  ;;  %v4789_v10 = vld [vmem:[#allocation2 + $0xf4] ss:$8 sps:$4 sm:$0xff]  }
 0x165   :  { %2868 = vmatpush1.bf16.msra.mxu1 %v4658_v12  ;;  %v4787_v12 = vld [vmem:[#allocation2 + $0xf0] ss:$8 sps:$4 sm:$0xff]  }
 0x166   :  { %2869 = vmatprep.subr.bf16.mxu1 %v4663_v13  ;;  %v4715_v13 = vld [vmem:[%s6303_s1 + $0xae8] ss:$16 sps:$4 sm:$0xff]  }
 0x167   :  { %3354 = vmatpush1.bf16.msra.mxu0 %v4754_v15  ;;  %v4720_v15 = vld [vmem:[%s6303_s1 + $0xb0c] ss:$16 sps:$4 sm:$0xff]  }
 0x168   :  { %3355 = vmatprep.subr.bf16.mxu0 %v4759_v17  ;;  %v4792_v17 = vld [vmem:[#allocation2 + $0x104] ss:$8 sps:$4 sm:$0xff]  }
 0x169   :  { %2870 = vmatpush1.bf16.msra.mxu1 %v4661_v19  ;;  %v4718_v19 = vld [vmem:[%s6303_s1 + $0xb08] ss:$16 sps:$4 sm:$0xff]  }
 0x16a   :  { %2871 = vmatprep.subr.bf16.mxu1 %v4666_v20  ;;  %v4723_v20 = vld [vmem:[%s6303_s1 + $0xb2c] ss:$16 sps:$4 sm:$0xff]  }
 0x16b   :  { %3356 = vmatpush1.bf16.msra.mxu0 %v4757_v21  ;;  %v4721_v21 = vld [vmem:[%s6303_s1 + $0xb28] ss:$16 sps:$4 sm:$0xff]  }
 0x16c   :  { %3357 = vmatprep.subr.bf16.mxu0 %v4762_v22  ;;  %v4726_v22 = vld [vmem:[%s6303_s1 + $0xb4c] ss:$16 sps:$4 sm:$0xff]  }
 0x16d   :  { %2872 = vmatpush1.bf16.msra.mxu1 %v4664_v23  ;;  %v4724_v23 = vld [vmem:[%s6303_s1 + $0xb48] ss:$16 sps:$4 sm:$0xff]  }
 0x16e   :  { %2873 = vmatprep.subr.bf16.mxu1 %v4669_v25  ;;  %v4729_v25 = vld [vmem:[%s6303_s1 + $0xb6c] ss:$16 sps:$4 sm:$0xff]  }
 0x16f   :  { %3358 = vmatpush1.bf16.msra.mxu0 %v4760_v26  ;;  %v4727_v26 = vld [vmem:[%s6303_s1 + $0xb68] ss:$16 sps:$4 sm:$0xff]  }
 0x170   :  { %3359 = vmatprep.subr.bf16.mxu0 %v4765_v27  ;;  %v4732_v27 = vld [vmem:[%s6303_s1 + $0xb8c] ss:$16 sps:$4 sm:$0xff]  }
 0x171   :  { %2874 = vmatpush1.bf16.msra.mxu1 %v4667_v28  ;;  %v4730_v28 = vld [vmem:[%s6303_s1 + $0xb88] ss:$16 sps:$4 sm:$0xff]  }
 0x172   :  { %2875 = vmatprep.subr.bf16.mxu1 %v4672_v29  ;;  %v4735_v29 = vld [vmem:[%s6303_s1 + $0xbac] ss:$16 sps:$4 sm:$0xff]  }
 0x173   :  { %3360 = vmatpush1.bf16.msra.mxu0 %v4763_v32  ;;  %v4733_v32 = vld [vmem:[%s6303_s1 + $0xba8] ss:$16 sps:$4 sm:$0xff]  }
 0x174   :  { %3361 = vmatprep.subr.bf16.mxu0 %v4768_v33  ;;  %v4738_v33 = vld [vmem:[%s6303_s1 + $0xbcc] ss:$16 sps:$4 sm:$0xff]  }
 0x175   :  { %2876 = vmatpush1.bf16.msra.mxu1 %v4670_v34  ;;  %v4736_v34 = vld [vmem:[%s6303_s1 + $0xbc8] ss:$16 sps:$4 sm:$0xff]  }
 0x176   :  { %2877 = vmatprep.subr.bf16.mxu1 %v4675_v37  ;;  %v4741_v37 = vld [vmem:[%s6303_s1 + $0xbec] ss:$16 sps:$4 sm:$0xff]  }
 0x177   :  { %3362 = vmatpush1.bf16.msra.mxu0 %v4766_v38  ;;  %v4739_v38 = vld [vmem:[%s6303_s1 + $0xbe8] ss:$16 sps:$4 sm:$0xff]  }
 0x178   :  { %3363 = vmatprep.subr.bf16.mxu0 %v4771_v16  ;;  %v511_v16 = vsub.s32 0, %v5076_v43 }
 0x179   :  { %2878 = vmatpush1.bf16.msra.mxu1 %v4673_v39  ;;  %v6217_v39 = vld [vmem:[%s6304_s2] sm:$0xf] }
 0x17a   :  { %2879 = vmatprep.subr.bf16.mxu1 %v4678_v40  ;;  %v515_v40 = vsub.s32 1, %v5076_v43 }
 0x17b   :  { %3364 = vmatpush1.bf16.msra.mxu0 %v4769_v41  ;;  %v512_v41 = vrot.slane %v6217_v39, %v511_v16 }
 0x17c   :  { %3365 = vmatprep.subr.bf16.mxu0 %v4774_v3  ;;  %v516_v3 = vrot.slane %v6217_v39, %v515_v40 }
 0x17d   :  { %2880 = vmatpush1.bf16.msra.mxu1 %v4676_v44  ;;  %v2484_v44 = vadd.f32 %v5893_v11, %v512_v41  ;;  %v4838_v11 = vld [vmem:[%s6307_s5 + $0x40] sm:$0xff]  }
 0x17e   :  { %2881 = vmatprep.subr.bf16.mxu1 %v4681_v45 }
 0x17f   :  { %3366 = vmatpush1.bf16.msra.mxu0 %v4772_v24 }
 0x180   :  { %3367 = vmatprep.subr.bf16.mxu0 %v4777_v47 }
 0x181   :  { %2882 = vmatpush1.bf16.msra.mxu1 %v4679_v31 }
 0x182   :  { %2883 = vmatprep.subr.bf16.mxu1 %v4684_v18 }
 0x183   :  { %3368 = vmatpush1.bf16.msra.mxu0 %v4775_v50 }
 0x184   :  { %3369 = vmatprep.subr.bf16.mxu0 %v4780_v52 }
 0x185   :  { %2884 = vmatpush1.bf16.msra.mxu1 %v4682_v49 }
 0x186   :  { %2885 = vmatprep.subr.bf16.mxu1 %v4687_v53 }
 0x187   :  { %3370 = vmatpush1.bf16.msra.mxu0 %v4778_v54  ;;  %v4790_v54 = vld [vmem:[#allocation2 + $0x100] ss:$8 sps:$4 sm:$0xff]  }
 0x188   :  { %3371 = vmatprep.subr.bf16.mxu0 %v4783_v55 }
 0x189   :  { %2886 = vmatpush1.bf16.msra.mxu1 %v4685_v56  ;;  %v4795_v56 = vld [vmem:[#allocation2 + $0x114] ss:$8 sps:$4 sm:$0xff]  }
 0x18a   :  { %2887 = vmatprep.subr.bf16.mxu1 %v4690_v36  ;;  %v4840_v36 = vld [vmem:[%s6307_s5 + $0x48] sm:$0xff]  }
 0x18b   :  { %3372 = vmatpush1.bf16.msra.mxu0 %v4781_v58  ;;  %v4793_v58 = vld [vmem:[#allocation2 + $0x110] ss:$8 sps:$4 sm:$0xff]  }
 0x18c   :  { %3373 = vmatprep.subr.bf16.mxu0 %v4786_v6  ;;  %v4810_v6 = vld [vmem:[#allocation2 + $0x164] ss:$8 sps:$4 sm:$0xff]  }
 0x18d   :  { %2888 = vmatpush1.bf16.msra.mxu1 %v4688_v59  ;;  %v4798_v59 = vld [vmem:[#allocation2 + $0x124] ss:$8 sps:$4 sm:$0xff]  }
 0x18e   :  { %2889 = vmatprep.subr.bf16.mxu1 %v4693_v60  ;;  %v4841_v60 = vld [vmem:[%s6307_s5 + $0x8] sm:$0xff]  }
 0x18f   :  { %3374 = vmatpush1.bf16.msra.mxu0 %v4784_v7  ;;  %v4849_v7 = vld [vmem:[%s6307_s5 + $0x28] sm:$0xff]  }
 0x190   :  { %3375 = vmatprep.subr.bf16.mxu0 %v4789_v10  ;;  %v4811_v10 = vld [vmem:[#allocation2 + $0x170] ss:$8 sps:$4 sm:$0xff]  }
 0x191   :  { %2890 = vmatpush1.bf16.msra.mxu1 %v4691_v61  ;;  %v4842_v61 = vld [vmem:[%s6307_s5 + $0x50] sm:$0xff]  }
 0x192   :  { %2900 = vmatprep.subr.bf16.mxu1 %v4696_v62  ;;  %v4796_v62 = vld [vmem:[#allocation2 + $0x120] ss:$8 sps:$4 sm:$0xff]  }
 0x193   :  { %3376 = vmatpush1.bf16.msra.mxu0 %v4787_v12  ;;  %v4816_v12 = vld [vmem:[#allocation2 + $0x184] ss:$8 sps:$4 sm:$0xff]  }
 0x194   :  { %2892 = vmatmul.mubr.bf16.vlgmr.msra.gmra.mrb[4].mxu1 %v5819_v51  ;;  %v4705_v51 = vld [vmem:[%s6303_s1 + $0xa6c] ss:$16 sps:$4 sm:$0xff]   ;;  %3386 = vmatprep.subr.bf16.mxu0 %v4792_v17  ;;  %v4817_v17 = vld [vmem:[#allocation2 + $0x190] ss:$8 sps:$4 sm:$0xff]  }
 0x195   :  { %2901 = vmatpush1.bf16.msra.mxu1 %v4694_v63  ;;  %2932 = vmatprep.mubr.bf16.mxu1 %v5833_v57  ;;  %v4703_v57 = vld [vmem:[%s6303_s1 + $0xa68] ss:$16 sps:$4 sm:$0xff]   ;;  %v4801_v63 = vld [vmem:[#allocation2 + $0x134] ss:$8 sps:$4 sm:$0xff]  }
 0x196   :  { %2902 = vmatprep.subr.bf16.mxu1 %v4699_v35  ;;  %v4843_v35 = vld [vmem:[%s6307_s5 + $0x10] sm:$0xff]  }
 0x199   :  { %2903 = vmatpush1.bf16.msra.mxu1 %v4697_v48  ;;  %v4844_v48 = vld [vmem:[%s6307_s5 + $0x58] sm:$0xff]  }
 0x19a   :  { %2904 = vmatprep.subr.bf16.mxu1 %v4702_v0  ;;  %v4799_v0 = vld [vmem:[#allocation2 + $0x130] ss:$8 sps:$4 sm:$0xff]  }
 0x19d   :  { %2905 = vmatpush1.bf16.msra.mxu1 %v4700_v1  ;;  %v4804_v1 = vld [vmem:[#allocation2 + $0x144] ss:$8 sps:$4 sm:$0xff]  }
 0x19e   :  { %2906 = vmatprep.subr.bf16.mxu1 %v4705_v51  ;;  %v4845_v51 = vld [vmem:[%s6307_s5 + $0x18] sm:$0xff]  }
 0x1a1   :  { %2907 = vmatpush1.bf16.msra.mxu1 %v4703_v57  ;;  %v4846_v57 = vld [vmem:[%s6307_s5 + $0x60] sm:$0xff]  }
 0x1a2   :  { %2908 = vmatprep.subr.bf16.mxu1 %v4708_v2  ;;  %v4802_v2 = vld [vmem:[#allocation2 + $0x140] ss:$8 sps:$4 sm:$0xff]  }
 0x1a5   :  { %2909 = vmatpush1.bf16.msra.mxu1 %v4706_v42  ;;  %v4807_v42 = vld [vmem:[#allocation2 + $0x154] ss:$8 sps:$4 sm:$0xff]  }
 0x1a6   :  { %2910 = vmatprep.subr.bf16.mxu1 %v4711_v4  ;;  %v4847_v4 = vld [vmem:[%s6307_s5 + $0x20] sm:$0xff]  }
 0x1a9   :  { %2911 = vmatpush1.bf16.msra.mxu1 %v4709_v46  ;;  %v4848_v46 = vld [vmem:[%s6307_s5 + $0x68] sm:$0xff]  }
 0x1aa   :  { %2912 = vmatprep.subr.bf16.mxu1 %v4714_v5  ;;  %v4805_v5 = vld [vmem:[#allocation2 + $0x150] ss:$8 sps:$4 sm:$0xff]  }
 0x1ad   :  { %2913 = vmatpush1.bf16.msra.mxu1 %v4712_v8  ;;  %v4808_v8 = vld [vmem:[#allocation2 + $0x160] ss:$8 sps:$4 sm:$0xff]  }
 0x1ae   :  { %2914 = vmatprep.subr.bf16.mxu1 %v4717_v9  ;;  %v4813_v9 = vld [vmem:[#allocation2 + $0x174] ss:$8 sps:$4 sm:$0xff]  }
 0x1b1   :  { %2915 = vmatpush1.bf16.msra.mxu1 %v4715_v13  ;;  %v4814_v13 = vld [vmem:[#allocation2 + $0x180] ss:$8 sps:$4 sm:$0xff]  }
 0x1b2   :  { %2916 = vmatprep.subr.bf16.mxu1 %v4720_v15  ;;  %v4819_v15 = vld [vmem:[#allocation2 + $0x194] ss:$8 sps:$4 sm:$0xff]  }
 0x1b5   :  { %2917 = vmatpush1.bf16.msra.mxu1 %v4718_v19  ;;  %v4822_v19 = vld [vmem:[#allocation2 + $0x1a4] ss:$8 sps:$4 sm:$0xff]  }
 0x1b6   :  { %2918 = vmatprep.subr.bf16.mxu1 %v4723_v20  ;;  %v4820_v20 = vld [vmem:[#allocation2 + $0x1a0] ss:$8 sps:$4 sm:$0xff]  }
 0x1b9   :  { %2919 = vmatpush1.bf16.msra.mxu1 %v4721_v21  ;;  %v4825_v21 = vld [vmem:[#allocation2 + $0x1b4] ss:$8 sps:$4 sm:$0xff]  }
 0x1ba   :  { %2920 = vmatprep.subr.bf16.mxu1 %v4726_v22  ;;  %v4823_v22 = vld [vmem:[#allocation2 + $0x1b0] ss:$8 sps:$4 sm:$0xff]  }
 0x1bd   :  { %2921 = vmatpush1.bf16.msra.mxu1 %v4724_v23  ;;  %v4828_v23 = vld [vmem:[#allocation2 + $0x1c4] ss:$8 sps:$4 sm:$0xff]  }
 0x1be   :  { %2922 = vmatprep.subr.bf16.mxu1 %v4729_v25  ;;  %v4826_v25 = vld [vmem:[#allocation2 + $0x1c0] ss:$8 sps:$4 sm:$0xff]  }
 0x1c1   :  { %2923 = vmatpush1.bf16.msra.mxu1 %v4727_v26  ;;  %v4831_v26 = vld [vmem:[#allocation2 + $0x1d4] ss:$8 sps:$4 sm:$0xff]  }
 0x1c2   :  { %2924 = vmatprep.subr.bf16.mxu1 %v4732_v27  ;;  %v4829_v27 = vld [vmem:[#allocation2 + $0x1d0] ss:$8 sps:$4 sm:$0xff]  }
 0x1c5   :  { %2925 = vmatpush1.bf16.msra.mxu1 %v4730_v28  ;;  %v4834_v28 = vld [vmem:[#allocation2 + $0x1e4] ss:$8 sps:$4 sm:$0xff]  }
 0x1c6   :  { %2926 = vmatprep.subr.bf16.mxu1 %v4735_v29  ;;  %v4832_v29 = vld [vmem:[#allocation2 + $0x1e0] ss:$8 sps:$4 sm:$0xff]  }
 0x1c9   :  { %2927 = vmatpush1.bf16.msra.mxu1 %v4733_v32  ;;  %v4837_v32 = vld [vmem:[#allocation2 + $0x1f4] ss:$8 sps:$4 sm:$0xff]  }
 0x1ca   :  { %2928 = vmatprep.subr.bf16.mxu1 %v4738_v33  ;;  %v4835_v33 = vld [vmem:[#allocation2 + $0x1f0] ss:$8 sps:$4 sm:$0xff]  }
 0x1cd   :  { %2929 = vmatpush1.bf16.msra.mxu1 %v4736_v34  ;;  %v519_v34 = vsub.s32 2, %v5076_v43 }
 0x1ce   :  { %2930 = vmatprep.subr.bf16.mxu1 %v4741_v37  ;;  %v523_v37 = vsub.s32 3, %v5076_v43 }
 0x1d0   :  { %v524_v41 = vrot.slane %v6217_v39, %v523_v37 }
 0x1d1   :  { %2931 = vmatpush1.bf16.msra.mxu1 %v4739_v38  ;;  %v520_v38 = vrot.slane %v6217_v39, %v519_v34  ;;  %v4851_v39 = vld [vmem:[%s6307_s5 + $0x30] sm:$0xff]  }
 0x1d2   :  { %4088 = vmatprep.subr.bf16.mxu1 %v4838_v11 }
 0x1d4   :  { %2933 = vmatmul.mubr.bf16.vlgmr.msra.gmra.mrb[4].mxu1 %v6016_v30  ;;  %v2486_v30 = vadd.f32 %v5901_v14, %v516_v3  ;;  %v4839_v14 = vld [vmem:[%s6307_s5] sm:$0xff]  }
 0x1d5   :  { %4089 = vmatpush3.bf16.msra.mxu1 %v4839_v14 }
 0x1d6   :  { %4090 = vmatprep.subr.bf16.mxu1 %v4840_v36 }
 0x1d9   :  { %4091 = vmatpush3.bf16.msra.mxu1 %v4841_v60 }
 0x1da   :  { %4092 = vmatprep.subr.bf16.mxu1 %v4842_v61 }
 0x1dd   :  { %4093 = vmatpush3.bf16.msra.mxu1 %v4843_v35 }
 0x1de   :  { %4094 = vmatprep.subr.bf16.mxu1 %v4844_v48 }
 0x1e1   :  { %4095 = vmatpush3.bf16.msra.mxu1 %v4845_v51 }
 0x1e2   :  { %4096 = vmatprep.subr.bf16.mxu1 %v4846_v57 }
 0x1e5   :  { %4097 = vmatpush3.bf16.msra.mxu1 %v4847_v4 }
 0x1e6   :  { %4098 = vmatprep.subr.bf16.mxu1 %v4848_v46 }
 0x1e9   :  { %4099 = vmatpush3.bf16.msra.mxu1 %v4849_v7 }
 0x228   :  { %v2688_v45 = vpop.f32.mrb[0].mxu0 }
 0x229   :  { %v4111_v24 = vadd.f32 %v2688_v45, %v2484_v44  ;;  %v2690_v47 = vpop.f32.mrb[1].mxu0 }
 0x22a   :  { %v4113_v31 = vadd.f32 %v2690_v47, %v2486_v30  ;;  %v2692_v18 = vpop.f32.mrb[2].mxu0 }
 0x22b   :  { %v2941_v50 = vmax.f32 %v4111_v24, 0.0  ;;  %v2693_v52 = vpop.f32.mrb[3].mxu0 }
 0x22c   :  { %v2942_v49 = vmax.f32 %v4113_v31, 0.0 }
 0x22d   :  { %v2945_v55 = vpack.c.bf16 %v2941_v50, %v2941_v50 }
 0x22e   :  { %v2946_v53 = vpack.c.bf16 %v2942_v49, %v2942_v49  ;;  %v4850_v49 = vld [vmem:[%s6307_s5 + $0x70] sm:$0xff]  }
 0x22f   :  { %4100 = vmatprep.subr.bf16.mxu1 %v4850_v49 }
 0x230   :  { %3377 = vmatprep.mubr.bf16.mxu0 %v2946_v53  ;;  %4101 = vmatpush3.bf16.msra.mxu1 %v4851_v39  ;;  %v4852_v53 = vld [vmem:[%s6307_s5 + $0x78] sm:$0xff]  }
 0x231   :  { %3378 = vmatmul.mubr.bf16.vlgmr.msra.gmra.mrb[4].mxu0 %v2945_v55  ;;  %4102 = vmatprep.subr.bf16.mxu1 %v4852_v53  ;;  %v3013_v55 = vld [vmem:[%s6306_s4] sm:$0x3] }
 0x232   :  { %3387 = vmatpush1.bf16.msra.mxu0 %v4790_v54  ;;  %v4853_v54 = vld [vmem:[%s6307_s5 + $0x38] sm:$0xff]   ;;  %v3022_v11 = vrot.slane %v3013_v55, %v515_v40 }
 0x233   :  { %3388 = vmatprep.subr.bf16.mxu0 %v4795_v56  ;;  %v3018_v56 = vrot.slane %v3013_v55, %v511_v16  ;;  %v4071_v16 = vld [vmem:[%s6308_s6] ss:$0 sm:$0xff] }
 0x234   :  { %4103 = vmatpush3.bf16.msra.mxu1 %v4853_v54 }
 0x236   :  { %3389 = vmatpush1.bf16.msra.mxu0 %v4793_v58 }
 0x237   :  { %3390 = vmatprep.subr.bf16.mxu0 %v4798_v59 }
 0x23a   :  { %3391 = vmatpush1.bf16.msra.mxu0 %v4796_v62 }
 0x23b   :  { %3392 = vmatprep.subr.bf16.mxu0 %v4801_v63 }
 0x23e   :  { %3393 = vmatpush1.bf16.msra.mxu0 %v4799_v0 }
 0x23f   :  { %3394 = vmatprep.subr.bf16.mxu0 %v4804_v1 }
 0x242   :  { %3395 = vmatpush1.bf16.msra.mxu0 %v4802_v2 }
 0x243   :  { %3396 = vmatprep.subr.bf16.mxu0 %v4807_v42 }
 0x246   :  { %3397 = vmatpush1.bf16.msra.mxu0 %v4805_v5 }
 0x247   :  { %3398 = vmatprep.subr.bf16.mxu0 %v4810_v6 }
 0x24a   :  { %3399 = vmatpush1.bf16.msra.mxu0 %v4808_v8 }
 0x24b   :  { %3400 = vmatprep.subr.bf16.mxu0 %v4813_v9 }
 0x24e   :  { %3401 = vmatpush1.bf16.msra.mxu0 %v4811_v10 }
 0x24f   :  { %3402 = vmatprep.subr.bf16.mxu0 %v4816_v12 }
 0x252   :  { %3403 = vmatpush1.bf16.msra.mxu0 %v4814_v13 }
 0x253   :  { %3404 = vmatprep.subr.bf16.mxu0 %v4819_v15 }
 0x256   :  { %3405 = vmatpush1.bf16.msra.mxu0 %v4817_v17 }
 0x257   :  { %3406 = vmatprep.subr.bf16.mxu0 %v4822_v19 }
 0x25a   :  { %3407 = vmatpush1.bf16.msra.mxu0 %v4820_v20 }
 0x25b   :  { %3408 = vmatprep.subr.bf16.mxu0 %v4825_v21 }
 0x25e   :  { %3409 = vmatpush1.bf16.msra.mxu0 %v4823_v22 }
 0x25f   :  { %3410 = vmatprep.subr.bf16.mxu0 %v4828_v23 }
 0x262   :  { %3411 = vmatpush1.bf16.msra.mxu0 %v4826_v25 }
 0x263   :  { %3412 = vmatprep.subr.bf16.mxu0 %v4831_v26 }
 0x266   :  { %3413 = vmatpush1.bf16.msra.mxu0 %v4829_v27 }
 0x267   :  { %3414 = vmatprep.subr.bf16.mxu0 %v4834_v28 }
 0x26a   :  { %3415 = vmatpush1.bf16.msra.mxu0 %v4832_v29 }
 0x26b   :  { %3416 = vmatprep.subr.bf16.mxu0 %v4837_v32 }
 0x26e   :  { %3417 = vmatpush1.bf16.msra.mxu0 %v4835_v33 }
 0x2a7   :  { %v2934_v3 = vpop.f32.mrb[4].mxu1 }
 0x2a8   :  { %v4114_v44 = vadd.f32 %v2934_v3, %v520_v38  ;;  %v2936_v30 = vpop.f32.mrb[5].mxu1 }
 0x2a9   :  { %v4115_v45 = vadd.f32 %v2936_v30, %v524_v41  ;;  %v2938_v24 = vpop.f32.mrb[6].mxu1 }
 0x2aa   :  { %v2943_v47 = vmax.f32 %v4114_v44, 0.0  ;;  %v2939_v31 = vpop.f32.mrb[7].mxu1 }
 0x2ab   :  { %v2944_v18 = vmax.f32 %v4115_v45, 0.0 }
 0x2ac   :  { %v2947_v52 = vpack.c.bf16 %v2943_v47, %v2943_v47 }
 0x2ad   :  { %v2948_v50 = vpack.c.bf16 %v2944_v18, %v2944_v18 }
 0x2af   :  { %3418 = vmatprep.mubr.bf16.mxu0 %v2948_v50 }
 0x2b0   :  { %3419 = vmatmul.mubr.bf16.vlgmr.msra.gmra.mrb[4].mxu0 %v2947_v52 }
 0x383   :  { %v3420_v14 = vpop.f32.mrb[4].mxu0 }
 0x384   :  { %v4116_v36 = vadd.f32 %v3420_v14, %v3018_v56  ;;  %v3422_v58 = vpop.f32.mrb[5].mxu0 }
 0x385   :  { %v4117_v59 = vadd.f32 %v3422_v58, %v3022_v11  ;;  %v3424_v60 = vpop.f32.mrb[6].mxu0 }
 0x386   :  { %v3427_v61 = vmax.f32 %v4116_v36, 0.0  ;;  %v3425_v62 = vpop.f32.mrb[7].mxu0 }
 0x387   :  { %v3428_v63 = vmax.f32 %v4117_v59, 0.0 }
 0x388   :  { %v3429_v48 = vpack.c.bf16 %v3427_v61, %v3427_v61 }
 0x389   :  { %v3430_v35 = vpack.c.bf16 %v3428_v63, %v3428_v63 }
 0x38b   :  { %3598 = vmatprep.mubr.bf16.mxu1 %v3430_v35 }
 0x38c   :  { %3599 = vmatmul.mubr.bf16.vlgmr.msra.gmra.mrb[8].mxu1 %v3429_v48 }
 0x45f   :  { %v4104_v0 = vpop.f32.mrb[8].mxu1 }
 0x460   :  { %v4105_v1 = vpop.f32.mrb[9].mxu1 }
 0x461   :  { %v4106_v43 = vadd.f32 %v4105_v1, %v4104_v0  ;;  %v4107_v40 = vpop.f32.mrb[10].mxu1 }
 0x462   :  { %v4108_v51 = vpop.f32.mrb[11].mxu1 }
 0x463   :  { %v3601_v57 = vadd.f32 %v4106_v43, %v4071_v16 }
 0x465   :  { %3607 = vst.msk [vmem:[#allocation5] sm:$0x3] %vm3606_vm0, %v3601_v57 }
 0x466   :  { %4887 = shalt.err (!%p4884_p12)
}
 0x467   :  { %s4888_s6 = scalar_lea.hbm %s6309_s7, 32 }
 0x468   :  { %p4889_p13 = scmp.ne.s32.totalorder %s6309_s7, %s4888_s6  ;;  %p4892_p0 = scmp.lt.u32.totalorder %s4888_s6, %s6309_s7 }
 0x46a   :  { %p4894_p1 = pnand %p4892_p0, %p4889_p13 }
 0x46c   :  { %4897 = shalt.err (!%p4894_p1)
}
 0x46d   :  { %3617 = dma.vmem_to_hbm [thread:$0]  %s3615_s13, 32, %s6309_s7, [#allocation4]  }
 0x46e   :  { %4900 = dma.done.wait [#allocation4], 32  }
 0x46f   :  { %4901 = vsyncadd [#allocation4], 4294967264 }
 0x470   :  { %3621 = vsyncpa [#allocation3], 1 }
 0x471   :  { %3622 = vsyncpa [#allocation4], 1 }

</bundles_post_ra>
